<compile_context>
chip_gen: v7x
topology: tpu7x:2x2x1
jax: 0.10.0
libtpu: 0.0.40
codegen_flags: <defaults>
</compile_context>

<pallas_src>
import functools

import jax
import jax.numpy as jnp
from jax import lax
from jax.experimental import pallas as pl
from jax.experimental.pallas import tpu as pltpu

EPS = 1e-5  # nn.InstanceNorm3d default eps


# --------------------------------------------------------------------------
# Glue: build dense additive attention bias (rel-pos bias + neighborhood mask)
# --------------------------------------------------------------------------
def _build_attn_bias(rpb, spatial, kernel_size):
    """rpb: (heads, 2k0-1, 2k1-1, 2k2-1) -> (heads, N, N) additive bias (f32)."""
    H, W, Z = spatial
    ks = jnp.asarray(kernel_size, jnp.int32)
    dims = jnp.asarray([H, W, Z], jnp.int32)
    nb = ks // 2

    hh, ww, zz = jnp.meshgrid(jnp.arange(H), jnp.arange(W), jnp.arange(Z), indexing="ij")
    coords = jnp.stack([hh, ww, zz], axis=-1).reshape(-1, 3).astype(jnp.int32)      # (N, 3)

    # NATTEN window: start = clamp(q - k//2, 0, L - k); key in window per dim.
    start = jnp.clip(coords - nb[None, :], 0, (dims - ks)[None, :])                 # (N, 3)
    key_c = coords[None, :, :]                                                      # (1, N, 3)
    in_win = jnp.all(
        (key_c >= start[:, None, :]) & (key_c < (start + ks)[:, None, :]), axis=-1  # (N, N)
    )

    # rel-pos-bias index = (key - query) + (k - 1)
    delta = key_c - coords[:, None, :]                                              # (N, N, 3)
    idx = jnp.clip(delta + (ks - 1)[None, None, :], 0, (2 * ks - 2)[None, None, :])
    bias = rpb[:, idx[..., 0], idx[..., 1], idx[..., 2]]                            # (heads, N, N)
    return jnp.where(in_win[None, :, :], bias, jnp.float32(-1e30))


# --------------------------------------------------------------------------
# Pallas kernel: per batch element -> instance norm + neighborhood attention
# --------------------------------------------------------------------------
def _nsam_kernel(x_ref, bias_ref, wqkv_ref, bqkv_ref, wproj_ref, bproj_ref,
                 o_ref, ctx_ref, *, num_heads):
    x = x_ref[0].astype(jnp.float32)                  # (N, C)
    N, C = x.shape
    dh = C // num_heads

    # InstanceNorm3d (affine=False): per-channel mean/var over spatial tokens.
    mean = jnp.mean(x, axis=0, keepdims=True)
    var = jnp.mean((x - mean) ** 2, axis=0, keepdims=True)
    xn = ((x - mean) * lax.rsqrt(var + EPS)).astype(jnp.bfloat16)

    # Single fused qkv projection (attention scale pre-folded into q columns).
    qkv = jnp.dot(xn, wqkv_ref[...], preferred_element_type=jnp.float32)
    qkv = (qkv + bqkv_ref[...]).astype(jnp.bfloat16)  # (N, 3C) bf16 MXU operands

    for h in range(num_heads):                        # static unrolled head loop
        lo = h * dh
        q = qkv[:, lo:lo + dh]
        k = qkv[:, C + lo:C + lo + dh]
        v = qkv[:, 2 * C + lo:2 * C + lo + dh]

        # q @ k^T without materializing the transpose (contract head dims).
        s = lax.dot_general(q, k, (((1,), (1,)), ((), ())),
                            preferred_element_type=jnp.float32)        # (N, N)
        s = s + bias_ref[h].astype(jnp.float32)       # rel-pos bias + window mask
        m = jnp.max(s, axis=-1, keepdims=True)
        p = jnp.exp(s - m)
        r = jnp.sum(p, axis=-1, keepdims=True)
        oh = jnp.dot(p.astype(jnp.bfloat16), v,
                     preferred_element_type=jnp.float32)               # (N, dh)
        # Normalize on the narrow (N, dh) tile; EUP reciprocal is ~free.
        ctx_ref[:, lo:lo + dh] = oh * pl.reciprocal(r, approx=True)

    # One fused output projection for all heads: (N, C) @ (C, C).
    out = jnp.dot(ctx_ref[...].astype(jnp.bfloat16), wproj_ref[...],
                  preferred_element_type=jnp.float32) + bproj_ref[...]
    o_ref[0] = out.astype(o_ref.dtype)


# --------------------------------------------------------------------------
# Wrapper
# --------------------------------------------------------------------------
def self_attention_module(x, params, *, num_heads=8, kernel_size=(3, 3, 3)):
    B, C, H, W, Z = x.shape
    assert C % num_heads == 0
    N = H * W * Z
    dh = C // num_heads

    x_tok = jnp.transpose(x, (0, 2, 3, 4, 1)).reshape(B, N, C)         # keep caller dtype

    # Fold attention scale into the q columns; cast weights to bf16 for the MXU.
    col_scale = jnp.concatenate([
        jnp.full((C,), dh ** -0.5, jnp.float32),
        jnp.ones((2 * C,), jnp.float32),
    ])
    wqkv_b = (params["wqkv"].astype(jnp.float32) * col_scale[None, :]).astype(jnp.bfloat16)
    bqkv_s = params["bqkv"].astype(jnp.float32) * col_scale[None, :]   # stays f32
    wproj_b = params["wproj"].astype(jnp.bfloat16)
    bproj_f = params["bproj"].astype(jnp.float32)

    bias = _build_attn_bias(params["rpb"], (H, W, Z), kernel_size).astype(jnp.bfloat16)

    kernel = functools.partial(_nsam_kernel, num_heads=num_heads)
    out = pl.pallas_call(
        kernel,
        out_shape=jax.ShapeDtypeStruct((B, N, C), x.dtype),
        grid=(B,),
        in_specs=[
            pl.BlockSpec((1, N, C), lambda b: (b, 0, 0)),              # x tokens
            pl.BlockSpec((num_heads, N, N), lambda b: (0, 0, 0)),      # attn bias (bf16)
            pl.BlockSpec((C, 3 * C), lambda b: (0, 0)),                # Wqkv (bf16, q-scaled)
            pl.BlockSpec((1, 3 * C), lambda b: (0, 0)),                # bqkv (f32, q-scaled)
            pl.BlockSpec((C, C), lambda b: (0, 0)),                    # Wproj (bf16)
            pl.BlockSpec((1, C), lambda b: (0, 0)),                    # bproj (f32)
        ],
        out_specs=pl.BlockSpec((1, N, C), lambda b: (b, 0, 0)),
        scratch_shapes=[pltpu.VMEM((N, C), jnp.float32)],              # per-head context
        compiler_params=pltpu.CompilerParams(dimension_semantics=("parallel",)),
    )(x_tok, bias, wqkv_b, bqkv_s, wproj_b, bproj_f)

    return jnp.transpose(out.reshape(B, H, W, Z, C), (0, 4, 1, 2, 3))


# --------------------------------------------------------------------------
# Pure-JAX reference (same math, all f32) for a correctness check
# --------------------------------------------------------------------------
def _reference(x, params, *, num_heads, kernel_size):
    B, C, H, W, Z = x.shape
    N = H * W * Z
    mean = x.mean(axis=(2, 3, 4), keepdims=True)
    var = ((x - mean) ** 2).mean(axis=(2, 3, 4), keepdims=True)
    xn = (x - mean) / jnp.sqrt(var + EPS)

    xt = jnp.transpose(xn, (0, 2, 3, 4, 1)).reshape(B, N, C)
    qkv = xt @ params["wqkv"] + params["bqkv"]
    q, k, v = jnp.split(qkv, 3, axis=-1)
    dh = C // num_heads

    def heads(t):
        return t.reshape(B, N, num_heads, dh).transpose(0, 2, 1, 3)

    q, k, v = heads(q), heads(k), heads(v)
    bias = _build_attn_bias(params["rpb"], (H, W, Z), kernel_size)
    s = jnp.einsum("bhnd,bhmd->bhnm", q, k) * (dh ** -0.5) + bias[None]
    p = jax.nn.softmax(s, axis=-1)
    o = jnp.einsum("bhnm,bhmd->bhnd", p, v).transpose(0, 2, 1, 3).reshape(B, N, C)
    o = o @ params["wproj"] + params["bproj"]
    return jnp.transpose(o.reshape(B, H, W, Z, C), (0, 4, 1, 2, 3))


if __name__ == "__main__":
    B, C, H, W, Z = 2, 32, 4, 4, 4       # embed_dims=32, divisible by num_heads=8
    num_heads = 8
    ks = (3, 3, 3)

    key = jax.random.PRNGKey(0)
    kx, k1, k2, k3, k4, k5 = jax.random.split(key, 6)
    x = jax.random.normal(kx, (B, C, H, W, Z), jnp.float32)

    params = dict(
        wqkv=jax.random.normal(k1, (C, 3 * C), jnp.float32) * 0.02,
        bqkv=jax.random.normal(k2, (1, 3 * C), jnp.float32) * 0.02,
        wproj=jax.random.normal(k3, (C, C), jnp.float32) * 0.02,
        bproj=jax.random.normal(k4, (1, C), jnp.float32) * 0.02,
        rpb=jax.random.normal(
            k5, (num_heads, 2 * ks[0] - 1, 2 * ks[1] - 1, 2 * ks[2] - 1), jnp.float32
        ) * 0.02,
    )

    out = jax.block_until_ready(
        self_attention_module(x, params, num_heads=num_heads, kernel_size=ks)
    )
    ref = jax.block_until_ready(
        _reference(x, params, num_heads=num_heads, kernel_size=ks)
    )

    assert out.shape == x.shape
    assert out.dtype == x.dtype
    assert bool(jnp.all(jnp.isfinite(out)))
    # bf16 MXU operands + approx reciprocal -> slightly relaxed tolerance vs f32 reference.
    assert bool(jnp.allclose(out, ref, atol=5e-3, rtol=5e-3)), float(
        jnp.max(jnp.abs(out - ref))
    )
    print("KERNEL_OK")
</pallas_src>

<mosaic_0001>
module attributes {stable_mosaic.version = 11 : i64} {
  func.func @_nsam_kernel(%arg0: i32, %arg1: memref<1x64x32xf32, #tpu.memory_space<vmem>>, %arg2: memref<8x64x64xbf16, #tpu.memory_space<vmem>>, %arg3: memref<32x96xbf16, #tpu.memory_space<vmem>>, %arg4: memref<1x96xf32, #tpu.memory_space<vmem>>, %arg5: memref<32x32xbf16, #tpu.memory_space<vmem>>, %arg6: memref<1x32xf32, #tpu.memory_space<vmem>>, %arg7: memref<1x64x32xf32, #tpu.memory_space<vmem>>, %arg8: memref<64x32xf32, #tpu.memory_space<vmem>>) attributes {dimension_semantics = [#tpu.dimension_semantics<parallel>], iteration_bounds = array<i64: 2>, scalar_prefetch = 0 : i64, scratch_operands = 1 : i64, tpu.core_type = #tpu.core_type<tc>, window_params = [{transform_indices = @transform_0, window_bounds = array<i64: 1, 64, 32>}, {pipeline_mode = #tpu.pipeline_mode<synchronous>, transform_indices = @transform_1, window_bounds = array<i64: 8, 64, 64>}, {pipeline_mode = #tpu.pipeline_mode<synchronous>, transform_indices = @transform_2, window_bounds = array<i64: 32, 96>}, {pipeline_mode = #tpu.pipeline_mode<synchronous>, transform_indices = @transform_3, window_bounds = array<i64: 1, 96>}, {pipeline_mode = #tpu.pipeline_mode<synchronous>, transform_indices = @transform_4, window_bounds = array<i64: 32, 32>}, {pipeline_mode = #tpu.pipeline_mode<synchronous>, transform_indices = @transform_5, window_bounds = array<i64: 1, 32>}, {transform_indices = @transform_6, window_bounds = array<i64: 1, 64, 32>}]} {
    %c0 = arith.constant 0 : index
    %c0_0 = arith.constant 0 : index
    %c0_1 = arith.constant 0 : index
    %0 = vector.load %arg1[%c0, %c0_0, %c0_1] : memref<1x64x32xf32, #tpu.memory_space<vmem>>, vector<1x64x32xf32>
    %1 = vector.shape_cast %0 : vector<1x64x32xf32> to vector<64x32xf32>
    %cst = arith.constant dense<0.000000e+00> : vector<32xf32>
    %2 = vector.multi_reduction <add>, %1, %cst [0] : vector<64x32xf32> to vector<32xf32>
    %3 = vector.shape_cast %2 : vector<32xf32> to vector<1x32xf32>
    %cst_2 = arith.constant 6.400000e+01 : f32
    %4 = vector.broadcast %cst_2 : f32 to vector<1x32xf32>
    %5 = arith.divf %3, %4 : vector<1x32xf32>
    %6 = vector.broadcast %5 : vector<1x32xf32> to vector<64x32xf32>
    %7 = arith.subf %1, %6 : vector<64x32xf32>
    %8 = arith.mulf %7, %7 : vector<64x32xf32>
    %cst_3 = arith.constant dense<0.000000e+00> : vector<32xf32>
    %9 = vector.multi_reduction <add>, %8, %cst_3 [0] : vector<64x32xf32> to vector<32xf32>
    %10 = vector.shape_cast %9 : vector<32xf32> to vector<1x32xf32>
    %cst_4 = arith.constant 6.400000e+01 : f32
    %11 = vector.broadcast %cst_4 : f32 to vector<1x32xf32>
    %12 = arith.divf %10, %11 : vector<1x32xf32>
    %13 = vector.broadcast %5 : vector<1x32xf32> to vector<64x32xf32>
    %14 = arith.subf %1, %13 : vector<64x32xf32>
    %cst_5 = arith.constant 9.99999974E-6 : f32
    %15 = vector.broadcast %cst_5 : f32 to vector<1x32xf32>
    %16 = arith.addf %12, %15 : vector<1x32xf32>
    %17 = math.rsqrt %16 : vector<1x32xf32>
    %18 = vector.broadcast %17 : vector<1x32xf32> to vector<64x32xf32>
    %19 = arith.mulf %14, %18 : vector<64x32xf32>
    %20 = arith.truncf %19 : vector<64x32xf32> to vector<64x32xbf16>
    %c0_6 = arith.constant 0 : index
    %c0_7 = arith.constant 0 : index
    %21 = vector.load %arg3[%c0_6, %c0_7] : memref<32x96xbf16, #tpu.memory_space<vmem>>, vector<32x96xbf16>
    %cst_8 = arith.constant dense<0.000000e+00> : vector<64x96xf32>
    %22 = tpu.matmul %20, %21, %cst_8 {dimension_numbers = #tpu.dot_dimension_numbers<[1], [0], [0], [1], [0, 0, 1, 1], [], []>} : vector<64x32xbf16>, vector<32x96xbf16>, vector<64x96xf32> -> vector<64x96xf32>
    %c0_9 = arith.constant 0 : index
    %c0_10 = arith.constant 0 : index
    %23 = vector.load %arg4[%c0_9, %c0_10] : memref<1x96xf32, #tpu.memory_space<vmem>>, vector<1x96xf32>
    %24 = vector.broadcast %23 : vector<1x96xf32> to vector<64x96xf32>
    %25 = arith.addf %22, %24 : vector<64x96xf32>
    %26 = arith.truncf %25 : vector<64x96xf32> to vector<64x96xbf16>
    %27 = vector.extract_strided_slice %26 {offsets = [0, 0], sizes = [64, 4], strides = [1, 1]} : vector<64x96xbf16> to vector<64x4xbf16>
    %28 = vector.extract_strided_slice %26 {offsets = [0, 32], sizes = [64, 4], strides = [1, 1]} : vector<64x96xbf16> to vector<64x4xbf16>
    %29 = vector.extract_strided_slice %26 {offsets = [0, 64], sizes = [64, 4], strides = [1, 1]} : vector<64x96xbf16> to vector<64x4xbf16>
    %cst_11 = arith.constant dense<0.000000e+00> : vector<64x64xf32>
    %30 = tpu.matmul %27, %28, %cst_11 {dimension_numbers = #tpu.dot_dimension_numbers<[1], [1], [0], [0], [0, 0, 1, 0], [], []>} : vector<64x4xbf16>, vector<64x4xbf16>, vector<64x64xf32> -> vector<64x64xf32>
    %c0_12 = arith.constant 0 : index
    %c0_13 = arith.constant 0 : index
    %c0_14 = arith.constant 0 : index
    %31 = vector.load %arg2[%c0_12, %c0_13, %c0_14] : memref<8x64x64xbf16, #tpu.memory_space<vmem>>, vector<1x64x64xbf16>
    %32 = vector.shape_cast %31 : vector<1x64x64xbf16> to vector<64x64xbf16>
    %33 = arith.extf %32 : vector<64x64xbf16> to vector<64x64xf32>
    %34 = arith.addf %30, %33 : vector<64x64xf32>
    %cst_15 = arith.constant dense<0xFF800000> : vector<64xf32>
    %35 = vector.multi_reduction <maximumf>, %34, %cst_15 [1] : vector<64x64xf32> to vector<64xf32>
    %36 = vector.shape_cast %35 : vector<64xf32> to vector<64x1xf32>
    %37 = vector.broadcast %36 : vector<64x1xf32> to vector<64x64xf32>
    %38 = arith.subf %34, %37 : vector<64x64xf32>
    %39 = math.exp %38 : vector<64x64xf32>
    %cst_16 = arith.constant dense<0.000000e+00> : vector<64xf32>
    %40 = vector.multi_reduction <add>, %39, %cst_16 [1] : vector<64x64xf32> to vector<64xf32>
    %41 = vector.shape_cast %40 : vector<64xf32> to vector<64x1xf32>
    %42 = arith.truncf %39 : vector<64x64xf32> to vector<64x64xbf16>
    %cst_17 = arith.constant dense<0.000000e+00> : vector<64x4xf32>
    %43 = tpu.matmul %42, %29, %cst_17 {dimension_numbers = #tpu.dot_dimension_numbers<[1], [0], [0], [1], [0, 0, 1, 1], [], []>} : vector<64x64xbf16>, vector<64x4xbf16>, vector<64x4xf32> -> vector<64x4xf32>
    %44 = tpu.reciprocal %41 {approx = true} : vector<64x1xf32> -> vector<64x1xf32>
    %45 = vector.broadcast %44 : vector<64x1xf32> to vector<64x4xf32>
    %46 = arith.mulf %43, %45 : vector<64x4xf32>
    %c0_18 = arith.constant 0 : index
    %c0_19 = arith.constant 0 : index
    %47 = vector.load %arg8[%c0_18, %c0_19] : memref<64x32xf32, #tpu.memory_space<vmem>>, vector<64x4xf32>
    tpu.vector_store %arg8[%c0_18, %c0_19], %46 {strides = array<i32>} : memref<64x32xf32, #tpu.memory_space<vmem>>, vector<64x4xf32>,
    %48 = vector.extract_strided_slice %26 {offsets = [0, 4], sizes = [64, 4], strides = [1, 1]} : vector<64x96xbf16> to vector<64x4xbf16>
    %49 = vector.extract_strided_slice %26 {offsets = [0, 36], sizes = [64, 4], strides = [1, 1]} : vector<64x96xbf16> to vector<64x4xbf16>
    %50 = vector.extract_strided_slice %26 {offsets = [0, 68], sizes = [64, 4], strides = [1, 1]} : vector<64x96xbf16> to vector<64x4xbf16>
    %cst_20 = arith.constant dense<0.000000e+00> : vector<64x64xf32>
    %51 = tpu.matmul %48, %49, %cst_20 {dimension_numbers = #tpu.dot_dimension_numbers<[1], [1], [0], [0], [0, 0, 1, 0], [], []>} : vector<64x4xbf16>, vector<64x4xbf16>, vector<64x64xf32> -> vector<64x64xf32>
    %c1 = arith.constant 1 : index
    %c0_21 = arith.constant 0 : index
    %c0_22 = arith.constant 0 : index
    %52 = vector.load %arg2[%c1, %c0_21, %c0_22] : memref<8x64x64xbf16, #tpu.memory_space<vmem>>, vector<1x64x64xbf16>
    %53 = vector.shape_cast %52 : vector<1x64x64xbf16> to vector<64x64xbf16>
    %54 = arith.extf %53 : vector<64x64xbf16> to vector<64x64xf32>
    %55 = arith.addf %51, %54 : vector<64x64xf32>
    %cst_23 = arith.constant dense<0xFF800000> : vector<64xf32>
    %56 = vector.multi_reduction <maximumf>, %55, %cst_23 [1] : vector<64x64xf32> to vector<64xf32>
    %57 = vector.shape_cast %56 : vector<64xf32> to vector<64x1xf32>
    %58 = vector.broadcast %57 : vector<64x1xf32> to vector<64x64xf32>
    %59 = arith.subf %55, %58 : vector<64x64xf32>
    %60 = math.exp %59 : vector<64x64xf32>
    %cst_24 = arith.constant dense<0.000000e+00> : vector<64xf32>
    %61 = vector.multi_reduction <add>, %60, %cst_24 [1] : vector<64x64xf32> to vector<64xf32>
    %62 = vector.shape_cast %61 : vector<64xf32> to vector<64x1xf32>
    %63 = arith.truncf %60 : vector<64x64xf32> to vector<64x64xbf16>
    %cst_25 = arith.constant dense<0.000000e+00> : vector<64x4xf32>
    %64 = tpu.matmul %63, %50, %cst_25 {dimension_numbers = #tpu.dot_dimension_numbers<[1], [0], [0], [1], [0, 0, 1, 1], [], []>} : vector<64x64xbf16>, vector<64x4xbf16>, vector<64x4xf32> -> vector<64x4xf32>
    %65 = tpu.reciprocal %62 {approx = true} : vector<64x1xf32> -> vector<64x1xf32>
    %66 = vector.broadcast %65 : vector<64x1xf32> to vector<64x4xf32>
    %67 = arith.mulf %64, %66 : vector<64x4xf32>
    %c0_26 = arith.constant 0 : index
    %c4 = arith.constant 4 : index
    %68 = vector.load %arg8[%c0_26, %c4] : memref<64x32xf32, #tpu.memory_space<vmem>>, vector<64x4xf32>
    tpu.vector_store %arg8[%c0_26, %c4], %67 {strides = array<i32>} : memref<64x32xf32, #tpu.memory_space<vmem>>, vector<64x4xf32>,
    %69 = vector.extract_strided_slice %26 {offsets = [0, 8], sizes = [64, 4], strides = [1, 1]} : vector<64x96xbf16> to vector<64x4xbf16>
    %70 = vector.extract_strided_slice %26 {offsets = [0, 40], sizes = [64, 4], strides = [1, 1]} : vector<64x96xbf16> to vector<64x4xbf16>
    %71 = vector.extract_strided_slice %26 {offsets = [0, 72], sizes = [64, 4], strides = [1, 1]} : vector<64x96xbf16> to vector<64x4xbf16>
    %cst_27 = arith.constant dense<0.000000e+00> : vector<64x64xf32>
    %72 = tpu.matmul %69, %70, %cst_27 {dimension_numbers = #tpu.dot_dimension_numbers<[1], [1], [0], [0], [0, 0, 1, 0], [], []>} : vector<64x4xbf16>, vector<64x4xbf16>, vector<64x64xf32> -> vector<64x64xf32>
    %c2 = arith.constant 2 : index
    %c0_28 = arith.constant 0 : index
    %c0_29 = arith.constant 0 : index
    %73 = vector.load %arg2[%c2, %c0_28, %c0_29] : memref<8x64x64xbf16, #tpu.memory_space<vmem>>, vector<1x64x64xbf16>
    %74 = vector.shape_cast %73 : vector<1x64x64xbf16> to vector<64x64xbf16>
    %75 = arith.extf %74 : vector<64x64xbf16> to vector<64x64xf32>
    %76 = arith.addf %72, %75 : vector<64x64xf32>
    %cst_30 = arith.constant dense<0xFF800000> : vector<64xf32>
    %77 = vector.multi_reduction <maximumf>, %76, %cst_30 [1] : vector<64x64xf32> to vector<64xf32>
    %78 = vector.shape_cast %77 : vector<64xf32> to vector<64x1xf32>
    %79 = vector.broadcast %78 : vector<64x1xf32> to vector<64x64xf32>
    %80 = arith.subf %76, %79 : vector<64x64xf32>
    %81 = math.exp %80 : vector<64x64xf32>
    %cst_31 = arith.constant dense<0.000000e+00> : vector<64xf32>
    %82 = vector.multi_reduction <add>, %81, %cst_31 [1] : vector<64x64xf32> to vector<64xf32>
    %83 = vector.shape_cast %82 : vector<64xf32> to vector<64x1xf32>
    %84 = arith.truncf %81 : vector<64x64xf32> to vector<64x64xbf16>
    %cst_32 = arith.constant dense<0.000000e+00> : vector<64x4xf32>
    %85 = tpu.matmul %84, %71, %cst_32 {dimension_numbers = #tpu.dot_dimension_numbers<[1], [0], [0], [1], [0, 0, 1, 1], [], []>} : vector<64x64xbf16>, vector<64x4xbf16>, vector<64x4xf32> -> vector<64x4xf32>
    %86 = tpu.reciprocal %83 {approx = true} : vector<64x1xf32> -> vector<64x1xf32>
    %87 = vector.broadcast %86 : vector<64x1xf32> to vector<64x4xf32>
    %88 = arith.mulf %85, %87 : vector<64x4xf32>
    %c0_33 = arith.constant 0 : index
    %c8 = arith.constant 8 : index
    %89 = vector.load %arg8[%c0_33, %c8] : memref<64x32xf32, #tpu.memory_space<vmem>>, vector<64x4xf32>
    tpu.vector_store %arg8[%c0_33, %c8], %88 {strides = array<i32>} : memref<64x32xf32, #tpu.memory_space<vmem>>, vector<64x4xf32>,
    %90 = vector.extract_strided_slice %26 {offsets = [0, 12], sizes = [64, 4], strides = [1, 1]} : vector<64x96xbf16> to vector<64x4xbf16>
    %91 = vector.extract_strided_slice %26 {offsets = [0, 44], sizes = [64, 4], strides = [1, 1]} : vector<64x96xbf16> to vector<64x4xbf16>
    %92 = vector.extract_strided_slice %26 {offsets = [0, 76], sizes = [64, 4], strides = [1, 1]} : vector<64x96xbf16> to vector<64x4xbf16>
    %cst_34 = arith.constant dense<0.000000e+00> : vector<64x64xf32>
    %93 = tpu.matmul %90, %91, %cst_34 {dimension_numbers = #tpu.dot_dimension_numbers<[1], [1], [0], [0], [0, 0, 1, 0], [], []>} : vector<64x4xbf16>, vector<64x4xbf16>, vector<64x64xf32> -> vector<64x64xf32>
    %c3 = arith.constant 3 : index
    %c0_35 = arith.constant 0 : index
    %c0_36 = arith.constant 0 : index
    %94 = vector.load %arg2[%c3, %c0_35, %c0_36] : memref<8x64x64xbf16, #tpu.memory_space<vmem>>, vector<1x64x64xbf16>
    %95 = vector.shape_cast %94 : vector<1x64x64xbf16> to vector<64x64xbf16>
    %96 = arith.extf %95 : vector<64x64xbf16> to vector<64x64xf32>
    %97 = arith.addf %93, %96 : vector<64x64xf32>
    %cst_37 = arith.constant dense<0xFF800000> : vector<64xf32>
    %98 = vector.multi_reduction <maximumf>, %97, %cst_37 [1] : vector<64x64xf32> to vector<64xf32>
    %99 = vector.shape_cast %98 : vector<64xf32> to vector<64x1xf32>
    %100 = vector.broadcast %99 : vector<64x1xf32> to vector<64x64xf32>
    %101 = arith.subf %97, %100 : vector<64x64xf32>
    %102 = math.exp %101 : vector<64x64xf32>
    %cst_38 = arith.constant dense<0.000000e+00> : vector<64xf32>
    %103 = vector.multi_reduction <add>, %102, %cst_38 [1] : vector<64x64xf32> to vector<64xf32>
    %104 = vector.shape_cast %103 : vector<64xf32> to vector<64x1xf32>
    %105 = arith.truncf %102 : vector<64x64xf32> to vector<64x64xbf16>
    %cst_39 = arith.constant dense<0.000000e+00> : vector<64x4xf32>
    %106 = tpu.matmul %105, %92, %cst_39 {dimension_numbers = #tpu.dot_dimension_numbers<[1], [0], [0], [1], [0, 0, 1, 1], [], []>} : vector<64x64xbf16>, vector<64x4xbf16>, vector<64x4xf32> -> vector<64x4xf32>
    %107 = tpu.reciprocal %104 {approx = true} : vector<64x1xf32> -> vector<64x1xf32>
    %108 = vector.broadcast %107 : vector<64x1xf32> to vector<64x4xf32>
    %109 = arith.mulf %106, %108 : vector<64x4xf32>
    %c0_40 = arith.constant 0 : index
    %c12 = arith.constant 12 : index
    %110 = vector.load %arg8[%c0_40, %c12] : memref<64x32xf32, #tpu.memory_space<vmem>>, vector<64x4xf32>
    tpu.vector_store %arg8[%c0_40, %c12], %109 {strides = array<i32>} : memref<64x32xf32, #tpu.memory_space<vmem>>, vector<64x4xf32>,
    %111 = vector.extract_strided_slice %26 {offsets = [0, 16], sizes = [64, 4], strides = [1, 1]} : vector<64x96xbf16> to vector<64x4xbf16>
    %112 = vector.extract_strided_slice %26 {offsets = [0, 48], sizes = [64, 4], strides = [1, 1]} : vector<64x96xbf16> to vector<64x4xbf16>
    %113 = vector.extract_strided_slice %26 {offsets = [0, 80], sizes = [64, 4], strides = [1, 1]} : vector<64x96xbf16> to vector<64x4xbf16>
    %cst_41 = arith.constant dense<0.000000e+00> : vector<64x64xf32>
    %114 = tpu.matmul %111, %112, %cst_41 {dimension_numbers = #tpu.dot_dimension_numbers<[1], [1], [0], [0], [0, 0, 1, 0], [], []>} : vector<64x4xbf16>, vector<64x4xbf16>, vector<64x64xf32> -> vector<64x64xf32>
    %c4_42 = arith.constant 4 : index
    %c0_43 = arith.constant 0 : index
    %c0_44 = arith.constant 0 : index
    %115 = vector.load %arg2[%c4_42, %c0_43, %c0_44] : memref<8x64x64xbf16, #tpu.memory_space<vmem>>, vector<1x64x64xbf16>
    %116 = vector.shape_cast %115 : vector<1x64x64xbf16> to vector<64x64xbf16>
    %117 = arith.extf %116 : vector<64x64xbf16> to vector<64x64xf32>
    %118 = arith.addf %114, %117 : vector<64x64xf32>
    %cst_45 = arith.constant dense<0xFF800000> : vector<64xf32>
    %119 = vector.multi_reduction <maximumf>, %118, %cst_45 [1] : vector<64x64xf32> to vector<64xf32>
    %120 = vector.shape_cast %119 : vector<64xf32> to vector<64x1xf32>
    %121 = vector.broadcast %120 : vector<64x1xf32> to vector<64x64xf32>
    %122 = arith.subf %118, %121 : vector<64x64xf32>
    %123 = math.exp %122 : vector<64x64xf32>
    %cst_46 = arith.constant dense<0.000000e+00> : vector<64xf32>
    %124 = vector.multi_reduction <add>, %123, %cst_46 [1] : vector<64x64xf32> to vector<64xf32>
    %125 = vector.shape_cast %124 : vector<64xf32> to vector<64x1xf32>
    %126 = arith.truncf %123 : vector<64x64xf32> to vector<64x64xbf16>
    %cst_47 = arith.constant dense<0.000000e+00> : vector<64x4xf32>
    %127 = tpu.matmul %126, %113, %cst_47 {dimension_numbers = #tpu.dot_dimension_numbers<[1], [0], [0], [1], [0, 0, 1, 1], [], []>} : vector<64x64xbf16>, vector<64x4xbf16>, vector<64x4xf32> -> vector<64x4xf32>
    %128 = tpu.reciprocal %125 {approx = true} : vector<64x1xf32> -> vector<64x1xf32>
    %129 = vector.broadcast %128 : vector<64x1xf32> to vector<64x4xf32>
    %130 = arith.mulf %127, %129 : vector<64x4xf32>
    %c0_48 = arith.constant 0 : index
    %c16 = arith.constant 16 : index
    %131 = vector.load %arg8[%c0_48, %c16] : memref<64x32xf32, #tpu.memory_space<vmem>>, vector<64x4xf32>
    tpu.vector_store %arg8[%c0_48, %c16], %130 {strides = array<i32>} : memref<64x32xf32, #tpu.memory_space<vmem>>, vector<64x4xf32>,
    %132 = vector.extract_strided_slice %26 {offsets = [0, 20], sizes = [64, 4], strides = [1, 1]} : vector<64x96xbf16> to vector<64x4xbf16>
    %133 = vector.extract_strided_slice %26 {offsets = [0, 52], sizes = [64, 4], strides = [1, 1]} : vector<64x96xbf16> to vector<64x4xbf16>
    %134 = vector.extract_strided_slice %26 {offsets = [0, 84], sizes = [64, 4], strides = [1, 1]} : vector<64x96xbf16> to vector<64x4xbf16>
    %cst_49 = arith.constant dense<0.000000e+00> : vector<64x64xf32>
    %135 = tpu.matmul %132, %133, %cst_49 {dimension_numbers = #tpu.dot_dimension_numbers<[1], [1], [0], [0], [0, 0, 1, 0], [], []>} : vector<64x4xbf16>, vector<64x4xbf16>, vector<64x64xf32> -> vector<64x64xf32>
    %c5 = arith.constant 5 : index
    %c0_50 = arith.constant 0 : index
    %c0_51 = arith.constant 0 : index
    %136 = vector.load %arg2[%c5, %c0_50, %c0_51] : memref<8x64x64xbf16, #tpu.memory_space<vmem>>, vector<1x64x64xbf16>
    %137 = vector.shape_cast %136 : vector<1x64x64xbf16> to vector<64x64xbf16>
    %138 = arith.extf %137 : vector<64x64xbf16> to vector<64x64xf32>
    %139 = arith.addf %135, %138 : vector<64x64xf32>
    %cst_52 = arith.constant dense<0xFF800000> : vector<64xf32>
    %140 = vector.multi_reduction <maximumf>, %139, %cst_52 [1] : vector<64x64xf32> to vector<64xf32>
    %141 = vector.shape_cast %140 : vector<64xf32> to vector<64x1xf32>
    %142 = vector.broadcast %141 : vector<64x1xf32> to vector<64x64xf32>
    %143 = arith.subf %139, %142 : vector<64x64xf32>
    %144 = math.exp %143 : vector<64x64xf32>
    %cst_53 = arith.constant dense<0.000000e+00> : vector<64xf32>
    %145 = vector.multi_reduction <add>, %144, %cst_53 [1] : vector<64x64xf32> to vector<64xf32>
    %146 = vector.shape_cast %145 : vector<64xf32> to vector<64x1xf32>
    %147 = arith.truncf %144 : vector<64x64xf32> to vector<64x64xbf16>
    %cst_54 = arith.constant dense<0.000000e+00> : vector<64x4xf32>
    %148 = tpu.matmul %147, %134, %cst_54 {dimension_numbers = #tpu.dot_dimension_numbers<[1], [0], [0], [1], [0, 0, 1, 1], [], []>} : vector<64x64xbf16>, vector<64x4xbf16>, vector<64x4xf32> -> vector<64x4xf32>
    %149 = tpu.reciprocal %146 {approx = true} : vector<64x1xf32> -> vector<64x1xf32>
    %150 = vector.broadcast %149 : vector<64x1xf32> to vector<64x4xf32>
    %151 = arith.mulf %148, %150 : vector<64x4xf32>
    %c0_55 = arith.constant 0 : index
    %c20 = arith.constant 20 : index
    %152 = vector.load %arg8[%c0_55, %c20] : memref<64x32xf32, #tpu.memory_space<vmem>>, vector<64x4xf32>
    tpu.vector_store %arg8[%c0_55, %c20], %151 {strides = array<i32>} : memref<64x32xf32, #tpu.memory_space<vmem>>, vector<64x4xf32>,
    %153 = vector.extract_strided_slice %26 {offsets = [0, 24], sizes = [64, 4], strides = [1, 1]} : vector<64x96xbf16> to vector<64x4xbf16>
    %154 = vector.extract_strided_slice %26 {offsets = [0, 56], sizes = [64, 4], strides = [1, 1]} : vector<64x96xbf16> to vector<64x4xbf16>
    %155 = vector.extract_strided_slice %26 {offsets = [0, 88], sizes = [64, 4], strides = [1, 1]} : vector<64x96xbf16> to vector<64x4xbf16>
    %cst_56 = arith.constant dense<0.000000e+00> : vector<64x64xf32>
    %156 = tpu.matmul %153, %154, %cst_56 {dimension_numbers = #tpu.dot_dimension_numbers<[1], [1], [0], [0], [0, 0, 1, 0], [], []>} : vector<64x4xbf16>, vector<64x4xbf16>, vector<64x64xf32> -> vector<64x64xf32>
    %c6 = arith.constant 6 : index
    %c0_57 = arith.constant 0 : index
    %c0_58 = arith.constant 0 : index
    %157 = vector.load %arg2[%c6, %c0_57, %c0_58] : memref<8x64x64xbf16, #tpu.memory_space<vmem>>, vector<1x64x64xbf16>
    %158 = vector.shape_cast %157 : vector<1x64x64xbf16> to vector<64x64xbf16>
    %159 = arith.extf %158 : vector<64x64xbf16> to vector<64x64xf32>
    %160 = arith.addf %156, %159 : vector<64x64xf32>
    %cst_59 = arith.constant dense<0xFF800000> : vector<64xf32>
    %161 = vector.multi_reduction <maximumf>, %160, %cst_59 [1] : vector<64x64xf32> to vector<64xf32>
    %162 = vector.shape_cast %161 : vector<64xf32> to vector<64x1xf32>
    %163 = vector.broadcast %162 : vector<64x1xf32> to vector<64x64xf32>
    %164 = arith.subf %160, %163 : vector<64x64xf32>
    %165 = math.exp %164 : vector<64x64xf32>
    %cst_60 = arith.constant dense<0.000000e+00> : vector<64xf32>
    %166 = vector.multi_reduction <add>, %165, %cst_60 [1] : vector<64x64xf32> to vector<64xf32>
    %167 = vector.shape_cast %166 : vector<64xf32> to vector<64x1xf32>
    %168 = arith.truncf %165 : vector<64x64xf32> to vector<64x64xbf16>
    %cst_61 = arith.constant dense<0.000000e+00> : vector<64x4xf32>
    %169 = tpu.matmul %168, %155, %cst_61 {dimension_numbers = #tpu.dot_dimension_numbers<[1], [0], [0], [1], [0, 0, 1, 1], [], []>} : vector<64x64xbf16>, vector<64x4xbf16>, vector<64x4xf32> -> vector<64x4xf32>
    %170 = tpu.reciprocal %167 {approx = true} : vector<64x1xf32> -> vector<64x1xf32>
    %171 = vector.broadcast %170 : vector<64x1xf32> to vector<64x4xf32>
    %172 = arith.mulf %169, %171 : vector<64x4xf32>
    %c0_62 = arith.constant 0 : index
    %c24 = arith.constant 24 : index
    %173 = vector.load %arg8[%c0_62, %c24] : memref<64x32xf32, #tpu.memory_space<vmem>>, vector<64x4xf32>
    tpu.vector_store %arg8[%c0_62, %c24], %172 {strides = array<i32>} : memref<64x32xf32, #tpu.memory_space<vmem>>, vector<64x4xf32>,
    %174 = vector.extract_strided_slice %26 {offsets = [0, 28], sizes = [64, 4], strides = [1, 1]} : vector<64x96xbf16> to vector<64x4xbf16>
    %175 = vector.extract_strided_slice %26 {offsets = [0, 60], sizes = [64, 4], strides = [1, 1]} : vector<64x96xbf16> to vector<64x4xbf16>
    %176 = vector.extract_strided_slice %26 {offsets = [0, 92], sizes = [64, 4], strides = [1, 1]} : vector<64x96xbf16> to vector<64x4xbf16>
    %cst_63 = arith.constant dense<0.000000e+00> : vector<64x64xf32>
    %177 = tpu.matmul %174, %175, %cst_63 {dimension_numbers = #tpu.dot_dimension_numbers<[1], [1], [0], [0], [0, 0, 1, 0], [], []>} : vector<64x4xbf16>, vector<64x4xbf16>, vector<64x64xf32> -> vector<64x64xf32>
    %c7 = arith.constant 7 : index
    %c0_64 = arith.constant 0 : index
    %c0_65 = arith.constant 0 : index
    %178 = vector.load %arg2[%c7, %c0_64, %c0_65] : memref<8x64x64xbf16, #tpu.memory_space<vmem>>, vector<1x64x64xbf16>
    %179 = vector.shape_cast %178 : vector<1x64x64xbf16> to vector<64x64xbf16>
    %180 = arith.extf %179 : vector<64x64xbf16> to vector<64x64xf32>
    %181 = arith.addf %177, %180 : vector<64x64xf32>
    %cst_66 = arith.constant dense<0xFF800000> : vector<64xf32>
    %182 = vector.multi_reduction <maximumf>, %181, %cst_66 [1] : vector<64x64xf32> to vector<64xf32>
    %183 = vector.shape_cast %182 : vector<64xf32> to vector<64x1xf32>
    %184 = vector.broadcast %183 : vector<64x1xf32> to vector<64x64xf32>
    %185 = arith.subf %181, %184 : vector<64x64xf32>
    %186 = math.exp %185 : vector<64x64xf32>
    %cst_67 = arith.constant dense<0.000000e+00> : vector<64xf32>
    %187 = vector.multi_reduction <add>, %186, %cst_67 [1] : vector<64x64xf32> to vector<64xf32>
    %188 = vector.shape_cast %187 : vector<64xf32> to vector<64x1xf32>
    %189 = arith.truncf %186 : vector<64x64xf32> to vector<64x64xbf16>
    %cst_68 = arith.constant dense<0.000000e+00> : vector<64x4xf32>
    %190 = tpu.matmul %189, %176, %cst_68 {dimension_numbers = #tpu.dot_dimension_numbers<[1], [0], [0], [1], [0, 0, 1, 1], [], []>} : vector<64x64xbf16>, vector<64x4xbf16>, vector<64x4xf32> -> vector<64x4xf32>
    %191 = tpu.reciprocal %188 {approx = true} : vector<64x1xf32> -> vector<64x1xf32>
    %192 = vector.broadcast %191 : vector<64x1xf32> to vector<64x4xf32>
    %193 = arith.mulf %190, %192 : vector<64x4xf32>
    %c0_69 = arith.constant 0 : index
    %c28 = arith.constant 28 : index
    %194 = vector.load %arg8[%c0_69, %c28] : memref<64x32xf32, #tpu.memory_space<vmem>>, vector<64x4xf32>
    tpu.vector_store %arg8[%c0_69, %c28], %193 {strides = array<i32>} : memref<64x32xf32, #tpu.memory_space<vmem>>, vector<64x4xf32>,
    %c0_70 = arith.constant 0 : index
    %c0_71 = arith.constant 0 : index
    %195 = vector.load %arg8[%c0_70, %c0_71] : memref<64x32xf32, #tpu.memory_space<vmem>>, vector<64x32xf32>
    %196 = arith.truncf %195 : vector<64x32xf32> to vector<64x32xbf16>
    %c0_72 = arith.constant 0 : index
    %c0_73 = arith.constant 0 : index
    %197 = vector.load %arg5[%c0_72, %c0_73] : memref<32x32xbf16, #tpu.memory_space<vmem>>, vector<32x32xbf16>
    %cst_74 = arith.constant dense<0.000000e+00> : vector<64x32xf32>
    %198 = tpu.matmul %196, %197, %cst_74 {dimension_numbers = #tpu.dot_dimension_numbers<[1], [0], [0], [1], [0, 0, 1, 1], [], []>} : vector<64x32xbf16>, vector<32x32xbf16>, vector<64x32xf32> -> vector<64x32xf32>
    %c0_75 = arith.constant 0 : index
    %c0_76 = arith.constant 0 : index
    %199 = vector.load %arg6[%c0_75, %c0_76] : memref<1x32xf32, #tpu.memory_space<vmem>>, vector<1x32xf32>
    %200 = vector.broadcast %199 : vector<1x32xf32> to vector<64x32xf32>
    %201 = arith.addf %198, %200 : vector<64x32xf32>
    %c0_77 = arith.constant 0 : index
    %c0_78 = arith.constant 0 : index
    %c0_79 = arith.constant 0 : index
    %202 = vector.load %arg7[%c0_77, %c0_78, %c0_79] : memref<1x64x32xf32, #tpu.memory_space<vmem>>, vector<1x64x32xf32>
    %203 = vector.shape_cast %202 : vector<1x64x32xf32> to vector<64x32xf32>
    %204 = vector.shape_cast %201 : vector<64x32xf32> to vector<1x64x32xf32>
    tpu.vector_store %arg7[%c0_77, %c0_78, %c0_79], %204 {strides = array<i32>} : memref<1x64x32xf32, #tpu.memory_space<vmem>>, vector<1x64x32xf32>,
    return
  }
  func.func @transform_0(%arg0: i32) -> (i32, i32, i32) {
    %c0_i32 = arith.constant 0 : i32
    %c0_i32_0 = arith.constant 0 : i32
    %c0_i32_1 = arith.constant 0 : i32
    return %arg0, %c0_i32, %c0_i32_0 : i32, i32, i32
  }
  func.func @transform_1(%arg0: i32) -> (i32, i32, i32) {
    %c0_i32 = arith.constant 0 : i32
    %c0_i32_0 = arith.constant 0 : i32
    %c0_i32_1 = arith.constant 0 : i32
    %c0_i32_2 = arith.constant 0 : i32
    return %c0_i32, %c0_i32_0, %c0_i32_1 : i32, i32, i32
  }
  func.func @transform_2(%arg0: i32) -> (i32, i32) {
    %c0_i32 = arith.constant 0 : i32
    %c0_i32_0 = arith.constant 0 : i32
    %c0_i32_1 = arith.constant 0 : i32
    return %c0_i32, %c0_i32_0 : i32, i32
  }
  func.func @transform_3(%arg0: i32) -> (i32, i32) {
    %c0_i32 = arith.constant 0 : i32
    %c0_i32_0 = arith.constant 0 : i32
    %c0_i32_1 = arith.constant 0 : i32
    return %c0_i32, %c0_i32_0 : i32, i32
  }
  func.func @transform_4(%arg0: i32) -> (i32, i32) {
    %c0_i32 = arith.constant 0 : i32
    %c0_i32_0 = arith.constant 0 : i32
    %c0_i32_1 = arith.constant 0 : i32
    return %c0_i32, %c0_i32_0 : i32, i32
  }
  func.func @transform_5(%arg0: i32) -> (i32, i32) {
    %c0_i32 = arith.constant 0 : i32
    %c0_i32_0 = arith.constant 0 : i32
    %c0_i32_1 = arith.constant 0 : i32
    return %c0_i32, %c0_i32_0 : i32, i32
  }
  func.func @transform_6(%arg0: i32) -> (i32, i32, i32) {
    %c0_i32 = arith.constant 0 : i32
    %c0_i32_0 = arith.constant 0 : i32
    %c0_i32_1 = arith.constant 0 : i32
    return %arg0, %c0_i32, %c0_i32_0 : i32, i32, i32
  }
}

</mosaic_0001>

<bundles_post_ra>
// kernel: tpu_custom_call.1
= control target key start
LH: loop header
LB: loop body
LE: loop exit
PB: predicated region body
PF: predicated region fallthrough
CT: control target
= control target key end

     0   :  { %11 = vsyncpa [#allocation4], 0  ;;  %s4477_s21 = smov 0   ;;  %s5742_s0 = inlined_call_operand.vmem [shape: f32[2,64,32], index: 0, kind: input, shape index: {}]   ;;  %s5743_s1 = inlined_call_operand.hbm [shape: bf16[8,64,64], index: 1, kind: input, shape index: {}]   ;;  %s5744_s2 = inlined_call_operand.vmem [shape: bf16[32,96], index: 2, kind: input, shape index: {}]   ;;  %s5745_s3 = inlined_call_operand.vmem [shape: f32[1,96], index: 3, kind: input, shape index: {}]   ;;  %s5746_s4 = inlined_call_operand.vmem [shape: bf16[32,32], index: 4, kind: input, shape index: {}]   ;;  %s5747_s5 = inlined_call_operand.vmem [shape: f32[1,32], index: 5, kind: input, shape index: {}]   ;;  %s5748_s6 = inlined_call_operand.vmem [shape: f32[2,64,32], index: 6, kind: output, shape index: {}]  }
   0x1 LB: > { %s4483_s22 = sadd.s32 4294967295, %s4407_s21   ;;  %p3361_p0 = scmp.ge.s32.totalorder %s4407_s21, 1  ;;  %s4407_s21 = sphi %s4477_s21, %s17_s21  }
   0x2   : > { %p179_p1 = scmp.lt.s32.totalorder %s4407_s21, 3  ;;  %s4409_s23 = smov [#allocation3]  }
   0x3   : > { %s191_s24 = sshll.u32 %s4409_s23, 4  ;;  %p5749_p3 = scmp.eq.s32.totalorder %s4483_s22, 0  ;;  %s192_s24 = int_to_ptr.vmem [resolvable:$true] %s191_s24 }
   0x4   : > { %p4487_p2 = pnand %p3361_p0, %p179_p1  ;;  %s4369_s29 = scalar_lea.hbm %s5743_s1, 4096 }
   0x5   : > { %p4370_p6 = scmp.ne.s32.totalorder %s5743_s1, %s4369_s29  ;;  %p4376_p10 = scmp.lt.u32.totalorder %s4369_s29, %s5743_s1 }
   0x6   : > { %s5762_s25 = scalar_select %p4487_p2, 1, 0 }
   0x7   : > { %p4060_p4 = pneg %p4487_p2 }
   0x9   : > { %p4496_p5 = pnand %p5749_p3, %p4060_p4 }
   0xb   : > { %p4371_p7 = pneg %p4496_p5 }
   0xd   : > { %p4372_p8 = pnand %p4371_p7, %p4370_p6 }
   0xf   : > { %p4373_p9 = pneg %p4372_p8 }
  0x11   : > { %p4378_p11 = pnand %p4376_p10, %p4373_p9 }
  0x13   : > { %4381 = shalt.err (!%p4378_p11)
}
  0x14   : > { %s4382_s10 = scalar_lea.vmem %s192_s24, 4096  ;;  %p4390_p1 = scmp.lt.s32.totalorder %s192_s24, %s192_s24 }
  0x15   : > { %p4383_p12 = scmp.ne.s32.totalorder %s192_s24, %s4382_s10  ;;  %p4391_p4 = scmp.lt.s32.totalorder %s4382_s10, %s4382_s10 }
  0x17   : > { %p4385_p13 = pnand %p4383_p12, %p4371_p7  ;;  %p4392_p3 = por %p4391_p4, %p4390_p1 }
  0x19   : > { %p4386_p0 = pneg %p4385_p13 }
  0x1b   : > { %p4393_p2 = pnand %p4392_p3, %p4386_p0 }
  0x1d   : > { %4396 = shalt.err (!%p4393_p2)
}
  0x1e   : > { %s4410_s11 = smov 64   ;;  %s4411_s12 = smov 4  }
  0x1f   : > { %4063 = dma.hbm_to_vmem [thread:$0]  (!%p4496_p5), %s5743_s1, 4096, %s192_s24, [#allocation4], %s4410_s11, %s4410_s11, %s4411_s12  }
  0x20   : > { %p5764_p6 = scmp.ne.s32.totalorder %s5762_s25, 0 }
  0x22   : > { %227 = sbr.rel (%p5764_p6) target bundleno = 4559 (0x11cf), region = 44 }
  0x29   : > { %p5765_p8 = scmp.eq.s32.totalorder %s4483_s22, 0 }
  0x2b   : > { %4402 = dma.done.wait (%p5765_p8), [#allocation4], 4096   ;;  %p5766_p7 = pmov %p5765_p8 }
  0x2c   : > { %p257_p2 = scmp.lt.s32.totalorder %s4483_s22, 1  ;;  %v4107_v0 = vld [vmem:[%s5744_s2] sm:$0xff]   ;;  %vm276_vm0 = vcmask 261120   ;;  %v4108_v1 = vld [vmem:[%s5744_s2 + $0x8] sm:$0xff]   ;;  %vm484_vm1 = vcmask 31744   ;;  %s4412_s27 = smov 96  }
  0x2d   : > { %4404 = vsyncadd (%p5766_p7), [#allocation4], 4294963200  ;;  %3744 = vmatprep.subr.bf16.mxu0 %v4107_v0  ;;  %s4413_s28 = smov 64   ;;  %s4414_s29 = smov 92   ;;  %vm574_vm2 = vcmask 523264   ;;  %vm1099_vm3 = vcmask 64544  }
  0x2e   : > { %s5902_s22 = smov (!%p257_p2, %s4483_s22), 1  ;;  %3745 = vmatpush3.bf16.msra.mxu0 %v4107_v0  ;;  %s4415_s30 = smov 124   ;;  %vm1443_vm4 = vcmask 97344   ;;  %vm1787_vm5 = vcmask 130144   ;;  %vm2131_vm6 = vcmask 162944   ;;  %vm2475_vm7 = vcmask 195744  }
  0x2f   : > { %s3450_s15 = sshll.u32 %s5902_s22, 6  ;;  %3746 = vmatprep.subr.bf16.mxu0 %v4108_v1  ;;  %s4416_s7 = smov 60   ;;  %vm2819_vm8 = vcmask 228544   ;;  %vm3163_vm9 = vcmask 261344  }
  0x30   : > { %s261_s18 = scalar_lea.vmem %s5742_s0, %s3450_s15  ;;  %s4417_s8 = smov 88  }
  0x31   : > { %v268_v2 = vld [vmem:[%s261_s18] sm:$0xff]  ;;  %v269_v3 = vld [vmem:[%s261_s18 + $0x8] sm:$0xff]  ;;  %v270_v4 = vld [vmem:[%s261_s18 + $0x10] sm:$0xff]  ;;  %s4418_s9 = smov 120   ;;  %s4419_s10 = smov 56  }
  0x32   : > { %v271_v5 = vld [vmem:[%s261_s18 + $0x18] sm:$0xff]  ;;  %v277_v6 = vsel %vm276_vm0, %v268_v2, 0.0  ;;  %v278_v7 = vsel %vm276_vm0, %v269_v3, 0.0  ;;  %v280_v8 = vsel %vm276_vm0, %v270_v4, 0.0  ;;  %v272_v9 = vld [vmem:[%s261_s18 + $0x20] sm:$0xff]  ;;  %v273_v12 = vld [vmem:[%s261_s18 + $0x28] sm:$0xff]  ;;  %3747 = vmatpush3.bf16.msra.mxu0 %v4108_v1 }
  0x33   : > { %v279_v10 = vadd.f32 %v278_v7, %v277_v6  ;;  %v282_v11 = vsel %vm276_vm0, %v271_v5, 0.0  ;;  %v284_v14 = vsel %vm276_vm0, %v272_v9, 0.0  ;;  %v274_v15 = vld [vmem:[%s261_s18 + $0x30] sm:$0xff]  ;;  %v286_v17 = vsel %vm276_vm0, %v273_v12, 0.0  ;;  %v275_v18 = vld [vmem:[%s261_s18 + $0x38] sm:$0xff]  ;;  %s4420_s11 = smov 84  }
  0x34   : > { %v288_v20 = vsel %vm276_vm0, %v274_v15, 0.0  ;;  %v290_v22 = vsel %vm276_vm0, %v275_v18, 0.0  ;;  %s4421_s12 = smov 116   ;;  %s4422_s13 = smov 52  }
  0x35   : > { %v281_v13 = vadd.f32 %v280_v8, %v279_v10  ;;  %s4423_s14 = smov 80   ;;  %s4424_s16 = smov 112  }
  0x36   : > { %s4425_s17 = smov 48   ;;  %s4426_s18 = smov 76  }
  0x37   : > { %v283_v16 = vadd.f32 %v282_v11, %v281_v13  ;;  %s4427_s19 = smov 108   ;;  %s4428_s20 = smov 44  }
  0x38   : > { %s4429_s23 = smov 72   ;;  %s4430_s24 = smov 104  }
  0x39   : > { %v285_v19 = vadd.f32 %v284_v14, %v283_v16  ;;  %s4431_s25 = smov 40   ;;  %s4432_s26 = smov 68  }
  0x3b   : > { %v287_v21 = vadd.f32 %v286_v17, %v285_v19 }
  0x3d   : > { %v289_v23 = vadd.f32 %v288_v20, %v287_v21  ;;  %v3370_v21 = vld [vmem:[%s5745_s3] ss:$0 sm:$0xff] }
  0x3f   : > { %v291_v24 = vadd.f32 %v290_v22, %v289_v23 }
  0x41   : > { %v292_v25 = vrot.slane %v291_v24, 4 }
  0x43   : > { %v293_v26 = vadd.f32 %v292_v25, %v291_v24 }
  0x45   : > { %v294_v27 = vrot.slane %v293_v26, 2 }
  0x47   : > { %v295_v28 = vadd.f32 %v294_v27, %v293_v26 }
  0x49   : > { %v296_v29 = vrot.slane %v295_v28, 1 }
  0x4b   : > { %v297_v30 = vadd.f32 %v296_v29, %v295_v28 }
  0x4d   : > { %v299_v31 = vmul.f32 0.015625, %v297_v30 }
  0x4f   : > { %v300_v32 = vsub.f32 %v268_v2, %v299_v31  ;;  %v301_v33 = vsub.f32 %v269_v3, %v299_v31  ;;  %v302_v34 = vsub.f32 %v270_v4, %v299_v31  ;;  %v303_v35 = vsub.f32 %v271_v5, %v299_v31 }
  0x50   : > { %v304_v36 = vsub.f32 %v272_v9, %v299_v31  ;;  %v305_v37 = vsub.f32 %v273_v12, %v299_v31  ;;  %v306_v42 = vsub.f32 %v274_v15, %v299_v31  ;;  %v307_v48 = vsub.f32 %v275_v18, %v299_v31 }
  0x51   : > { %v308_v38 = vmul.f32 %v300_v32, %v300_v32  ;;  %v309_v39 = vmul.f32 %v301_v33, %v301_v33  ;;  %v310_v40 = vmul.f32 %v302_v34, %v302_v34  ;;  %v311_v41 = vmul.f32 %v303_v35, %v303_v35 }
  0x52   : > { %v312_v43 = vmul.f32 %v304_v36, %v304_v36  ;;  %v313_v49 = vmul.f32 %v305_v37, %v305_v37  ;;  %v314_v52 = vmul.f32 %v306_v42, %v306_v42  ;;  %v315_v55 = vmul.f32 %v307_v48, %v307_v48 }
  0x53   : > { %v316_v44 = vsel %vm276_vm0, %v308_v38, 0.0  ;;  %v317_v45 = vsel %vm276_vm0, %v309_v39, 0.0  ;;  %v319_v46 = vsel %vm276_vm0, %v310_v40, 0.0  ;;  %v321_v50 = vsel %vm276_vm0, %v311_v41, 0.0 }
  0x54   : > { %v318_v47 = vadd.f32 %v317_v45, %v316_v44  ;;  %v323_v53 = vsel %vm276_vm0, %v312_v43, 0.0  ;;  %v325_v56 = vsel %vm276_vm0, %v313_v49, 0.0  ;;  %v327_v58 = vsel %vm276_vm0, %v314_v52, 0.0 }
  0x55   : > { %v329_v60 = vsel %vm276_vm0, %v315_v55, 0.0  ;;  %v3453_v55 = vld [vmem:[#allocation3] sm:$0xff]  }
  0x56   : > { %v320_v51 = vadd.f32 %v319_v46, %v318_v47 }
  0x58   : > { %v322_v54 = vadd.f32 %v321_v50, %v320_v51 }
  0x5a   : > { %v324_v57 = vadd.f32 %v323_v53, %v322_v54  ;;  %v3580_v54 = vld [vmem:[#allocation3 + $0x8] sm:$0xff]  }
  0x5c   : > { %v326_v59 = vadd.f32 %v325_v56, %v324_v57  ;;  %v3458_v56 = vunpack.c.l.bf16 %v3580_v54  ;;  %v3454_v57 = vunpack.c.l.bf16 %v3453_v55 }
  0x5e   : > { %v328_v61 = vadd.f32 %v327_v58, %v326_v59  ;;  %v3455_v59 = vunpack.c.h.bf16 %v3453_v55 }
  0x60   : > { %v330_v62 = vadd.f32 %v329_v60, %v328_v61 }
  0x62   : > { %v331_v63 = vrot.slane %v330_v62, 4 }
  0x64   : > { %v332_v0 = vadd.f32 %v331_v63, %v330_v62 }
  0x66   : > { %v333_v1 = vrot.slane %v332_v0, 2 }
  0x68   : > { %v334_v2 = vadd.f32 %v333_v1, %v332_v0  ;;  %v3459_v0 = vunpack.c.h.bf16 %v3580_v54 }
  0x6a   : > { %v335_v3 = vrot.slane %v334_v2, 1 }
  0x6c   : > { %v336_v4 = vadd.f32 %v335_v3, %v334_v2 }
  0x6e   : > { %v337_v5 = vmul.f32 0.015625, %v336_v4  ;;  %v3582_v4 = vld [vmem:[#allocation3 + $0x18] sm:$0xff]  }
  0x70   : > { %v338_v6 = vadd.f32 1e-05, %v337_v5 }
  0x72   : > { %4111 = vrsqrt.f32 %v338_v6 }
  0x7c   : > { %v4112_v7 = vpop.eup %4111 }
  0x7d   : > { %v340_v8 = vmul.f32 %v4112_v7, %v300_v32  ;;  %v341_v9 = vmul.f32 %v4112_v7, %v301_v33  ;;  %v342_v10 = vmul.f32 %v4112_v7, %v302_v34  ;;  %v343_v11 = vmul.f32 %v4112_v7, %v303_v35 }
  0x7e   : > { %v344_v12 = vmul.f32 %v4112_v7, %v304_v36  ;;  %v345_v13 = vmul.f32 %v4112_v7, %v305_v37  ;;  %v346_v17 = vmul.f32 %v4112_v7, %v306_v42  ;;  %v347_v18 = vmul.f32 %v4112_v7, %v307_v48 }
  0x7f   : > { %v348_v14 = vpack.c.bf16 %v341_v9, %v340_v8  ;;  %v349_v15 = vpack.c.bf16 %v343_v11, %v342_v10  ;;  %v3466_v7 = vunpack.c.l.bf16 %v3582_v4  ;;  %v3581_v10 = vld [vmem:[#allocation3 + $0x10] sm:$0xff]  }
  0x80   : > { %v350_v16 = vpack.c.bf16 %v345_v13, %v344_v12  ;;  %v351_v19 = vpack.c.bf16 %v347_v18, %v346_v17  ;;  %v3467_v18 = vunpack.c.h.bf16 %v3582_v4 }
  0x81   : > { %3748 = vmatprep.mubr.msk.bf16.mxu0 %vm276_vm0, %v348_v14  ;;  %v3462_v14 = vunpack.c.l.bf16 %v3581_v10 }
  0x82   : > { %3749 = vmatmul.mubr.msk.bf16.vlgmr.msra.gmra.mrb[0].mxu0 %vm276_vm0, %v349_v15 }
  0x83   : > { %3752 = vmatprep.mubr.msk.bf16.mxu0 %vm276_vm0, %v350_v16 }
  0x8a   : > { %3753 = vmatmul.mubr.msk.bf16.gmra.mrb[4].mxu0 %vm276_vm0, %v351_v19 }
 0x155   : > { %v3750_v20 = vpop.f32.mrb[0].mxu0 }
 0x156   : > { %v421_v22 = vpop.f32.mrb[1].mxu0  ;;  %v430_v24 = vadd.f32 %v3750_v20, %v3370_v21 }
 0x157   : > { %v3751_v23 = vpop.f32.mrb[2].mxu0  ;;  %v422_v27 = vadd.f32 %v3370_v21, %v421_v22 }
 0x158   : > { %v433_v25 = vadd.f32 %v3751_v23, %v3370_v21  ;;  %v424_v26 = vpop.f32.mrb[3].mxu0  ;;  %v3463_v23 = vunpack.c.h.bf16 %v3581_v10 }
 0x159   : > { %v425_v28 = vadd.f32 %v3370_v21, %v424_v26 }
 0x15a   : > { %v4561_v29 = vpack.c.bf16 %v433_v25, %v430_v24 }
 0x15b   : > { %v4563_v30 = vpack.c.bf16 %v425_v28, %v422_v27 }
 0x15d   : > { %v3754_v31 = vpop.f32.mrb[4].mxu0  ;;  %476 = vrot.lane.b32.xlu0 %v4563_v30, %s4412_s27  ;;  %3764 = vmatprep.mubr.msk.bf16.mxu1 %vm484_vm1, %v4563_v30 }
 0x15e   : > { %v446_v32 = vadd.f32 %v3754_v31, %v3370_v21  ;;  %v437_v33 = vpop.f32.mrb[5].mxu0 }
 0x15f   : > { %v438_v34 = vadd.f32 %v3370_v21, %v437_v33  ;;  %v3755_v35 = vpop.f32.mrb[6].mxu0 }
 0x160   : > { %v449_v36 = vadd.f32 %v3755_v35, %v3370_v21  ;;  %v440_v37 = vpop.f32.mrb[7].mxu0 }
 0x161   : > { %v441_v38 = vadd.f32 %v3370_v21, %v440_v37  ;;  %478 = vrot.lane.b32.xlu0 %v4561_v29, %s4412_s27 }
 0x162   : > { %v4569_v39 = vpack.c.bf16 %v449_v36, %v446_v32 }
 0x163   : > { %v4571_v40 = vpack.c.bf16 %v441_v38, %v438_v34 }
 0x165   : > { %480 = vrot.lane.b32.xlu1 %v4571_v40, %s4412_s27  ;;  %653 = vrot.lane.b32.xlu0 %v4561_v29, %s4413_s28 }
 0x169   : > { %482 = vrot.lane.b32.xlu1 %v4569_v39, %s4412_s27  ;;  %s4433_s27 = smov 100  }
 0x16d   : > { %651 = vrot.lane.b32.xlu1 %v4563_v30, %s4413_s28 }
 0x171   : > { %657 = vrot.lane.b32.xlu1 %v4569_v39, %s4413_s28 }
 0x175   : > { %789 = vrot.lane.b32.xlu1 %v4563_v30, %s4414_s29 }
 0x179   : > { %655 = vrot.lane.b32.xlu1 %v4571_v40, %s4413_s28  ;;  %s4434_s28 = smov 36  }
 0x1cf   : > { %v477_v41 = vpop.permute.xlu0 %476 }
 0x1d0   : > { %4024 = vmatprep.subr.msk.bf16.mxu1 %vm484_vm1, %v477_v41  ;;  %v498_v42 = vsel %vm484_vm1, %v477_v41, 0 }
 0x1d1   : > { %3757 = vmatpush3.bf16.xpose.msra.mxu1 %v498_v42 }
 0x1d3   : > { %v479_v43 = vpop.permute.xlu0 %478 }
 0x1d4   : > { %4025 = vmatprep.subr.msk.bf16.mxu1 %vm484_vm1, %v479_v43  ;;  %v501_v45 = vsel %vm484_vm1, %v479_v43, 0 }
 0x1d7   : > { %v481_v44 = vpop.permute.xlu1 %480  ;;  %v654_v49 = vpop.permute.xlu0 %653 }
 0x1d8   : > { %v504_v48 = vsel %vm484_vm1, %v481_v44, 0 }
 0x1d9   : > { %3759 = vmatpush3.bf16.xpose.msra.mxu1 %v501_v45 }
 0x1da   : > { %4026 = vmatprep.subr.msk.bf16.mxu1 %vm484_vm1, %v481_v44 }
 0x1db   : > { %v483_v46 = vpop.permute.xlu1 %482 }
 0x1dc   : > { %v507_v52 = vsel %vm484_vm1, %v483_v46, 0 }
 0x1df   : > { %v652_v47 = vpop.permute.xlu1 %651 }
 0x1e0   : > { %3772 = vmatprep.subr.bf16.mxu0 %v652_v47 }
 0x1e1   : > { %3761 = vmatpush3.bf16.xpose.msra.mxu1 %v504_v48  ;;  %3773 = vmatpush3.bf16.msra.mxu0 %v652_v47 }
 0x1e2   : > { %4027 = vmatprep.subr.msk.bf16.mxu1 %vm484_vm1, %v483_v46  ;;  %3774 = vmatprep.subr.bf16.mxu0 %v654_v49 }
 0x1e3   : > { %v658_v50 = vpop.permute.xlu1 %657 }
 0x1e5   : > { %3775 = vmatpush3.bf16.msra.mxu0 %v654_v49 }
 0x1e7   : > { %v4588_v51 = vpop.permute.xlu1 %789 }
 0x1e9   : > { %3763 = vmatpush3.bf16.xpose.msra.mxu1 %v507_v52  ;;  %v810_v52 = vsel %vm484_vm1, %v4588_v51, 0 }
 0x1eb   : > { %v656_v53 = vpop.permute.xlu1 %655 }
 0x1ec   : > { %3776 = vmatprep.subr.bf16.mxu0 %v656_v53 }
 0x1ed   : > { %3777 = vmatpush3.bf16.msra.mxu0 %v656_v53 }
 0x1ee   : > { %3778 = vmatprep.subr.bf16.mxu0 %v658_v50 }
 0x1f0   : > { %3765 = vmatmul.mubr.msk.bf16.vlgmr.msra.gmra.mrb[0].mxu1 %vm484_vm1, %v4561_v29 }
 0x1f1   : > { %3768 = vmatprep.mubr.msk.bf16.mxu1 %vm484_vm1, %v4571_v40  ;;  %3779 = vmatpush3.bf16.msra.mxu0 %v658_v50 }
 0x1f2   : > { %4028 = vmatprep.subr.msk.bf16.mxu0 %vm484_vm1, %v4588_v51 }
 0x1f8   : > { %3769 = vmatmul.mubr.msk.bf16.gmra.mrb[4].mxu1 %vm484_vm1, %v4569_v39 }
 0x2c3   : > { %v3766_v58 = vpop.f32.mrb[0].mxu1 }
 0x2c4   : > { %v552_v60 = vadd.f32 %v3766_v58, %v3458_v56  ;;  %v543_v61 = vpop.f32.mrb[1].mxu1 }
 0x2c5   : > { %v3767_v62 = vpop.f32.mrb[2].mxu1  ;;  %v544_v63 = vadd.f32 %v3454_v57, %v543_v61 }
 0x2c6   : > { %v546_v1 = vpop.f32.mrb[3].mxu1  ;;  %v581_v2 = vsel %vm574_vm2, %v552_v60, -inf  ;;  %v555_v6 = vadd.f32 %v3767_v62, %v3459_v0 }
 0x2c7   : > { %v547_v3 = vadd.f32 %v3455_v59, %v546_v1  ;;  %582 = vmax.xlane.f32.xlu0 %v581_v2  ;;  %v575_v8 = vsel %vm574_vm2, %v544_v63, -inf }
 0x2c8   : > { %v584_v16 = vsel %vm574_vm2, %v555_v6, -inf }
 0x2c9   : > { %v578_v5 = vsel %vm574_vm2, %v547_v3, -inf }
 0x2ca   : > { %579 = vmax.xlane.f32.xlu1 %v578_v5 }
 0x2cb   : > { %v3770_v9 = vpop.f32.mrb[4].mxu1  ;;  %576 = vmax.xlane.f32.xlu0 %v575_v8 }
 0x2cc   : > { %v559_v11 = vpop.f32.mrb[5].mxu1  ;;  %v4602_v13 = vadd.f32 %v3770_v9, %v3466_v7 }
 0x2cd   : > { %v3771_v12 = vpop.f32.mrb[6].mxu1  ;;  %v4605_v17 = vadd.f32 %v3462_v14, %v559_v11 }
 0x2ce   : > { %v562_v15 = vpop.f32.mrb[7].mxu1  ;;  %v593_v19 = vsel %vm574_vm2, %v4602_v13, -inf  ;;  %v4609_v20 = vadd.f32 %v3771_v12, %v3467_v18 }
 0x2cf   : > { %585 = vmax.xlane.f32.xlu0 %v584_v16  ;;  %v587_v21 = vsel %vm574_vm2, %v4605_v17, -inf  ;;  %v563_v24 = vadd.f32 %v3463_v23, %v562_v15 }
 0x2d0   : > { %v596_v22 = vsel %vm574_vm2, %v4609_v20, -inf }
 0x2d1   : > { %v590_v25 = vsel %vm574_vm2, %v563_v24, -inf }
 0x2d3   : > { %594 = vmax.xlane.f32.xlu0 %v593_v19 }
 0x2d7   : > { %588 = vmax.xlane.f32.xlu0 %v587_v21 }
 0x2db   : > { %793 = vrot.lane.b32.xlu1 %v4571_v40, %s4414_s29  ;;  %597 = vmax.xlane.f32.xlu0 %v596_v22 }
 0x2f1   : > { %791 = vrot.lane.b32.xlu0 %v4561_v29, %s4414_s29 }
 0x2f5   : > { %781 = vrot.lane.b32.xlu0 %v4563_v30, %s4415_s30 }
 0x2f9   : > { %785 = vrot.lane.b32.xlu0 %v4571_v40, %s4415_s30 }
 0x2fd   : > { %964 = vrot.lane.b32.xlu0 %v4561_v29, %s4416_s7 }
 0x2ff   : > { %591 = vmax.xlane.f32.xlu1 %v590_v25  ;;  %v3583_v25 = vld [vmem:[#allocation3 + $0x28] sm:$0xff]  }
 0x310   : > { %795 = vrot.lane.b32.xlu1 %v4569_v39, %s4414_s29  ;;  %s4435_s29 = smov 4  }
 0x314   : > { %783 = vrot.lane.b32.xlu1 %v4561_v29, %s4415_s30 }
 0x318   : > { %787 = vrot.lane.b32.xlu1 %v4569_v39, %s4415_s30  ;;  %s4436_s30 = smov 8  }
 0x31c   : > { %962 = vrot.lane.b32.xlu1 %v4563_v30, %s4416_s7 }
 0x320   : > { %966 = vrot.lane.b32.xlu1 %v4571_v40, %s4416_s7 }
 0x324   : > { %968 = vrot.lane.b32.xlu1 %v4569_v39, %s4416_s7  ;;  %s4437_s7 = smov 12  }
 0x328   : > { %1133 = vrot.lane.b32.xlu1 %v4563_v30, %s4417_s8 }
 0x354   : > { %v583_v26 = vpop.xlane.xlu0 %582 }
 0x355   : > { %v601_v28 = vsub.f32 %v552_v60, %v583_v26 }
 0x357   : > { %v580_v27 = vpop.xlane.xlu1 %579  ;;  %v611_v36 = vmul.f32 1.442695, %v601_v28  ;;  %v3474_v28 = vunpack.c.l.bf16 %v3583_v25 }
 0x358   : > { %v600_v31 = vsub.f32 %v547_v3, %v580_v27  ;;  %v577_v32 = vpop.xlane.xlu0 %576  ;;  %v3469_v27 = vld [vmem:[#allocation3 + $0x20] sm:$0xff]  }
 0x359   : > { %v599_v33 = vsub.f32 %v544_v63, %v577_v32 }
 0x35a   : > { %v609_v34 = vmul.f32 1.442695, %v600_v31  ;;  %v3470_v31 = vunpack.c.l.bf16 %v3469_v27 }
 0x35b   : > { %v607_v35 = vmul.f32 1.442695, %v599_v33  ;;  %v794_v55 = vpop.permute.xlu1 %793  ;;  %v3471_v33 = vunpack.c.h.bf16 %v3469_v27 }
 0x35c   : > { %4113 = vpow2.f32 %v609_v34  ;;  %v586_v37 = vpop.xlane.xlu0 %585  ;;  %v816_v56 = vsel %vm484_vm1, %v794_v55, 0 }
 0x35d   : > { %4115 = vpow2.f32 %v607_v35  ;;  %v602_v38 = vsub.f32 %v555_v6, %v586_v37 }
 0x35e   : > { %4117 = vpow2.f32 %v611_v36 }
 0x35f   : > { %v613_v41 = vmul.f32 1.442695, %v602_v38  ;;  %v3475_v38 = vunpack.c.h.bf16 %v3583_v25 }
 0x360   : > { %v595_v42 = vpop.xlane.xlu0 %594 }
 0x361   : > { %4119 = vpow2.f32 %v613_v41  ;;  %v605_v59 = vsub.f32 %v4602_v13, %v595_v42 }
 0x363   : > { %v619_v63 = vmul.f32 1.442695, %v605_v59 }
 0x364   : > { %v589_v43 = vpop.xlane.xlu0 %588 }
 0x365   : > { %v603_v57 = vsub.f32 %v4605_v17, %v589_v43 }
 0x366   : > { %v4632_v44 = vpop.eup %4113 }
 0x367   : > { %5767 = vst [vmem:[#allocation6_spill] sm:$0xff] %v4632_v44  ;;  %v4634_v45 = vpop.eup %4115  ;;  %v615_v51 = vmul.f32 1.442695, %v603_v57 }
 0x368   : > { %5768 = vst [vmem:[#allocation7_spill] sm:$0xff] %v4634_v45  ;;  %v647_v46 = vpack.c.bf16 %v4632_v44, %v4634_v45  ;;  %v598_v47 = vpop.xlane.xlu0 %597  ;;  %v4638_v48 = vpop.eup %4117 }
 0x369   : > { %5769 = vst [vmem:[#allocation8_spill] sm:$0xff] %v4638_v48  ;;  %v606_v58 = vsub.f32 %v4609_v20, %v598_v47  ;;  %4121 = vpow2.f32 %v615_v51 }
 0x36a   : > { %3780 = vmatprep.mubr.msk.bf16.mxu0 %vm574_vm2, %v647_v46  ;;  %v3585_v46 = vld [vmem:[#allocation3 + $0x38] sm:$0xff]  }
 0x36b   : > { %v4641_v49 = vpop.eup %4119  ;;  %v621_v60 = vmul.f32 1.442695, %v606_v58 }
 0x36c   : > { %5770 = vst [vmem:[#allocation9_spill] sm:$0xff] %v4641_v49  ;;  %v648_v50 = vpack.c.bf16 %v4641_v49, %v4638_v48  ;;  %v792_v53 = vpop.permute.xlu0 %791 }
 0x36d   : > { %v813_v54 = vsel %vm484_vm1, %v792_v53, 0  ;;  %4123 = vpow2.f32 %v621_v60 }
 0x36e   : > { %3781 = vmatmul.mubr.msk.bf16.vlgmr.msra.gmra.mrb[8].mxu0 %vm574_vm2, %v648_v50 }
 0x36f   : > { %3789 = vmatpush3.bf16.xpose.msra.mxu0 %v810_v52 }
 0x370   : > { %4029 = vmatprep.subr.msk.bf16.mxu0 %vm484_vm1, %v792_v53  ;;  %v782_v3 = vpop.permute.xlu0 %781  ;;  %v3482_v53 = vunpack.c.l.bf16 %v3585_v46 }
 0x373   : > { %v4657_v7 = vpop.eup %4121 }
 0x374   : > { %v786_v5 = vpop.permute.xlu0 %785  ;;  %5771 = vst [vmem:[#allocation10_spill] sm:$0xff] %v4657_v7 }
 0x377   : > { %3791 = vmatpush3.bf16.xpose.msra.mxu0 %v813_v54  ;;  %v4659_v8 = vpop.eup %4123 }
 0x378   : > { %4030 = vmatprep.subr.msk.bf16.mxu0 %vm484_vm1, %v794_v55  ;;  %5772 = vst [vmem:[#allocation11_spill] sm:$0xff] %v4659_v8  ;;  %v965_v14 = vpop.permute.xlu0 %964  ;;  %v3584_v55 = vld [vmem:[#allocation3 + $0x30] sm:$0xff]  }
 0x379   : > { %v3478_v59 = vunpack.c.l.bf16 %v3584_v55 }
 0x37f   : > { %3793 = vmatpush3.bf16.xpose.msra.mxu0 %v816_v56 }
 0x38c   : > { %v592_v61 = vpop.xlane.xlu1 %591 }
 0x38d   : > { %v604_v62 = vsub.f32 %v563_v24, %v592_v61 }
 0x38f   : > { %v617_v0 = vmul.f32 1.442695, %v604_v62  ;;  %v3483_v62 = vunpack.c.h.bf16 %v3585_v46 }
 0x390   : > { %v796_v1 = vpop.permute.xlu1 %795 }
 0x391   : > { %4125 = vpow2.f32 %v617_v0  ;;  %4031 = vmatprep.subr.msk.bf16.mxu0 %vm484_vm1, %v796_v1  ;;  %v819_v2 = vsel %vm484_vm1, %v796_v1, 0 }
 0x392   : > { %4127 = vpow2.f32 %v619_v63  ;;  %3795 = vmatpush3.bf16.xpose.msra.mxu0 %v819_v2 }
 0x394   : > { %v784_v4 = vpop.permute.xlu1 %783 }
 0x398   : > { %v788_v6 = vpop.permute.xlu1 %787 }
 0x39b   : > { %v4661_v9 = vpop.eup %4125 }
 0x39c   : > { %5773 = vst [vmem:[#allocation12_spill] sm:$0xff] %v4661_v9  ;;  %v4663_v10 = vpop.eup %4127  ;;  %v963_v11 = vpop.permute.xlu1 %962  ;;  %v649_v12 = vpack.c.bf16 %v4661_v9, %v4657_v7 }
 0x39d   : > { %5774 = vst [vmem:[#allocation13_spill] sm:$0xff] %v4663_v10  ;;  %3804 = vmatprep.subr.bf16.mxu1 %v963_v11  ;;  %v650_v13 = vpack.c.bf16 %v4659_v8, %v4663_v10 }
 0x39e   : > { %3784 = vmatprep.mubr.msk.bf16.mxu0 %vm574_vm2, %v649_v12  ;;  %3805 = vmatpush3.bf16.msra.mxu1 %v963_v11 }
 0x39f   : > { %3785 = vmatmul.mubr.msk.bf16.gmra.mrb[12].mxu0 %vm574_vm2, %v650_v13  ;;  %3806 = vmatprep.subr.bf16.mxu1 %v965_v14 }
 0x3a0   : > { %v967_v15 = vpop.permute.xlu1 %966  ;;  %3796 = vmatprep.mubr.msk.bf16.mxu0 %vm484_vm1, %v782_v3  ;;  %v3479_v3 = vunpack.c.h.bf16 %v3584_v55 }
 0x3a2   : > { %3807 = vmatpush3.bf16.msra.mxu1 %v965_v14 }
 0x3a3   : > { %3808 = vmatprep.subr.bf16.mxu1 %v967_v15 }
 0x3a4   : > { %v969_v16 = vpop.permute.xlu1 %968 }
 0x3a6   : > { %3809 = vmatpush3.bf16.msra.mxu1 %v967_v15 }
 0x3a7   : > { %3797 = vmatmul.mubr.msk.bf16.vlgmr.msra.gmra.mrb[16].mxu0 %vm484_vm1, %v784_v4  ;;  %3810 = vmatprep.subr.bf16.mxu1 %v969_v16 }
 0x3a8   : > { %3800 = vmatprep.mubr.msk.bf16.mxu0 %vm484_vm1, %v786_v5  ;;  %v4674_v17 = vpop.permute.xlu1 %1133 }
 0x3a9   : > { %v1154_v46 = vsel %vm484_vm1, %v4674_v17, 0 }
 0x3aa   : > { %3811 = vmatpush3.bf16.msra.mxu1 %v969_v16 }
 0x3ab   : > { %4032 = vmatprep.subr.msk.bf16.mxu1 %vm484_vm1, %v4674_v17 }
 0x3af   : > { %3801 = vmatmul.mubr.msk.bf16.gmra.mrb[20].mxu0 %vm484_vm1, %v788_v6 }
 0x441   : > { %v4679_v18 = vpop.f32.mrb[8].mxu0 }
 0x442   : > { %5775 = vst [vmem:[#allocation14_spill] sm:$0xff] %v4679_v18  ;;  %v4681_v19 = vpop.f32.mrb[9].mxu0 }
 0x443   : > { %5776 = vst [vmem:[#allocation15_spill] sm:$0xff] %v4681_v19  ;;  %v4683_v20 = vpop.f32.mrb[10].mxu0 }
 0x444   : > { %5777 = vst [vmem:[#allocation16_spill] sm:$0xff] %v4683_v20  ;;  %v4685_v21 = vpop.f32.mrb[11].mxu0 }
 0x445   : > { %5778 = vst [vmem:[#allocation17_spill] sm:$0xff] %v4685_v21 }
 0x472   : > { %v4687_v22 = vpop.f32.mrb[12].mxu0 }
 0x473   : > { %5779 = vst [vmem:[#allocation18_spill] sm:$0xff] %v4687_v22  ;;  %v4689_v23 = vpop.f32.mrb[13].mxu0 }
 0x474   : > { %5780 = vst [vmem:[#allocation19_spill] sm:$0xff] %v4689_v23  ;;  %v4691_v24 = vpop.f32.mrb[14].mxu0 }
 0x475   : > { %5781 = vst [vmem:[#allocation20_spill] sm:$0xff] %v4691_v24  ;;  %v4693_v26 = vpop.f32.mrb[15].mxu0 }
 0x476   : > { %5782 = vst [vmem:[#allocation21_spill] sm:$0xff] %v4693_v26 }
 0x47a   : > { %v3798_v32 = vpop.f32.mrb[16].mxu0 }
 0x47b   : > { %v864_v34 = vadd.f32 %v3798_v32, %v3474_v28  ;;  %v855_v35 = vpop.f32.mrb[17].mxu0 }
 0x47c   : > { %v3799_v36 = vpop.f32.mrb[18].mxu0  ;;  %v856_v37 = vadd.f32 %v3470_v31, %v855_v35 }
 0x47d   : > { %v858_v41 = vpop.f32.mrb[19].mxu0  ;;  %v892_v42 = vsel %vm574_vm2, %v864_v34, -inf  ;;  %v867_v50 = vadd.f32 %v3799_v36, %v3475_v38 }
 0x47e   : > { %v859_v43 = vadd.f32 %v3471_v33, %v858_v41  ;;  %893 = vmax.xlane.f32.xlu0 %v892_v42  ;;  %v886_v52 = vsel %vm574_vm2, %v856_v37, -inf }
 0x47f   : > { %v895_v60 = vsel %vm574_vm2, %v867_v50, -inf }
 0x480   : > { %v889_v47 = vsel %vm574_vm2, %v859_v43, -inf }
 0x481   : > { %890 = vmax.xlane.f32.xlu1 %v889_v47 }
 0x482   : > { %887 = vmax.xlane.f32.xlu0 %v886_v52  ;;  %v3802_v54 = vpop.f32.mrb[20].mxu0 }
 0x483   : > { %v871_v56 = vpop.f32.mrb[21].mxu0  ;;  %v4698_v58 = vadd.f32 %v3802_v54, %v3482_v53 }
 0x484   : > { %v3803_v57 = vpop.f32.mrb[22].mxu0  ;;  %v4701_v61 = vadd.f32 %v3478_v59, %v871_v56 }
 0x485   : > { %v874_v51 = vpop.f32.mrb[23].mxu0  ;;  %v904_v63 = vsel %vm574_vm2, %v4698_v58, -inf  ;;  %v4705_v0 = vadd.f32 %v3803_v57, %v3483_v62 }
 0x486   : > { %896 = vmax.xlane.f32.xlu0 %v895_v60  ;;  %v898_v1 = vsel %vm574_vm2, %v4701_v61, -inf  ;;  %v875_v4 = vadd.f32 %v3479_v3, %v874_v51 }
 0x487   : > { %v907_v2 = vsel %vm574_vm2, %v4705_v0, -inf }
 0x488   : > { %v901_v5 = vsel %vm574_vm2, %v875_v4, -inf }
 0x48a   : > { %905 = vmax.xlane.f32.xlu0 %v904_v63 }
 0x48e   : > { %899 = vmax.xlane.f32.xlu0 %v898_v1 }
 0x492   : > { %1137 = vrot.lane.b32.xlu1 %v4571_v40, %s4417_s8  ;;  %908 = vmax.xlane.f32.xlu0 %v907_v2 }
 0x4a8   : > { %1135 = vrot.lane.b32.xlu0 %v4561_v29, %s4417_s8 }
 0x4ac   : > { %1125 = vrot.lane.b32.xlu0 %v4563_v30, %s4418_s9 }
 0x4b0   : > { %1129 = vrot.lane.b32.xlu0 %v4571_v40, %s4418_s9 }
 0x4b4   : > { %1308 = vrot.lane.b32.xlu0 %v4561_v29, %s4419_s10 }
 0x4b6   : > { %902 = vmax.xlane.f32.xlu1 %v901_v5 }
 0x4c7   : > { %1139 = vrot.lane.b32.xlu1 %v4569_v39, %s4417_s8  ;;  %s4438_s8 = smov 16  }
 0x4cb   : > { %1127 = vrot.lane.b32.xlu1 %v4561_v29, %s4418_s9 }
 0x4cf   : > { %1131 = vrot.lane.b32.xlu1 %v4569_v39, %s4418_s9  ;;  %s4439_s9 = smov 20  }
 0x4d3   : > { %1306 = vrot.lane.b32.xlu1 %v4563_v30, %s4419_s10 }
 0x4d7   : > { %1310 = vrot.lane.b32.xlu1 %v4571_v40, %s4419_s10 }
 0x4db   : > { %1312 = vrot.lane.b32.xlu1 %v4569_v39, %s4419_s10  ;;  %s4440_s10 = smov 24  }
 0x4df   : > { %1477 = vrot.lane.b32.xlu1 %v4563_v30, %s4420_s11 }
 0x50b   : > { %v894_v6 = vpop.xlane.xlu0 %893 }
 0x50c   : > { %v912_v12 = vsub.f32 %v864_v34, %v894_v6 }
 0x50e   : > { %v891_v11 = vpop.xlane.xlu1 %890  ;;  %v922_v27 = vmul.f32 1.442695, %v912_v12 }
 0x50f   : > { %v911_v13 = vsub.f32 %v859_v43, %v891_v11  ;;  %v888_v14 = vpop.xlane.xlu0 %887 }
 0x510   : > { %v910_v15 = vsub.f32 %v856_v37, %v888_v14 }
 0x511   : > { %v920_v16 = vmul.f32 1.442695, %v911_v13 }
 0x512   : > { %v918_v25 = vmul.f32 1.442695, %v910_v15  ;;  %v1138_v52 = vpop.permute.xlu1 %1137 }
 0x513   : > { %4129 = vpow2.f32 %v920_v16  ;;  %v897_v28 = vpop.xlane.xlu0 %896  ;;  %v1160_v53 = vsel %vm484_vm1, %v1138_v52, 0 }
 0x514   : > { %4131 = vpow2.f32 %v918_v25  ;;  %v913_v31 = vsub.f32 %v867_v50, %v897_v28 }
 0x515   : > { %4133 = vpow2.f32 %v922_v27 }
 0x516   : > { %v924_v32 = vmul.f32 1.442695, %v913_v31 }
 0x517   : > { %v906_v33 = vpop.xlane.xlu0 %905 }
 0x518   : > { %4135 = vpow2.f32 %v924_v32  ;;  %v916_v56 = vsub.f32 %v4698_v58, %v906_v33 }
 0x51a   : > { %v930_v60 = vmul.f32 1.442695, %v916_v56 }
 0x51b   : > { %v900_v35 = vpop.xlane.xlu0 %899 }
 0x51c   : > { %v914_v54 = vsub.f32 %v4701_v61, %v900_v35 }
 0x51d   : > { %v4728_v36 = vpop.eup %4129 }
 0x51e   : > { %v4730_v38 = vpop.eup %4131  ;;  %v926_v17 = vmul.f32 1.442695, %v914_v54 }
 0x51f   : > { %v958_v34 = vpack.c.bf16 %v4728_v36, %v4730_v38  ;;  %v909_v37 = vpop.xlane.xlu0 %908  ;;  %v4734_v41 = vpop.eup %4133 }
 0x520   : > { %v917_v55 = vsub.f32 %v4705_v0, %v909_v37  ;;  %4137 = vpow2.f32 %v926_v17  ;;  %v3586_v37 = vld [vmem:[#allocation3 + $0x48] sm:$0xff]  }
 0x521   : > { %3812 = vmatprep.mubr.msk.bf16.mxu1 %vm574_vm2, %v958_v34 }
 0x522   : > { %v4737_v42 = vpop.eup %4135  ;;  %v932_v57 = vmul.f32 1.442695, %v917_v55 }
 0x523   : > { %v959_v43 = vpack.c.bf16 %v4737_v42, %v4734_v41  ;;  %v1136_v47 = vpop.permute.xlu0 %1135 }
 0x524   : > { %v1157_v50 = vsel %vm484_vm1, %v1136_v47, 0  ;;  %4139 = vpow2.f32 %v932_v57  ;;  %v3491_v57 = vunpack.c.h.bf16 %v3586_v37 }
 0x525   : > { %3813 = vmatmul.mubr.msk.bf16.vlgmr.msra.gmra.mrb[8].mxu1 %vm574_vm2, %v959_v43 }
 0x526   : > { %3821 = vmatpush3.bf16.xpose.msra.mxu1 %v1154_v46  ;;  %v3485_v46 = vld [vmem:[#allocation3 + $0x40] sm:$0xff]  }
 0x527   : > { %4033 = vmatprep.subr.msk.bf16.mxu1 %vm484_vm1, %v1136_v47  ;;  %v1126_v61 = vpop.permute.xlu0 %1125  ;;  %v3490_v47 = vunpack.c.l.bf16 %v3586_v37 }
 0x52a   : > { %v4753_v3 = vpop.eup %4137 }
 0x52b   : > { %v1130_v2 = vpop.permute.xlu0 %1129 }
 0x52e   : > { %3823 = vmatpush3.bf16.xpose.msra.mxu1 %v1157_v50  ;;  %v4755_v5 = vpop.eup %4139  ;;  %v3486_v50 = vunpack.c.l.bf16 %v3485_v46 }
 0x52f   : > { %4034 = vmatprep.subr.msk.bf16.mxu1 %vm484_vm1, %v1138_v52  ;;  %v1309_v14 = vpop.permute.xlu0 %1308 }
 0x536   : > { %3825 = vmatpush3.bf16.xpose.msra.mxu1 %v1160_v53  ;;  %v3487_v53 = vunpack.c.h.bf16 %v3485_v46 }
 0x543   : > { %v903_v59 = vpop.xlane.xlu1 %902 }
 0x544   : > { %v915_v51 = vsub.f32 %v875_v4, %v903_v59 }
 0x546   : > { %v928_v62 = vmul.f32 1.442695, %v915_v51 }
 0x547   : > { %v1140_v63 = vpop.permute.xlu1 %1139 }
 0x548   : > { %4141 = vpow2.f32 %v928_v62  ;;  %4035 = vmatprep.subr.msk.bf16.mxu1 %vm484_vm1, %v1140_v63  ;;  %v1163_v1 = vsel %vm484_vm1, %v1140_v63, 0  ;;  %v3588_v62 = vld [vmem:[#allocation3 + $0x58] sm:$0xff]  }
 0x549   : > { %4143 = vpow2.f32 %v930_v60  ;;  %3827 = vmatpush3.bf16.xpose.msra.mxu1 %v1163_v1  ;;  %v3499_v46 = vunpack.c.h.bf16 %v3588_v62 }
 0x54b   : > { %v1128_v0 = vpop.permute.xlu1 %1127 }
 0x54f   : > { %v1132_v58 = vpop.permute.xlu1 %1131 }
 0x552   : > { %v4757_v4 = vpop.eup %4141 }
 0x553   : > { %v4759_v6 = vpop.eup %4143  ;;  %v1307_v11 = vpop.permute.xlu1 %1306  ;;  %v960_v12 = vpack.c.bf16 %v4757_v4, %v4753_v3 }
 0x554   : > { %3836 = vmatprep.subr.bf16.mxu0 %v1307_v11  ;;  %v961_v13 = vpack.c.bf16 %v4755_v5, %v4759_v6 }
 0x555   : > { %3816 = vmatprep.mubr.msk.bf16.mxu1 %vm574_vm2, %v960_v12  ;;  %3837 = vmatpush3.bf16.msra.mxu0 %v1307_v11 }
 0x556   : > { %3817 = vmatmul.mubr.msk.bf16.gmra.mrb[12].mxu1 %vm574_vm2, %v961_v13  ;;  %3838 = vmatprep.subr.bf16.mxu0 %v1309_v14 }
 0x557   : > { %v1311_v15 = vpop.permute.xlu1 %1310  ;;  %3828 = vmatprep.mubr.msk.bf16.mxu1 %vm484_vm1, %v1126_v61 }
 0x559   : > { %3839 = vmatpush3.bf16.msra.mxu0 %v1309_v14 }
 0x55a   : > { %3840 = vmatprep.subr.bf16.mxu0 %v1311_v15 }
 0x55b   : > { %v1313_v16 = vpop.permute.xlu1 %1312 }
 0x55d   : > { %3841 = vmatpush3.bf16.msra.mxu0 %v1311_v15 }
 0x55e   : > { %3829 = vmatmul.mubr.msk.bf16.vlgmr.msra.gmra.mrb[16].mxu1 %vm484_vm1, %v1128_v0  ;;  %3842 = vmatprep.subr.bf16.mxu0 %v1313_v16  ;;  %v3498_v0 = vunpack.c.l.bf16 %v3588_v62 }
 0x55f   : > { %3832 = vmatprep.mubr.msk.bf16.mxu1 %vm484_vm1, %v1130_v2  ;;  %v4770_v25 = vpop.permute.xlu1 %1477 }
 0x561   : > { %3843 = vmatpush3.bf16.msra.mxu0 %v1313_v16 }
 0x562   : > { %4036 = vmatprep.subr.msk.bf16.mxu0 %vm484_vm1, %v4770_v25 }
 0x566   : > { %3833 = vmatmul.mubr.msk.bf16.gmra.mrb[20].mxu1 %vm484_vm1, %v1132_v58  ;;  %v3587_v58 = vld [vmem:[#allocation3 + $0x50] sm:$0xff]  }
 0x567   : > { %v3494_v14 = vunpack.c.l.bf16 %v3587_v58 }
 0x5f8   : > { %v4775_v27 = vpop.f32.mrb[8].mxu1 }
 0x5f9   : > { %5783 = vst [vmem:[#allocation22_spill] sm:$0xff] %v4775_v27  ;;  %v4777_v28 = vpop.f32.mrb[9].mxu1 }
 0x5fa   : > { %5784 = vst [vmem:[#allocation23_spill] sm:$0xff] %v4777_v28  ;;  %v4779_v31 = vpop.f32.mrb[10].mxu1 }
 0x5fb   : > { %5785 = vst [vmem:[#allocation24_spill] sm:$0xff] %v4779_v31  ;;  %v4781_v32 = vpop.f32.mrb[11].mxu1 }
 0x5fc   : > { %5786 = vst [vmem:[#allocation25_spill] sm:$0xff] %v4781_v32 }
 0x629   : > { %v4783_v33 = vpop.f32.mrb[12].mxu1 }
 0x62a   : > { %5787 = vst [vmem:[#allocation26_spill] sm:$0xff] %v4783_v33  ;;  %v4785_v35 = vpop.f32.mrb[13].mxu1 }
 0x62b   : > { %5788 = vst [vmem:[#allocation27_spill] sm:$0xff] %v4785_v35  ;;  %v4787_v34 = vpop.f32.mrb[14].mxu1 }
 0x62c   : > { %5789 = vst [vmem:[#allocation28_spill] sm:$0xff] %v4787_v34  ;;  %v4789_v43 = vpop.f32.mrb[15].mxu1 }
 0x62d   : > { %5790 = vst [vmem:[#allocation29_spill] sm:$0xff] %v4789_v43 }
 0x631   : > { %v3830_v52 = vpop.f32.mrb[16].mxu1 }
 0x632   : > { %v1208_v54 = vadd.f32 %v3830_v52, %v3490_v47  ;;  %v1199_v55 = vpop.f32.mrb[17].mxu1 }
 0x633   : > { %v3831_v56 = vpop.f32.mrb[18].mxu1  ;;  %v1200_v17 = vadd.f32 %v3486_v50, %v1199_v55  ;;  %v3495_v55 = vunpack.c.h.bf16 %v3587_v58 }
 0x634   : > { %v1202_v59 = vpop.f32.mrb[19].mxu1  ;;  %v1236_v51 = vsel %vm574_vm2, %v1208_v54, -inf  ;;  %v1211_v1 = vadd.f32 %v3831_v56, %v3491_v57 }
 0x635   : > { %v1203_v60 = vadd.f32 %v3487_v53, %v1202_v59  ;;  %1237 = vmax.xlane.f32.xlu0 %v1236_v51  ;;  %v1230_v61 = vsel %vm574_vm2, %v1200_v17, -inf }
 0x636   : > { %v1239_v16 = vsel %vm574_vm2, %v1211_v1, -inf }
 0x637   : > { %v1233_v63 = vsel %vm574_vm2, %v1203_v60, -inf }
 0x638   : > { %1234 = vmax.xlane.f32.xlu1 %v1233_v63 }
 0x639   : > { %1231 = vmax.xlane.f32.xlu0 %v1230_v61  ;;  %v3834_v2 = vpop.f32.mrb[20].mxu1 }
 0x63a   : > { %v1215_v11 = vpop.f32.mrb[21].mxu1  ;;  %v4794_v13 = vadd.f32 %v3834_v2, %v3498_v0 }
 0x63b   : > { %v3835_v12 = vpop.f32.mrb[22].mxu1  ;;  %v4797_v37 = vadd.f32 %v3494_v14, %v1215_v11 }
 0x63c   : > { %v1218_v15 = vpop.f32.mrb[23].mxu1  ;;  %v1248_v47 = vsel %vm574_vm2, %v4794_v13, -inf  ;;  %v4801_v50 = vadd.f32 %v3835_v12, %v3499_v46 }
 0x63d   : > { %1240 = vmax.xlane.f32.xlu0 %v1239_v16  ;;  %v1242_v52 = vsel %vm574_vm2, %v4797_v37, -inf  ;;  %v1219_v56 = vadd.f32 %v3495_v55, %v1218_v15  ;;  %v1498_v55 = vsel %vm484_vm1, %v4770_v25, 0 }
 0x63e   : > { %v1251_v53 = vsel %vm574_vm2, %v4801_v50, -inf }
 0x63f   : > { %v1245_v57 = vsel %vm574_vm2, %v1219_v56, -inf }
 0x641   : > { %1249 = vmax.xlane.f32.xlu0 %v1248_v47 }
 0x645   : > { %1243 = vmax.xlane.f32.xlu0 %v1242_v52 }
 0x649   : > { %1481 = vrot.lane.b32.xlu1 %v4571_v40, %s4420_s11  ;;  %1252 = vmax.xlane.f32.xlu0 %v1251_v53 }
 0x65f   : > { %1479 = vrot.lane.b32.xlu0 %v4561_v29, %s4420_s11 }
 0x663   : > { %1469 = vrot.lane.b32.xlu0 %v4563_v30, %s4421_s12 }
 0x667   : > { %1473 = vrot.lane.b32.xlu0 %v4571_v40, %s4421_s12 }
 0x66b   : > { %1652 = vrot.lane.b32.xlu0 %v4561_v29, %s4422_s13 }
 0x66d   : > { %1246 = vmax.xlane.f32.xlu1 %v1245_v57 }
 0x67e   : > { %1483 = vrot.lane.b32.xlu1 %v4569_v39, %s4420_s11  ;;  %s4441_s11 = smov 28  }
 0x682   : > { %1471 = vrot.lane.b32.xlu1 %v4561_v29, %s4421_s12 }
 0x686   : > { %1475 = vrot.lane.b32.xlu1 %v4569_v39, %s4421_s12 }
 0x68a   : > { %1650 = vrot.lane.b32.xlu1 %v4563_v30, %s4422_s13 }
 0x68e   : > { %1654 = vrot.lane.b32.xlu1 %v4571_v40, %s4422_s13 }
 0x692   : > { %1656 = vrot.lane.b32.xlu1 %v4569_v39, %s4422_s13 }
 0x696   : > { %1821 = vrot.lane.b32.xlu1 %v4563_v30, %s4423_s14 }
 0x6c2   : > { %v1238_v59 = vpop.xlane.xlu0 %1237 }
 0x6c3   : > { %v1256_v62 = vsub.f32 %v1208_v54, %v1238_v59 }
 0x6c5   : > { %v1235_v51 = vpop.xlane.xlu1 %1234  ;;  %v1266_v11 = vmul.f32 1.442695, %v1256_v62 }
 0x6c6   : > { %v1255_v63 = vsub.f32 %v1203_v60, %v1235_v51  ;;  %v1232_v61 = vpop.xlane.xlu0 %1231 }
 0x6c7   : > { %v1254_v0 = vsub.f32 %v1200_v17, %v1232_v61 }
 0x6c8   : > { %v1264_v2 = vmul.f32 1.442695, %v1255_v63 }
 0x6c9   : > { %v1262_v58 = vmul.f32 1.442695, %v1254_v0  ;;  %v1482_v51 = vpop.permute.xlu1 %1481 }
 0x6ca   : > { %4145 = vpow2.f32 %v1264_v2  ;;  %v1241_v12 = vpop.xlane.xlu0 %1240  ;;  %v1504_v62 = vsel %vm484_vm1, %v1482_v51, 0 }
 0x6cb   : > { %4147 = vpow2.f32 %v1262_v58  ;;  %v1257_v14 = vsub.f32 %v1211_v1, %v1241_v12 }
 0x6cc   : > { %4149 = vpow2.f32 %v1266_v11 }
 0x6cd   : > { %v1268_v15 = vmul.f32 1.442695, %v1257_v14 }
 0x6ce   : > { %v1250_v16 = vpop.xlane.xlu0 %1249 }
 0x6cf   : > { %4151 = vpow2.f32 %v1268_v15  ;;  %v1260_v0 = vsub.f32 %v4794_v13, %v1250_v16 }
 0x6d1   : > { %v1274_v12 = vmul.f32 1.442695, %v1260_v0 }
 0x6d2   : > { %v1244_v46 = vpop.xlane.xlu0 %1243 }
 0x6d3   : > { %v1258_v63 = vsub.f32 %v4797_v37, %v1244_v46 }
 0x6d4   : > { %v4824_v47 = vpop.eup %4145 }
 0x6d5   : > { %v4826_v52 = vpop.eup %4147  ;;  %v1270_v25 = vmul.f32 1.442695, %v1258_v63 }
 0x6d6   : > { %v1302_v54 = vpack.c.bf16 %v4824_v47, %v4826_v52  ;;  %v1253_v17 = vpop.xlane.xlu0 %1252  ;;  %v4830_v60 = vpop.eup %4149 }
 0x6d7   : > { %v1261_v61 = vsub.f32 %v4801_v50, %v1253_v17  ;;  %4153 = vpow2.f32 %v1270_v25 }
 0x6d8   : > { %3844 = vmatprep.mubr.msk.bf16.mxu0 %vm574_vm2, %v1302_v54 }
 0x6d9   : > { %v4833_v53 = vpop.eup %4151  ;;  %v1276_v2 = vmul.f32 1.442695, %v1261_v61 }
 0x6da   : > { %v1303_v1 = vpack.c.bf16 %v4833_v53, %v4830_v60  ;;  %v1480_v57 = vpop.permute.xlu0 %1479 }
 0x6db   : > { %v1501_v59 = vsel %vm484_vm1, %v1480_v57, 0  ;;  %4155 = vpow2.f32 %v1276_v2 }
 0x6dc   : > { %3845 = vmatmul.mubr.msk.bf16.vlgmr.msra.gmra.mrb[24].mxu0 %vm574_vm2, %v1303_v1 }
 0x6dd   : > { %3853 = vmatpush3.bf16.xpose.msra.mxu0 %v1498_v55 }
 0x6de   : > { %4037 = vmatprep.subr.msk.bf16.mxu0 %vm484_vm1, %v1480_v57  ;;  %v1470_v37 = vpop.permute.xlu0 %1469 }
 0x6e1   : > { %v4849_v16 = vpop.eup %4153 }
 0x6e2   : > { %v1474_v46 = vpop.permute.xlu0 %1473 }
 0x6e5   : > { %3855 = vmatpush3.bf16.xpose.msra.mxu0 %v1501_v59  ;;  %v4851_v17 = vpop.eup %4155 }
 0x6e6   : > { %4038 = vmatprep.subr.msk.bf16.mxu0 %vm484_vm1, %v1482_v51  ;;  %v1653_v51 = vpop.permute.xlu0 %1652 }
 0x6ed   : > { %3857 = vmatpush3.bf16.xpose.msra.mxu0 %v1504_v62 }
 0x6fa   : > { %v1247_v58 = vpop.xlane.xlu1 %1246 }
 0x6fb   : > { %v1259_v11 = vsub.f32 %v1219_v56, %v1247_v58 }
 0x6fd   : > { %v1272_v14 = vmul.f32 1.442695, %v1259_v11 }
 0x6fe   : > { %v1484_v15 = vpop.permute.xlu1 %1483 }
 0x6ff   : > { %4157 = vpow2.f32 %v1272_v14  ;;  %4039 = vmatprep.subr.msk.bf16.mxu0 %vm484_vm1, %v1484_v15  ;;  %v1507_v54 = vsel %vm484_vm1, %v1484_v15, 0  ;;  %v3589_v15 = vld [vmem:[#allocation3 + $0x68] sm:$0xff]  }
 0x700   : > { %4159 = vpow2.f32 %v1274_v12  ;;  %3859 = vmatpush3.bf16.xpose.msra.mxu0 %v1507_v54 }
 0x702   : > { %v1472_v50 = vpop.permute.xlu1 %1471 }
 0x706   : > { %v1476_v13 = vpop.permute.xlu1 %1475 }
 0x709   : > { %v4853_v56 = vpop.eup %4157 }
 0x70a   : > { %v4855_v1 = vpop.eup %4159  ;;  %v1651_v55 = vpop.permute.xlu1 %1650  ;;  %v1304_v57 = vpack.c.bf16 %v4853_v56, %v4849_v16 }
 0x70b   : > { %3868 = vmatprep.subr.bf16.mxu1 %v1651_v55  ;;  %v1305_v59 = vpack.c.bf16 %v4851_v17, %v4855_v1 }
 0x70c   : > { %3848 = vmatprep.mubr.msk.bf16.mxu0 %vm574_vm2, %v1304_v57  ;;  %3869 = vmatpush3.bf16.msra.mxu1 %v1651_v55 }
 0x70d   : > { %3849 = vmatmul.mubr.msk.bf16.gmra.mrb[28].mxu0 %vm574_vm2, %v1305_v59  ;;  %3870 = vmatprep.subr.bf16.mxu1 %v1653_v51 }
 0x70e   : > { %v1655_v62 = vpop.permute.xlu1 %1654  ;;  %3860 = vmatprep.mubr.msk.bf16.mxu0 %vm484_vm1, %v1470_v37  ;;  %v3501_v37 = vld [vmem:[#allocation3 + $0x60] sm:$0xff]  }
 0x70f   : > { %v3503_v55 = vunpack.c.h.bf16 %v3501_v37 }
 0x710   : > { %3871 = vmatpush3.bf16.msra.mxu1 %v1653_v51 }
 0x711   : > { %3872 = vmatprep.subr.bf16.mxu1 %v1655_v62 }
 0x712   : > { %v1657_v63 = vpop.permute.xlu1 %1656 }
 0x714   : > { %3873 = vmatpush3.bf16.msra.mxu1 %v1655_v62 }
 0x715   : > { %3861 = vmatmul.mubr.msk.bf16.vlgmr.msra.gmra.mrb[32].mxu0 %vm484_vm1, %v1472_v50  ;;  %3874 = vmatprep.subr.bf16.mxu1 %v1657_v63  ;;  %v3506_v50 = vunpack.c.l.bf16 %v3589_v15 }
 0x716   : > { %3864 = vmatprep.mubr.msk.bf16.mxu0 %vm484_vm1, %v1474_v46  ;;  %v4866_v61 = vpop.permute.xlu1 %1821  ;;  %v3502_v46 = vunpack.c.l.bf16 %v3501_v37 }
 0x718   : > { %3875 = vmatpush3.bf16.msra.mxu1 %v1657_v63  ;;  %v3507_v63 = vunpack.c.h.bf16 %v3589_v15 }
 0x719   : > { %4040 = vmatprep.subr.msk.bf16.mxu1 %vm484_vm1, %v4866_v61 }
 0x71d   : > { %3865 = vmatmul.mubr.msk.bf16.gmra.mrb[36].mxu0 %vm484_vm1, %v1476_v13 }
 0x7af   : > { %v4871_v0 = vpop.f32.mrb[24].mxu0 }
 0x7b0   : > { %5791 = vst [vmem:[#allocation30_spill] sm:$0xff] %v4871_v0  ;;  %v4873_v25 = vpop.f32.mrb[25].mxu0 }
 0x7b1   : > { %5792 = vst [vmem:[#allocation31_spill] sm:$0xff] %v4873_v25  ;;  %v4875_v2 = vpop.f32.mrb[26].mxu0 }
 0x7b2   : > { %5793 = vst [vmem:[#allocation32_spill] sm:$0xff] %v4875_v2  ;;  %v4877_v58 = vpop.f32.mrb[27].mxu0 }
 0x7b3   : > { %5794 = vst [vmem:[#allocation33_spill] sm:$0xff] %v4877_v58 }
 0x7e0   : > { %v4879_v11 = vpop.f32.mrb[28].mxu0 }
 0x7e1   : > { %5795 = vst [vmem:[#allocation34_spill] sm:$0xff] %v4879_v11  ;;  %v4881_v12 = vpop.f32.mrb[29].mxu0 }
 0x7e2   : > { %5796 = vst [vmem:[#allocation35_spill] sm:$0xff] %v4881_v12  ;;  %v4883_v14 = vpop.f32.mrb[30].mxu0  ;;  %v3591_v12 = vld [vmem:[#allocation3 + $0x78] sm:$0xff]  }
 0x7e3   : > { %5797 = vst [vmem:[#allocation36_spill] sm:$0xff] %v4883_v14  ;;  %v4885_v54 = vpop.f32.mrb[31].mxu0  ;;  %v3514_v33 = vunpack.c.l.bf16 %v3591_v12 }
 0x7e4   : > { %5798 = vst [vmem:[#allocation37_spill] sm:$0xff] %v4885_v54 }
 0x7e8   : > { %v3862_v13 = vpop.f32.mrb[32].mxu0 }
 0x7e9   : > { %v1552_v57 = vadd.f32 %v3862_v13, %v3506_v50  ;;  %v1543_v59 = vpop.f32.mrb[33].mxu0  ;;  %v3590_v50 = vld [vmem:[#allocation3 + $0x70] sm:$0xff]  }
 0x7ea   : > { %v3863_v51 = vpop.f32.mrb[34].mxu0  ;;  %v1544_v62 = vadd.f32 %v3502_v46, %v1543_v59  ;;  %v3510_v15 = vunpack.c.l.bf16 %v3590_v50 }
 0x7eb   : > { %v1546_v34 = vpop.f32.mrb[35].mxu0  ;;  %v1580_v11 = vsel %vm574_vm2, %v1552_v57, -inf  ;;  %v1555_v26 = vadd.f32 %v3863_v51, %v3507_v63 }
 0x7ec   : > { %v1547_v24 = vadd.f32 %v3503_v55, %v1546_v34  ;;  %1581 = vmax.xlane.f32.xlu0 %v1580_v11  ;;  %v1574_v54 = vsel %vm574_vm2, %v1544_v62, -inf  ;;  %v3515_v55 = vunpack.c.h.bf16 %v3591_v12  ;;  %v3511_v12 = vunpack.c.h.bf16 %v3590_v50 }
 0x7ed   : > { %v1583_v34 = vsel %vm574_vm2, %v1555_v26, -inf }
 0x7ee   : > { %v1577_v14 = vsel %vm574_vm2, %v1547_v24, -inf }
 0x7ef   : > { %1578 = vmax.xlane.f32.xlu1 %v1577_v14 }
 0x7f0   : > { %1575 = vmax.xlane.f32.xlu0 %v1574_v54  ;;  %v3866_v37 = vpop.f32.mrb[36].mxu0 }
 0x7f1   : > { %v1559_v13 = vpop.f32.mrb[37].mxu0  ;;  %v4890_v46 = vadd.f32 %v3866_v37, %v3514_v33 }
 0x7f2   : > { %v3867_v20 = vpop.f32.mrb[38].mxu0  ;;  %v4893_v11 = vadd.f32 %v3510_v15, %v1559_v13 }
 0x7f3   : > { %v1562_v59 = vpop.f32.mrb[39].mxu0  ;;  %v1592_v14 = vsel %vm574_vm2, %v4890_v46, -inf  ;;  %v4897_v51 = vadd.f32 %v3867_v20, %v3515_v55 }
 0x7f4   : > { %1584 = vmax.xlane.f32.xlu0 %v1583_v34  ;;  %v1586_v54 = vsel %vm574_vm2, %v4893_v11, -inf  ;;  %v1563_v20 = vadd.f32 %v3511_v12, %v1562_v59 }
 0x7f5   : > { %v1595_v33 = vsel %vm574_vm2, %v4897_v51, -inf }
 0x7f6   : > { %v1589_v63 = vsel %vm574_vm2, %v1563_v20, -inf }
 0x7f8   : > { %1593 = vmax.xlane.f32.xlu0 %v1592_v14 }
 0x7fc   : > { %1587 = vmax.xlane.f32.xlu0 %v1586_v54 }
 0x800   : > { %1825 = vrot.lane.b32.xlu1 %v4571_v40, %s4423_s14  ;;  %1596 = vmax.xlane.f32.xlu0 %v1595_v33 }
 0x816   : > { %1823 = vrot.lane.b32.xlu0 %v4561_v29, %s4423_s14 }
 0x81a   : > { %1813 = vrot.lane.b32.xlu0 %v4563_v30, %s4424_s16 }
 0x81e   : > { %1817 = vrot.lane.b32.xlu0 %v4571_v40, %s4424_s16 }
 0x822   : > { %1996 = vrot.lane.b32.xlu0 %v4561_v29, %s4425_s17 }
 0x824   : > { %1590 = vmax.xlane.f32.xlu1 %v1589_v63 }
 0x835   : > { %1827 = vrot.lane.b32.xlu1 %v4569_v39, %s4423_s14 }
 0x839   : > { %1815 = vrot.lane.b32.xlu1 %v4561_v29, %s4424_s16 }
 0x83d   : > { %1819 = vrot.lane.b32.xlu1 %v4569_v39, %s4424_s16 }
 0x841   : > { %1994 = vrot.lane.b32.xlu1 %v4563_v30, %s4425_s17 }
 0x845   : > { %1998 = vrot.lane.b32.xlu1 %v4571_v40, %s4425_s17 }
 0x849   : > { %2000 = vrot.lane.b32.xlu1 %v4569_v39, %s4425_s17 }
 0x84d   : > { %2165 = vrot.lane.b32.xlu1 %v4563_v30, %s4426_s18 }
 0x879   : > { %v1582_v37 = vpop.xlane.xlu0 %1581 }
 0x87a   : > { %v1600_v13 = vsub.f32 %v1552_v57, %v1582_v37 }
 0x87c   : > { %v1579_v50 = vpop.xlane.xlu1 %1578  ;;  %v1610_v54 = vmul.f32 1.442695, %v1600_v13 }
 0x87d   : > { %v1599_v15 = vsub.f32 %v1547_v24, %v1579_v50  ;;  %v1576_v59 = vpop.xlane.xlu0 %1575  ;;  %v1842_v50 = vsel %vm484_vm1, %v4866_v61, 0 }
 0x87e   : > { %v1598_v34 = vsub.f32 %v1544_v62, %v1576_v59 }
 0x87f   : > { %v1608_v55 = vmul.f32 1.442695, %v1599_v15 }
 0x880   : > { %v1606_v14 = vmul.f32 1.442695, %v1598_v34  ;;  %v1826_v59 = vpop.permute.xlu1 %1825 }
 0x881   : > { %4161 = vpow2.f32 %v1608_v55  ;;  %v1585_v33 = vpop.xlane.xlu0 %1584  ;;  %v1848_v34 = vsel %vm484_vm1, %v1826_v59, 0 }
 0x882   : > { %4163 = vpow2.f32 %v1606_v14  ;;  %v1601_v12 = vsub.f32 %v1555_v26, %v1585_v33 }
 0x883   : > { %4165 = vpow2.f32 %v1610_v54 }
 0x884   : > { %v1612_v63 = vmul.f32 1.442695, %v1601_v12 }
 0x885   : > { %v1594_v21 = vpop.xlane.xlu0 %1593 }
 0x886   : > { %4167 = vpow2.f32 %v1612_v63  ;;  %v1604_v54 = vsub.f32 %v4890_v46, %v1594_v21 }
 0x889   : > { %v1588_v22 = vpop.xlane.xlu0 %1587 }
 0x88a   : > { %v1602_v55 = vsub.f32 %v4893_v11, %v1588_v22 }
 0x88b   : > { %v4920_v23 = vpop.eup %4161 }
 0x88c   : > { %v4922_v18 = vpop.eup %4163  ;;  %v1614_v61 = vmul.f32 1.442695, %v1602_v55 }
 0x88d   : > { %v1646_v24 = vpack.c.bf16 %v4920_v23, %v4922_v18  ;;  %v1597_v57 = vpop.xlane.xlu0 %1596  ;;  %v4926_v62 = vpop.eup %4165 }
 0x88e   : > { %v1605_v14 = vsub.f32 %v4897_v51, %v1597_v57  ;;  %4169 = vpow2.f32 %v1614_v61 }
 0x88f   : > { %3876 = vmatprep.mubr.msk.bf16.mxu1 %vm574_vm2, %v1646_v24  ;;  %v1618_v24 = vmul.f32 1.442695, %v1604_v54 }
 0x890   : > { %v4929_v37 = vpop.eup %4167  ;;  %v1620_v33 = vmul.f32 1.442695, %v1605_v14 }
 0x891   : > { %v1647_v26 = vpack.c.bf16 %v4929_v37, %v4926_v62  ;;  %v1824_v13 = vpop.permute.xlu0 %1823 }
 0x892   : > { %v1845_v15 = vsel %vm484_vm1, %v1824_v13, 0  ;;  %4171 = vpow2.f32 %v1620_v33 }
 0x893   : > { %3877 = vmatmul.mubr.msk.bf16.vlgmr.msra.gmra.mrb[24].mxu1 %vm574_vm2, %v1647_v26 }
 0x894   : > { %3885 = vmatpush3.bf16.xpose.msra.mxu1 %v1842_v50 }
 0x895   : > { %4041 = vmatprep.subr.msk.bf16.mxu1 %vm484_vm1, %v1824_v13  ;;  %v1814_v22 = vpop.permute.xlu0 %1813 }
 0x898   : > { %v4945_v46 = vpop.eup %4169 }
 0x899   : > { %v1818_v51 = vpop.permute.xlu0 %1817 }
 0x89c   : > { %3887 = vmatpush3.bf16.xpose.msra.mxu1 %v1845_v15  ;;  %v4947_v57 = vpop.eup %4171 }
 0x89d   : > { %4042 = vmatprep.subr.msk.bf16.mxu1 %vm484_vm1, %v1826_v59  ;;  %v1997_v14 = vpop.permute.xlu0 %1996 }
 0x8a4   : > { %3889 = vmatpush3.bf16.xpose.msra.mxu1 %v1848_v34 }
 0x8b1   : > { %v1591_v12 = vpop.xlane.xlu1 %1590 }
 0x8b2   : > { %v1603_v63 = vsub.f32 %v1563_v20, %v1591_v12 }
 0x8b4   : > { %v1616_v26 = vmul.f32 1.442695, %v1603_v63 }
 0x8b5   : > { %v1828_v50 = vpop.permute.xlu1 %1827 }
 0x8b6   : > { %4173 = vpow2.f32 %v1616_v26  ;;  %4043 = vmatprep.subr.msk.bf16.mxu1 %vm484_vm1, %v1828_v50  ;;  %v1851_v13 = vsel %vm484_vm1, %v1828_v50, 0 }
 0x8b7   : > { %4175 = vpow2.f32 %v1618_v24  ;;  %3891 = vmatpush3.bf16.xpose.msra.mxu1 %v1851_v13 }
 0x8b9   : > { %v1816_v11 = vpop.permute.xlu1 %1815 }
 0x8bd   : > { %v1820_v21 = vpop.permute.xlu1 %1819 }
 0x8c0   : > { %v4949_v20 = vpop.eup %4173 }
 0x8c1   : > { %v4951_v15 = vpop.eup %4175  ;;  %v1995_v59 = vpop.permute.xlu1 %1994  ;;  %v1648_v34 = vpack.c.bf16 %v4949_v20, %v4945_v46 }
 0x8c2   : > { %3900 = vmatprep.subr.bf16.mxu0 %v1995_v59  ;;  %v1649_v55 = vpack.c.bf16 %v4947_v57, %v4951_v15 }
 0x8c3   : > { %3880 = vmatprep.mubr.msk.bf16.mxu1 %vm574_vm2, %v1648_v34  ;;  %3901 = vmatpush3.bf16.msra.mxu0 %v1995_v59  ;;  %v3517_v59 = vld [vmem:[#allocation3 + $0x80] sm:$0xff]  }
 0x8c4   : > { %3881 = vmatmul.mubr.msk.bf16.gmra.mrb[28].mxu1 %vm574_vm2, %v1649_v55  ;;  %3902 = vmatprep.subr.bf16.mxu0 %v1997_v14 }
 0x8c5   : > { %v1999_v54 = vpop.permute.xlu1 %1998  ;;  %3892 = vmatprep.mubr.msk.bf16.mxu1 %vm484_vm1, %v1814_v22 }
 0x8c7   : > { %3903 = vmatpush3.bf16.msra.mxu0 %v1997_v14  ;;  %v3519_v14 = vunpack.c.h.bf16 %v3517_v59 }
 0x8c8   : > { %3904 = vmatprep.subr.bf16.mxu0 %v1999_v54 }
 0x8c9   : > { %v2001_v61 = vpop.permute.xlu1 %2000 }
 0x8cb   : > { %3905 = vmatpush3.bf16.msra.mxu0 %v1999_v54 }
 0x8cc   : > { %3893 = vmatmul.mubr.msk.bf16.vlgmr.msra.gmra.mrb[32].mxu1 %vm484_vm1, %v1816_v11  ;;  %3906 = vmatprep.subr.bf16.mxu0 %v2001_v61  ;;  %v3592_v11 = vld [vmem:[#allocation3 + $0x88] sm:$0xff]  }
 0x8cd   : > { %3896 = vmatprep.mubr.msk.bf16.mxu1 %vm484_vm1, %v1818_v51  ;;  %v4962_v33 = vpop.permute.xlu1 %2165  ;;  %v3522_v34 = vunpack.c.l.bf16 %v3592_v11  ;;  %v3523_v35 = vunpack.c.h.bf16 %v3592_v11 }
 0x8cf   : > { %3907 = vmatpush3.bf16.msra.mxu0 %v2001_v61 }
 0x8d0   : > { %4044 = vmatprep.subr.msk.bf16.mxu0 %vm484_vm1, %v4962_v33 }
 0x8d4   : > { %3897 = vmatmul.mubr.msk.bf16.gmra.mrb[36].mxu1 %vm484_vm1, %v1820_v21  ;;  %v3518_v21 = vunpack.c.l.bf16 %v3517_v59 }
 0x966   : > { %v4967_v12 = vpop.f32.mrb[24].mxu1 }
 0x967   : > { %5799 = vst [vmem:[#allocation38_spill] sm:$0xff] %v4967_v12  ;;  %v4969_v63 = vpop.f32.mrb[25].mxu1 }
 0x968   : > { %5800 = vst [vmem:[#allocation39_spill] sm:$0xff] %v4969_v63  ;;  %v4971_v24 = vpop.f32.mrb[26].mxu1 }
 0x969   : > { %5801 = vst [vmem:[#allocation40_spill] sm:$0xff] %v4971_v24  ;;  %v4973_v26 = vpop.f32.mrb[27].mxu1 }
 0x96a   : > { %5802 = vst [vmem:[#allocation41_spill] sm:$0xff] %v4973_v26 }
 0x997   : > { %v4975_v50 = vpop.f32.mrb[28].mxu1 }
 0x998   : > { %5803 = vst [vmem:[#allocation42_spill] sm:$0xff] %v4975_v50  ;;  %v4977_v13 = vpop.f32.mrb[29].mxu1 }
 0x999   : > { %5804 = vst [vmem:[#allocation43_spill] sm:$0xff] %v4977_v13  ;;  %v4979_v22 = vpop.f32.mrb[30].mxu1  ;;  %v3594_v13 = vld [vmem:[#allocation3 + $0x98] sm:$0xff]  }
 0x99a   : > { %5805 = vst [vmem:[#allocation44_spill] sm:$0xff] %v4979_v22  ;;  %v4981_v51 = vpop.f32.mrb[31].mxu1  ;;  %v3530_v58 = vunpack.c.l.bf16 %v3594_v13 }
 0x99b   : > { %5806 = vst [vmem:[#allocation45_spill] sm:$0xff] %v4981_v51 }
 0x99f   : > { %v3894_v55 = vpop.f32.mrb[32].mxu1 }
 0x9a0   : > { %v1896_v54 = vadd.f32 %v3894_v55, %v3522_v34  ;;  %v1887_v61 = vpop.f32.mrb[33].mxu1  ;;  %v3593_v34 = vld [vmem:[#allocation3 + $0x90] sm:$0xff]  }
 0x9a1   : > { %v3895_v19 = vpop.f32.mrb[34].mxu1  ;;  %v1888_v43 = vadd.f32 %v3518_v21, %v1887_v61  ;;  %v3526_v11 = vunpack.c.l.bf16 %v3593_v34 }
 0x9a2   : > { %v1890_v24 = vpop.f32.mrb[35].mxu1  ;;  %v1924_v50 = vsel %vm574_vm2, %v1896_v54, -inf  ;;  %v1899_v2 = vadd.f32 %v3895_v19, %v3523_v35 }
 0x9a3   : > { %v1891_v26 = vadd.f32 %v3519_v14, %v1890_v24  ;;  %1925 = vmax.xlane.f32.xlu0 %v1924_v50  ;;  %v1918_v51 = vsel %vm574_vm2, %v1888_v43, -inf  ;;  %v3531_v14 = vunpack.c.h.bf16 %v3594_v13  ;;  %v3527_v13 = vunpack.c.h.bf16 %v3593_v34 }
 0x9a4   : > { %v1927_v24 = vsel %vm574_vm2, %v1899_v2, -inf }
 0x9a5   : > { %v1921_v22 = vsel %vm574_vm2, %v1891_v26, -inf }
 0x9a6   : > { %1922 = vmax.xlane.f32.xlu1 %v1921_v22 }
 0x9a7   : > { %1919 = vmax.xlane.f32.xlu0 %v1918_v51  ;;  %v3898_v59 = vpop.f32.mrb[36].mxu1 }
 0x9a8   : > { %v1903_v55 = vpop.f32.mrb[37].mxu1  ;;  %v4986_v21 = vadd.f32 %v3898_v59, %v3530_v58 }
 0x9a9   : > { %v3899_v12 = vpop.f32.mrb[38].mxu1  ;;  %v4989_v50 = vadd.f32 %v3526_v11, %v1903_v55 }
 0x9aa   : > { %v1906_v61 = vpop.f32.mrb[39].mxu1  ;;  %v1936_v19 = vsel %vm574_vm2, %v4986_v21, -inf  ;;  %v4993_v35 = vadd.f32 %v3899_v12, %v3531_v14 }
 0x9ab   : > { %1928 = vmax.xlane.f32.xlu0 %v1927_v24  ;;  %v1930_v22 = vsel %vm574_vm2, %v4989_v50, -inf  ;;  %v1907_v12 = vadd.f32 %v3527_v13, %v1906_v61 }
 0x9ac   : > { %v1939_v58 = vsel %vm574_vm2, %v4993_v35, -inf }
 0x9ad   : > { %v1933_v51 = vsel %vm574_vm2, %v1907_v12, -inf }
 0x9af   : > { %1937 = vmax.xlane.f32.xlu0 %v1936_v19 }
 0x9b3   : > { %1931 = vmax.xlane.f32.xlu0 %v1930_v22 }
 0x9b7   : > { %2169 = vrot.lane.b32.xlu1 %v4571_v40, %s4426_s18  ;;  %1940 = vmax.xlane.f32.xlu0 %v1939_v58 }
 0x9cd   : > { %2167 = vrot.lane.b32.xlu0 %v4561_v29, %s4426_s18 }
 0x9d1   : > { %2157 = vrot.lane.b32.xlu0 %v4563_v30, %s4427_s19 }
 0x9d5   : > { %2161 = vrot.lane.b32.xlu0 %v4571_v40, %s4427_s19 }
 0x9d9   : > { %2340 = vrot.lane.b32.xlu0 %v4561_v29, %s4428_s20 }
 0x9db   : > { %1934 = vmax.xlane.f32.xlu1 %v1933_v51 }
 0x9ec   : > { %2171 = vrot.lane.b32.xlu1 %v4569_v39, %s4426_s18 }
 0x9f0   : > { %2159 = vrot.lane.b32.xlu1 %v4561_v29, %s4427_s19 }
 0x9f4   : > { %2163 = vrot.lane.b32.xlu1 %v4569_v39, %s4427_s19 }
 0x9f8   : > { %2338 = vrot.lane.b32.xlu1 %v4563_v30, %s4428_s20 }
 0x9fc   : > { %2342 = vrot.lane.b32.xlu1 %v4571_v40, %s4428_s20 }
 0xa00   : > { %2344 = vrot.lane.b32.xlu1 %v4569_v39, %s4428_s20 }
 0xa04   : > { %2509 = vrot.lane.b32.xlu1 %v4563_v30, %s4429_s23 }
 0xa30   : > { %v1926_v59 = vpop.xlane.xlu0 %1925 }
 0xa31   : > { %v1944_v55 = vsub.f32 %v1896_v54, %v1926_v59 }
 0xa33   : > { %v1923_v34 = vpop.xlane.xlu1 %1922  ;;  %v1954_v22 = vmul.f32 1.442695, %v1944_v55 }
 0xa34   : > { %v1943_v11 = vsub.f32 %v1891_v26, %v1923_v34  ;;  %v1920_v61 = vpop.xlane.xlu0 %1919  ;;  %v2186_v34 = vsel %vm484_vm1, %v4962_v33, 0 }
 0xa35   : > { %v1942_v24 = vsub.f32 %v1888_v43, %v1920_v61 }
 0xa36   : > { %v1952_v14 = vmul.f32 1.442695, %v1943_v11 }
 0xa37   : > { %v1950_v19 = vmul.f32 1.442695, %v1942_v24  ;;  %v2170_v61 = vpop.permute.xlu1 %2169 }
 0xa38   : > { %4177 = vpow2.f32 %v1952_v14  ;;  %v1929_v58 = vpop.xlane.xlu0 %1928  ;;  %v2192_v24 = vsel %vm484_vm1, %v2170_v61, 0 }
 0xa39   : > { %4179 = vpow2.f32 %v1950_v19  ;;  %v1945_v13 = vsub.f32 %v1899_v2, %v1929_v58 }
 0xa3a   : > { %4181 = vpow2.f32 %v1954_v22 }
 0xa3b   : > { %v1956_v51 = vmul.f32 1.442695, %v1945_v13 }
 0xa3c   : > { %v1938_v31 = vpop.xlane.xlu0 %1937 }
 0xa3d   : > { %4183 = vpow2.f32 %v1956_v51  ;;  %v1948_v22 = vsub.f32 %v4986_v21, %v1938_v31 }
 0xa40   : > { %v1932_v63 = vpop.xlane.xlu0 %1931 }
 0xa41   : > { %v1946_v14 = vsub.f32 %v4989_v50, %v1932_v63 }
 0xa42   : > { %v5016_v27 = vpop.eup %4177 }
 0xa43   : > { %v5018_v0 = vpop.eup %4179  ;;  %v1958_v33 = vmul.f32 1.442695, %v1946_v14 }
 0xa44   : > { %v1990_v26 = vpack.c.bf16 %v5016_v27, %v5018_v0  ;;  %v1941_v43 = vpop.xlane.xlu0 %1940  ;;  %v5022_v54 = vpop.eup %4181 }
 0xa45   : > { %v1949_v19 = vsub.f32 %v4993_v35, %v1941_v43  ;;  %4185 = vpow2.f32 %v1958_v33 }
 0xa46   : > { %3908 = vmatprep.mubr.msk.bf16.mxu0 %vm574_vm2, %v1990_v26  ;;  %v1962_v26 = vmul.f32 1.442695, %v1948_v22 }
 0xa47   : > { %v5025_v59 = vpop.eup %4183  ;;  %v1964_v58 = vmul.f32 1.442695, %v1949_v19 }
 0xa48   : > { %v1991_v2 = vpack.c.bf16 %v5025_v59, %v5022_v54  ;;  %v2168_v55 = vpop.permute.xlu0 %2167 }
 0xa49   : > { %v2189_v11 = vsel %vm484_vm1, %v2168_v55, 0  ;;  %4187 = vpow2.f32 %v1964_v58 }
 0xa4a   : > { %3909 = vmatmul.mubr.msk.bf16.vlgmr.msra.gmra.mrb[40].mxu0 %vm574_vm2, %v1991_v2 }
 0xa4b   : > { %3917 = vmatpush3.bf16.xpose.msra.mxu0 %v2186_v34 }
 0xa4c   : > { %4045 = vmatprep.subr.msk.bf16.mxu0 %vm484_vm1, %v2168_v55  ;;  %v2158_v63 = vpop.permute.xlu0 %2157 }
 0xa4f   : > { %v5041_v21 = vpop.eup %4185 }
 0xa50   : > { %v2162_v35 = vpop.permute.xlu0 %2161 }
 0xa53   : > { %3919 = vmatpush3.bf16.xpose.msra.mxu0 %v2189_v11  ;;  %v5043_v43 = vpop.eup %4187 }
 0xa54   : > { %4046 = vmatprep.subr.msk.bf16.mxu0 %vm484_vm1, %v2170_v61  ;;  %v2341_v19 = vpop.permute.xlu0 %2340 }
 0xa5b   : > { %3921 = vmatpush3.bf16.xpose.msra.mxu0 %v2192_v24 }
 0xa68   : > { %v1935_v13 = vpop.xlane.xlu1 %1934 }
 0xa69   : > { %v1947_v51 = vsub.f32 %v1907_v12, %v1935_v13 }
 0xa6b   : > { %v1960_v2 = vmul.f32 1.442695, %v1947_v51 }
 0xa6c   : > { %v2172_v34 = vpop.permute.xlu1 %2171 }
 0xa6d   : > { %4189 = vpow2.f32 %v1960_v2  ;;  %4047 = vmatprep.subr.msk.bf16.mxu0 %vm484_vm1, %v2172_v34  ;;  %v2195_v55 = vsel %vm484_vm1, %v2172_v34, 0 }
 0xa6e   : > { %4191 = vpow2.f32 %v1962_v26  ;;  %3923 = vmatpush3.bf16.xpose.msra.mxu0 %v2195_v55 }
 0xa70   : > { %v2160_v50 = vpop.permute.xlu1 %2159 }
 0xa74   : > { %v2164_v31 = vpop.permute.xlu1 %2163 }
 0xa77   : > { %v5045_v12 = vpop.eup %4189 }
 0xa78   : > { %v5047_v11 = vpop.eup %4191  ;;  %v2339_v61 = vpop.permute.xlu1 %2338  ;;  %v1992_v24 = vpack.c.bf16 %v5045_v12, %v5041_v21 }
 0xa79   : > { %3932 = vmatprep.subr.bf16.mxu1 %v2339_v61  ;;  %v1993_v14 = vpack.c.bf16 %v5043_v43, %v5047_v11 }
 0xa7a   : > { %3912 = vmatprep.mubr.msk.bf16.mxu0 %vm574_vm2, %v1992_v24  ;;  %3933 = vmatpush3.bf16.msra.mxu1 %v2339_v61  ;;  %v3533_v61 = vld [vmem:[#allocation3 + $0xa0] sm:$0xff]  }
 0xa7b   : > { %3913 = vmatmul.mubr.msk.bf16.gmra.mrb[44].mxu0 %vm574_vm2, %v1993_v14  ;;  %3934 = vmatprep.subr.bf16.mxu1 %v2341_v19 }
 0xa7c   : > { %v2343_v22 = vpop.permute.xlu1 %2342  ;;  %3924 = vmatprep.mubr.msk.bf16.mxu0 %vm484_vm1, %v2158_v63 }
 0xa7e   : > { %3935 = vmatpush3.bf16.msra.mxu1 %v2341_v19  ;;  %v3535_v19 = vunpack.c.h.bf16 %v3533_v61 }
 0xa7f   : > { %3936 = vmatprep.subr.bf16.mxu1 %v2343_v22 }
 0xa80   : > { %v2345_v33 = vpop.permute.xlu1 %2344 }
 0xa82   : > { %3937 = vmatpush3.bf16.msra.mxu1 %v2343_v22 }
 0xa83   : > { %3925 = vmatmul.mubr.msk.bf16.vlgmr.msra.gmra.mrb[48].mxu0 %vm484_vm1, %v2160_v50  ;;  %3938 = vmatprep.subr.bf16.mxu1 %v2345_v33  ;;  %v3595_v50 = vld [vmem:[#allocation3 + $0xa8] sm:$0xff]  }
 0xa84   : > { %3928 = vmatprep.mubr.msk.bf16.mxu0 %vm484_vm1, %v2162_v35  ;;  %v5058_v58 = vpop.permute.xlu1 %2509  ;;  %v3538_v24 = vunpack.c.l.bf16 %v3595_v50 }
 0xa86   : > { %3939 = vmatpush3.bf16.msra.mxu1 %v2345_v33 }
 0xa87   : > { %4048 = vmatprep.subr.msk.bf16.mxu1 %vm484_vm1, %v5058_v58 }
 0xa8b   : > { %3929 = vmatmul.mubr.msk.bf16.gmra.mrb[52].mxu0 %vm484_vm1, %v2164_v31  ;;  %v3534_v31 = vunpack.c.l.bf16 %v3533_v61 }
 0xb1d   : > { %v5063_v13 = vpop.f32.mrb[40].mxu0 }
 0xb1e   : > { %5807 = vst [vmem:[#allocation46_spill] sm:$0xff] %v5063_v13  ;;  %v5065_v51 = vpop.f32.mrb[41].mxu0 }
 0xb1f   : > { %5808 = vst [vmem:[#allocation47_spill] sm:$0xff] %v5065_v51  ;;  %v5067_v26 = vpop.f32.mrb[42].mxu0  ;;  %v3539_v51 = vunpack.c.h.bf16 %v3595_v50 }
 0xb20   : > { %5809 = vst [vmem:[#allocation48_spill] sm:$0xff] %v5067_v26  ;;  %v5069_v2 = vpop.f32.mrb[43].mxu0 }
 0xb21   : > { %5810 = vst [vmem:[#allocation49_spill] sm:$0xff] %v5069_v2 }
 0xb4e   : > { %v5071_v34 = vpop.f32.mrb[44].mxu0 }
 0xb4f   : > { %5811 = vst [vmem:[#allocation50_spill] sm:$0xff] %v5071_v34  ;;  %v5073_v55 = vpop.f32.mrb[45].mxu0 }
 0xb50   : > { %5812 = vst [vmem:[#allocation51_spill] sm:$0xff] %v5073_v55  ;;  %v5075_v63 = vpop.f32.mrb[46].mxu0  ;;  %v3597_v55 = vld [vmem:[#allocation3 + $0xb8] sm:$0xff]  }
 0xb51   : > { %5813 = vst [vmem:[#allocation52_spill] sm:$0xff] %v5075_v63  ;;  %v5077_v35 = vpop.f32.mrb[47].mxu0  ;;  %v3546_v28 = vunpack.c.l.bf16 %v3597_v55 }
 0xb52   : > { %5814 = vst [vmem:[#allocation53_spill] sm:$0xff] %v5077_v35 }
 0xb56   : > { %v3926_v14 = vpop.f32.mrb[48].mxu0 }
 0xb57   : > { %v2240_v22 = vadd.f32 %v3926_v14, %v3538_v24  ;;  %v2231_v33 = vpop.f32.mrb[49].mxu0  ;;  %v3596_v24 = vld [vmem:[#allocation3 + $0xb0] sm:$0xff]  }
 0xb58   : > { %v3927_v13 = vpop.f32.mrb[50].mxu0  ;;  %v2232_v26 = vadd.f32 %v3534_v31, %v2231_v33  ;;  %v3542_v50 = vunpack.c.l.bf16 %v3596_v24 }
 0xb59   : > { %v2234_v2 = vpop.f32.mrb[51].mxu0  ;;  %v2268_v34 = vsel %vm574_vm2, %v2240_v22, -inf  ;;  %v2243_v32 = vadd.f32 %v3927_v13, %v3539_v51 }
 0xb5a   : > { %v2235_v25 = vadd.f32 %v3535_v19, %v2234_v2  ;;  %2269 = vmax.xlane.f32.xlu0 %v2268_v34  ;;  %v2262_v35 = vsel %vm574_vm2, %v2232_v26, -inf  ;;  %v3547_v19 = vunpack.c.h.bf16 %v3597_v55  ;;  %v3543_v55 = vunpack.c.h.bf16 %v3596_v24 }
 0xb5b   : > { %v2271_v2 = vsel %vm574_vm2, %v2243_v32, -inf }
 0xb5c   : > { %v2265_v63 = vsel %vm574_vm2, %v2235_v25, -inf }
 0xb5d   : > { %2266 = vmax.xlane.f32.xlu1 %v2265_v63 }
 0xb5e   : > { %2263 = vmax.xlane.f32.xlu0 %v2262_v35  ;;  %v3930_v61 = vpop.f32.mrb[52].mxu0 }
 0xb5f   : > { %v2247_v14 = vpop.f32.mrb[53].mxu0  ;;  %v5082_v31 = vadd.f32 %v3930_v61, %v3546_v28 }
 0xb60   : > { %v3931_v8 = vpop.f32.mrb[54].mxu0  ;;  %v5085_v34 = vadd.f32 %v3542_v50, %v2247_v14 }
 0xb61   : > { %v2250_v33 = vpop.f32.mrb[55].mxu0  ;;  %v2280_v13 = vsel %vm574_vm2, %v5082_v31, -inf  ;;  %v5089_v51 = vadd.f32 %v3931_v8, %v3547_v19 }
 0xb62   : > { %2272 = vmax.xlane.f32.xlu0 %v2271_v2  ;;  %v2274_v63 = vsel %vm574_vm2, %v5085_v34, -inf  ;;  %v2251_v8 = vadd.f32 %v3543_v55, %v2250_v33 }
 0xb63   : > { %v2283_v28 = vsel %vm574_vm2, %v5089_v51, -inf }
 0xb64   : > { %v2277_v35 = vsel %vm574_vm2, %v2251_v8, -inf }
 0xb66   : > { %2281 = vmax.xlane.f32.xlu0 %v2280_v13 }
 0xb6a   : > { %2275 = vmax.xlane.f32.xlu0 %v2274_v63 }
 0xb6e   : > { %2513 = vrot.lane.b32.xlu1 %v4571_v40, %s4429_s23  ;;  %2284 = vmax.xlane.f32.xlu0 %v2283_v28 }
 0xb84   : > { %2511 = vrot.lane.b32.xlu0 %v4561_v29, %s4429_s23 }
 0xb88   : > { %2501 = vrot.lane.b32.xlu0 %v4563_v30, %s4430_s24 }
 0xb8c   : > { %2505 = vrot.lane.b32.xlu0 %v4571_v40, %s4430_s24 }
 0xb90   : > { %2684 = vrot.lane.b32.xlu0 %v4561_v29, %s4431_s25 }
 0xb92   : > { %2278 = vmax.xlane.f32.xlu1 %v2277_v35 }
 0xba3   : > { %2515 = vrot.lane.b32.xlu1 %v4569_v39, %s4429_s23  ;;  %s266_s23 = scalar_lea.vmem %s5748_s6, %s3450_s15 }
 0xba7   : > { %2503 = vrot.lane.b32.xlu1 %v4561_v29, %s4430_s24 }
 0xbab   : > { %2507 = vrot.lane.b32.xlu1 %v4569_v39, %s4430_s24 }
 0xbaf   : > { %2682 = vrot.lane.b32.xlu1 %v4563_v30, %s4431_s25 }
 0xbb3   : > { %2686 = vrot.lane.b32.xlu1 %v4571_v40, %s4431_s25 }
 0xbb7   : > { %2688 = vrot.lane.b32.xlu1 %v4569_v39, %s4431_s25 }
 0xbbb   : > { %2853 = vrot.lane.b32.xlu1 %v4563_v30, %s4432_s26 }
 0xbe7   : > { %v2270_v61 = vpop.xlane.xlu0 %2269 }
 0xbe8   : > { %v2288_v14 = vsub.f32 %v2240_v22, %v2270_v61 }
 0xbea   : > { %v2267_v24 = vpop.xlane.xlu1 %2266  ;;  %v2298_v63 = vmul.f32 1.442695, %v2288_v14 }
 0xbeb   : > { %v2287_v50 = vsub.f32 %v2235_v25, %v2267_v24  ;;  %v2264_v33 = vpop.xlane.xlu0 %2263  ;;  %v2530_v24 = vsel %vm484_vm1, %v5058_v58, 0 }
 0xbec   : > { %v2286_v2 = vsub.f32 %v2232_v26, %v2264_v33 }
 0xbed   : > { %v2296_v19 = vmul.f32 1.442695, %v2287_v50 }
 0xbee   : > { %v2294_v13 = vmul.f32 1.442695, %v2286_v2  ;;  %v2514_v33 = vpop.permute.xlu1 %2513 }
 0xbef   : > { %4193 = vpow2.f32 %v2296_v19  ;;  %v2273_v28 = vpop.xlane.xlu0 %2272  ;;  %v2536_v2 = vsel %vm484_vm1, %v2514_v33, 0 }
 0xbf0   : > { %4195 = vpow2.f32 %v2294_v13  ;;  %v2289_v55 = vsub.f32 %v2243_v32, %v2273_v28 }
 0xbf1   : > { %4197 = vpow2.f32 %v2298_v63 }
 0xbf2   : > { %v2300_v35 = vmul.f32 1.442695, %v2289_v55 }
 0xbf3   : > { %v2282_v9 = vpop.xlane.xlu0 %2281 }
 0xbf4   : > { %4199 = vpow2.f32 %v2300_v35  ;;  %v2292_v63 = vsub.f32 %v5082_v31, %v2282_v9 }
 0xbf7   : > { %v2276_v49 = vpop.xlane.xlu0 %2275 }
 0xbf8   : > { %v2290_v19 = vsub.f32 %v5085_v34, %v2276_v49 }
 0xbf9   : > { %v5112_v10 = vpop.eup %4193 }
 0xbfa   : > { %v5114_v44 = vpop.eup %4195  ;;  %v2302_v58 = vmul.f32 1.442695, %v2290_v19 }
 0xbfb   : > { %v2334_v25 = vpack.c.bf16 %v5112_v10, %v5114_v44  ;;  %v2285_v26 = vpop.xlane.xlu0 %2284  ;;  %v5118_v22 = vpop.eup %4197 }
 0xbfc   : > { %v2293_v13 = vsub.f32 %v5089_v51, %v2285_v26  ;;  %4201 = vpow2.f32 %v2302_v58 }
 0xbfd   : > { %3940 = vmatprep.mubr.msk.bf16.mxu1 %vm574_vm2, %v2334_v25  ;;  %v2306_v25 = vmul.f32 1.442695, %v2292_v63 }
 0xbfe   : > { %v5121_v61 = vpop.eup %4199  ;;  %v2308_v28 = vmul.f32 1.442695, %v2293_v13 }
 0xbff   : > { %v2335_v32 = vpack.c.bf16 %v5121_v61, %v5118_v22  ;;  %v2512_v14 = vpop.permute.xlu0 %2511 }
 0xc00   : > { %v2533_v50 = vsel %vm484_vm1, %v2512_v14, 0  ;;  %4203 = vpow2.f32 %v2308_v28 }
 0xc01   : > { %3941 = vmatmul.mubr.msk.bf16.vlgmr.msra.gmra.mrb[40].mxu1 %vm574_vm2, %v2335_v32 }
 0xc02   : > { %3949 = vmatpush3.bf16.xpose.msra.mxu1 %v2530_v24 }
 0xc03   : > { %4049 = vmatprep.subr.msk.bf16.mxu1 %vm484_vm1, %v2512_v14  ;;  %v2502_v49 = vpop.permute.xlu0 %2501 }
 0xc06   : > { %v5137_v31 = vpop.eup %4201 }
 0xc07   : > { %v2506_v51 = vpop.permute.xlu0 %2505 }
 0xc0a   : > { %3951 = vmatpush3.bf16.xpose.msra.mxu1 %v2533_v50  ;;  %v5139_v26 = vpop.eup %4203 }
 0xc0b   : > { %4050 = vmatprep.subr.msk.bf16.mxu1 %vm484_vm1, %v2514_v33  ;;  %5815 = vst [vmem:[#allocation54_spill] sm:$0xff] %v5139_v26  ;;  %v2685_v13 = vpop.permute.xlu0 %2684 }
 0xc12   : > { %3953 = vmatpush3.bf16.xpose.msra.mxu1 %v2536_v2 }
 0xc1f   : > { %v2279_v55 = vpop.xlane.xlu1 %2278 }
 0xc20   : > { %v2291_v35 = vsub.f32 %v2251_v8, %v2279_v55 }
 0xc22   : > { %v2304_v32 = vmul.f32 1.442695, %v2291_v35 }
 0xc23   : > { %v2516_v24 = vpop.permute.xlu1 %2515 }
 0xc24   : > { %4205 = vpow2.f32 %v2304_v32  ;;  %4051 = vmatprep.subr.msk.bf16.mxu1 %vm484_vm1, %v2516_v24  ;;  %v2539_v14 = vsel %vm484_vm1, %v2516_v24, 0 }
 0xc25   : > { %4207 = vpow2.f32 %v2306_v25  ;;  %3955 = vmatpush3.bf16.xpose.msra.mxu1 %v2539_v14 }
 0xc27   : > { %v2504_v34 = vpop.permute.xlu1 %2503 }
 0xc2b   : > { %v2508_v9 = vpop.permute.xlu1 %2507 }
 0xc2e   : > { %v5141_v8 = vpop.eup %4205 }
 0xc2f   : > { %v5143_v50 = vpop.eup %4207  ;;  %v2683_v33 = vpop.permute.xlu1 %2682  ;;  %v2336_v2 = vpack.c.bf16 %v5141_v8, %v5137_v31 }
 0xc30   : > { %3964 = vmatprep.subr.bf16.mxu0 %v2683_v33  ;;  %v2337_v19 = vpack.c.bf16 %v5139_v26, %v5143_v50 }
 0xc31   : > { %3944 = vmatprep.mubr.msk.bf16.mxu1 %vm574_vm2, %v2336_v2  ;;  %3965 = vmatpush3.bf16.msra.mxu0 %v2683_v33  ;;  %v3549_v33 = vld [vmem:[#allocation3 + $0xc0] sm:$0xff]  }
 0xc32   : > { %3945 = vmatmul.mubr.msk.bf16.gmra.mrb[44].mxu1 %vm574_vm2, %v2337_v19  ;;  %3966 = vmatprep.subr.bf16.mxu0 %v2685_v13 }
 0xc33   : > { %v2687_v63 = vpop.permute.xlu1 %2686  ;;  %3956 = vmatprep.mubr.msk.bf16.mxu1 %vm484_vm1, %v2502_v49 }
 0xc35   : > { %3967 = vmatpush3.bf16.msra.mxu0 %v2685_v13  ;;  %v3551_v13 = vunpack.c.h.bf16 %v3549_v33 }
 0xc36   : > { %3968 = vmatprep.subr.bf16.mxu0 %v2687_v63 }
 0xc37   : > { %v2689_v58 = vpop.permute.xlu1 %2688 }
 0xc39   : > { %3969 = vmatpush3.bf16.msra.mxu0 %v2687_v63 }
 0xc3a   : > { %3957 = vmatmul.mubr.msk.bf16.vlgmr.msra.gmra.mrb[48].mxu1 %vm484_vm1, %v2504_v34  ;;  %3970 = vmatprep.subr.bf16.mxu0 %v2689_v58  ;;  %v3598_v34 = vld [vmem:[#allocation3 + $0xc8] sm:$0xff]  }
 0xc3b   : > { %3960 = vmatprep.mubr.msk.bf16.mxu1 %vm484_vm1, %v2506_v51  ;;  %v5154_v28 = vpop.permute.xlu1 %2853  ;;  %v3554_v2 = vunpack.c.l.bf16 %v3598_v34 }
 0xc3d   : > { %3971 = vmatpush3.bf16.msra.mxu0 %v2689_v58 }
 0xc3e   : > { %4052 = vmatprep.subr.msk.bf16.mxu0 %vm484_vm1, %v5154_v28 }
 0xc42   : > { %3961 = vmatmul.mubr.msk.bf16.gmra.mrb[52].mxu1 %vm484_vm1, %v2508_v9  ;;  %v3550_v9 = vunpack.c.l.bf16 %v3549_v33 }
 0xcd4   : > { %v5159_v55 = vpop.f32.mrb[40].mxu1 }
 0xcd5   : > { %5816 = vst [vmem:[#allocation55_spill] sm:$0xff] %v5159_v55  ;;  %v5161_v35 = vpop.f32.mrb[41].mxu1 }
 0xcd6   : > { %5817 = vst [vmem:[#allocation56_spill] sm:$0xff] %v5161_v35  ;;  %v5163_v25 = vpop.f32.mrb[42].mxu1 }
 0xcd7   : > { %5818 = vst [vmem:[#allocation57_spill] sm:$0xff] %v5163_v25  ;;  %v5165_v32 = vpop.f32.mrb[43].mxu1 }
 0xcd8   : > { %5819 = vst [vmem:[#allocation58_spill] sm:$0xff] %v5165_v32  ;;  %v3555_v32 = vunpack.c.h.bf16 %v3598_v34 }
 0xd05   : > { %v5167_v24 = vpop.f32.mrb[44].mxu1 }
 0xd06   : > { %5820 = vst [vmem:[#allocation59_spill] sm:$0xff] %v5167_v24  ;;  %v5169_v14 = vpop.f32.mrb[45].mxu1 }
 0xd07   : > { %5821 = vst [vmem:[#allocation60_spill] sm:$0xff] %v5169_v14  ;;  %v5171_v49 = vpop.f32.mrb[46].mxu1 }
 0xd08   : > { %5822 = vst [vmem:[#allocation61_spill] sm:$0xff] %v5171_v49  ;;  %v5173_v51 = vpop.f32.mrb[47].mxu1  ;;  %v3600_v49 = vld [vmem:[#allocation3 + $0xd8] sm:$0xff]  }
 0xd09   : > { %5823 = vst [vmem:[#allocation62_spill] sm:$0xff] %v5173_v51  ;;  %v3562_v33 = vunpack.c.l.bf16 %v3600_v49 }
 0xd0d   : > { %v3958_v19 = vpop.f32.mrb[48].mxu1 }
 0xd0e   : > { %v5175_v63 = vadd.f32 %v3958_v19, %v3554_v2  ;;  %v2575_v58 = vpop.f32.mrb[49].mxu1  ;;  %v3599_v19 = vld [vmem:[#allocation3 + $0xd0] sm:$0xff]  }
 0xd0f   : > { %v3959_v25 = vpop.f32.mrb[50].mxu1  ;;  %v2576_v55 = vadd.f32 %v3550_v9, %v2575_v58  ;;  %v3558_v58 = vunpack.c.l.bf16 %v3599_v19 }
 0xd10   : > { %v2578_v35 = vpop.f32.mrb[51].mxu1  ;;  %v2612_v24 = vsel %vm574_vm2, %v5175_v63, -inf  ;;  %v2587_v7 = vadd.f32 %v3959_v25, %v3555_v32 }
 0xd11   : > { %v2579_v14 = vadd.f32 %v3551_v13, %v2578_v35  ;;  %2613 = vmax.xlane.f32.xlu0 %v2612_v24  ;;  %v2606_v48 = vsel %vm574_vm2, %v2576_v55, -inf  ;;  %v3563_v13 = vunpack.c.h.bf16 %v3600_v49 }
 0xd12   : > { %v2615_v35 = vsel %vm574_vm2, %v2587_v7, -inf }
 0xd13   : > { %v2609_v51 = vsel %vm574_vm2, %v2579_v14, -inf }
 0xd14   : > { %2610 = vmax.xlane.f32.xlu1 %v2609_v51 }
 0xd15   : > { %2607 = vmax.xlane.f32.xlu0 %v2606_v48  ;;  %v3962_v2 = vpop.f32.mrb[52].mxu1 }
 0xd16   : > { %v2591_v45 = vpop.f32.mrb[53].mxu1  ;;  %v5181_v34 = vadd.f32 %v3962_v2, %v3562_v33  ;;  %v934_v2 = vsel %vm574_vm2, %v4730_v38, 0.0 }
 0xd17   : > { %v3963_v9 = vpop.f32.mrb[54].mxu1  ;;  %v5184_v24 = vadd.f32 %v3558_v58, %v2591_v45  ;;  %v3559_v45 = vunpack.c.h.bf16 %v3599_v19 }
 0xd18   : > { %v2594_v26 = vpop.f32.mrb[55].mxu1  ;;  %v2624_v25 = vsel %vm574_vm2, %v5181_v34, -inf  ;;  %v5188_v32 = vadd.f32 %v3963_v9, %v3563_v13 }
 0xd19   : > { %2616 = vmax.xlane.f32.xlu0 %v2615_v35  ;;  %v2618_v48 = vsel %vm574_vm2, %v5184_v24, -inf  ;;  %v2595_v49 = vadd.f32 %v3559_v45, %v2594_v26  ;;  %v937_v26 = vsel %vm574_vm2, %v4728_v36, 0.0 }
 0xd1a   : > { %v2627_v51 = vsel %vm574_vm2, %v5188_v32, -inf }
 0xd1b   : > { %v2621_v33 = vsel %vm574_vm2, %v2595_v49, -inf }
 0xd1d   : > { %2625 = vmax.xlane.f32.xlu0 %v2624_v25 }
 0xd21   : > { %2619 = vmax.xlane.f32.xlu0 %v2618_v48 }
 0xd25   : > { %2857 = vrot.lane.b32.xlu1 %v4571_v40, %s4432_s26  ;;  %2628 = vmax.xlane.f32.xlu0 %v2627_v51 }
 0xd3b   : > { %2855 = vrot.lane.b32.xlu0 %v4561_v29, %s4432_s26 }
 0xd3f   : > { %2845 = vrot.lane.b32.xlu0 %v4563_v30, %s4433_s27 }
 0xd43   : > { %2849 = vrot.lane.b32.xlu0 %v4571_v40, %s4433_s27 }
 0xd47   : > { %3028 = vrot.lane.b32.xlu0 %v4561_v29, %s4434_s28 }
 0xd49   : > { %2622 = vmax.xlane.f32.xlu1 %v2621_v33 }
 0xd5a   : > { %2859 = vrot.lane.b32.xlu1 %v4569_v39, %s4432_s26 }
 0xd5e   : > { %2847 = vrot.lane.b32.xlu1 %v4561_v29, %s4433_s27 }
 0xd62   : > { %2851 = vrot.lane.b32.xlu1 %v4569_v39, %s4433_s27 }
 0xd66   : > { %3026 = vrot.lane.b32.xlu1 %v4563_v30, %s4434_s28  ;;  %935 = vadd.xlane.f32.xlu0 %v934_v2 }
 0xd6a   : > { %3030 = vrot.lane.b32.xlu1 %v4571_v40, %s4434_s28 }
 0xd6e   : > { %3032 = vrot.lane.b32.xlu1 %v4569_v39, %s4434_s28 }
 0xd92   : > { %938 = vadd.xlane.f32.xlu1 %v937_v26  ;;  %v2874_v26 = vsel %vm484_vm1, %v5154_v28, 0 }
 0xd9e   : > { %v2614_v19 = vpop.xlane.xlu0 %2613 }
 0xd9f   : > { %v2632_v29 = vsub.f32 %v5175_v63, %v2614_v19 }
 0xda1   : > { %v2611_v9 = vpop.xlane.xlu1 %2610  ;;  %v2642_v48 = vmul.f32 1.442695, %v2632_v29 }
 0xda2   : > { %v2631_v58 = vsub.f32 %v2579_v14, %v2611_v9  ;;  %v2608_v35 = vpop.xlane.xlu0 %2607 }
 0xda3   : > { %v2630_v13 = vsub.f32 %v2576_v55, %v2608_v35 }
 0xda4   : > { %v2640_v25 = vmul.f32 1.442695, %v2631_v58 }
 0xda5   : > { %v2638_v38 = vmul.f32 1.442695, %v2630_v13  ;;  %v2858_v29 = vpop.permute.xlu1 %2857 }
 0xda6   : > { %4209 = vpow2.f32 %v2640_v25  ;;  %v2617_v30 = vpop.xlane.xlu0 %2616  ;;  %v2880_v58 = vsel %vm484_vm1, %v2858_v29, 0 }
 0xda7   : > { %4211 = vpow2.f32 %v2638_v38  ;;  %v2633_v40 = vsub.f32 %v2587_v7, %v2617_v30 }
 0xda8   : > { %4213 = vpow2.f32 %v2642_v48 }
 0xda9   : > { %v2644_v51 = vmul.f32 1.442695, %v2633_v40 }
 0xdaa   : > { %v2626_v39 = vpop.xlane.xlu0 %2625 }
 0xdab   : > { %4215 = vpow2.f32 %v2644_v51  ;;  %v2636_v25 = vsub.f32 %v5181_v34, %v2626_v39 }
 0xdad   : > { %v2650_v40 = vmul.f32 1.442695, %v2636_v25 }
 0xdae   : > { %v2620_v36 = vpop.xlane.xlu0 %2619 }
 0xdaf   : > { %v2634_v35 = vsub.f32 %v5184_v24, %v2620_v36 }
 0xdb0   : > { %v5214_v45 = vpop.eup %4209 }
 0xdb1   : > { %v5216_v33 = vpop.eup %4211  ;;  %v2646_v28 = vmul.f32 1.442695, %v2634_v35 }
 0xdb2   : > { %v2678_v14 = vpack.c.bf16 %v5214_v45, %v5216_v33  ;;  %v2629_v55 = vpop.xlane.xlu0 %2628  ;;  %v5220_v63 = vpop.eup %4213 }
 0xdb3   : > { %v2637_v13 = vsub.f32 %v5188_v32, %v2629_v55  ;;  %4217 = vpow2.f32 %v2646_v28 }
 0xdb4   : > { %3972 = vmatprep.mubr.msk.bf16.mxu0 %vm574_vm2, %v2678_v14 }
 0xdb5   : > { %v5223_v2 = vpop.eup %4215  ;;  %v2652_v38 = vmul.f32 1.442695, %v2637_v13 }
 0xdb6   : > { %v2679_v7 = vpack.c.bf16 %v5223_v2, %v5220_v63  ;;  %v2856_v19 = vpop.permute.xlu0 %2855 }
 0xdb7   : > { %v2877_v9 = vsel %vm484_vm1, %v2856_v19, 0  ;;  %4219 = vpow2.f32 %v2652_v38 }
 0xdb8   : > { %3973 = vmatmul.mubr.msk.bf16.vlgmr.msra.gmra.mrb[56].mxu0 %vm574_vm2, %v2679_v7 }
 0xdb9   : > { %3981 = vmatpush3.bf16.xpose.msra.mxu0 %v2874_v26 }
 0xdba   : > { %4053 = vmatprep.subr.msk.bf16.mxu0 %vm484_vm1, %v2856_v19  ;;  %v2846_v24 = vpop.permute.xlu0 %2845 }
 0xdbd   : > { %v5239_v39 = vpop.eup %4217 }
 0xdbe   : > { %v2850_v36 = vpop.permute.xlu0 %2849 }
 0xdc1   : > { %3983 = vmatpush3.bf16.xpose.msra.mxu0 %v2877_v9  ;;  %v5241_v55 = vpop.eup %4219 }
 0xdc2   : > { %4054 = vmatprep.subr.msk.bf16.mxu0 %vm484_vm1, %v2858_v29 }
 0xdc9   : > { %3985 = vmatpush3.bf16.xpose.msra.mxu0 %v2880_v58  ;;  %v3029_v58 = vpop.permute.xlu0 %3028 }
 0xdd6   : > { %v2623_v48 = vpop.xlane.xlu1 %2622 }
 0xdd7   : > { %v2635_v30 = vsub.f32 %v2595_v49, %v2623_v48 }
 0xdd9   : > { %v2648_v51 = vmul.f32 1.442695, %v2635_v30 }
 0xdda   : > { %v2860_v14 = vpop.permute.xlu1 %2859 }
 0xddb   : > { %4221 = vpow2.f32 %v2648_v51  ;;  %4055 = vmatprep.subr.msk.bf16.mxu0 %vm484_vm1, %v2860_v14  ;;  %v2883_v7 = vsel %vm484_vm1, %v2860_v14, 0  ;;  %v3601_v14 = vld [vmem:[#allocation3 + $0xe8] sm:$0xff]  }
 0xddc   : > { %4223 = vpow2.f32 %v2650_v40  ;;  %3987 = vmatpush3.bf16.xpose.msra.mxu0 %v2883_v7 }
 0xdde   : > { %v2848_v32 = vpop.permute.xlu1 %2847 }
 0xde2   : > { %v2852_v34 = vpop.permute.xlu1 %2851 }
 0xde5   : > { %v5243_v49 = vpop.eup %4221 }
 0xde6   : > { %v5245_v26 = vpop.eup %4223  ;;  %v3027_v19 = vpop.permute.xlu1 %3026  ;;  %v2680_v9 = vpack.c.bf16 %v5243_v49, %v5239_v39 }
 0xde7   : > { %3996 = vmatprep.subr.bf16.mxu1 %v3027_v19  ;;  %v2681_v29 = vpack.c.bf16 %v5241_v55, %v5245_v26 }
 0xde8   : > { %3976 = vmatprep.mubr.msk.bf16.mxu0 %vm574_vm2, %v2680_v9  ;;  %3997 = vmatpush3.bf16.msra.mxu1 %v3027_v19 }
 0xde9   : > { %3977 = vmatmul.mubr.msk.bf16.gmra.mrb[60].mxu0 %vm574_vm2, %v2681_v29  ;;  %3998 = vmatprep.subr.bf16.mxu1 %v3029_v58 }
 0xdea   : > { %v3031_v35 = vpop.permute.xlu1 %3030  ;;  %3988 = vmatprep.mubr.msk.bf16.mxu0 %vm484_vm1, %v2846_v24  ;;  %v3565_v24 = vld [vmem:[#allocation3 + $0xe0] sm:$0xff]  }
 0xdeb   : > { %v3567_v19 = vunpack.c.h.bf16 %v3565_v24 }
 0xdec   : > { %3999 = vmatpush3.bf16.msra.mxu1 %v3029_v58 }
 0xded   : > { %4000 = vmatprep.subr.bf16.mxu1 %v3031_v35 }
 0xdee   : > { %v3033_v13 = vpop.permute.xlu1 %3032 }
 0xdf0   : > { %4001 = vmatpush3.bf16.msra.mxu1 %v3031_v35  ;;  %v3603_v35 = vld [vmem:[#allocation3 + $0xf8] sm:$0xff]  }
 0xdf1   : > { %3989 = vmatmul.mubr.msk.bf16.vlgmr.msra.gmra.mrb[64].mxu0 %vm484_vm1, %v2848_v32  ;;  %4002 = vmatprep.subr.bf16.mxu1 %v3033_v13  ;;  %v3570_v32 = vunpack.c.l.bf16 %v3601_v14 }
 0xdf2   : > { %3992 = vmatprep.mubr.msk.bf16.mxu0 %vm484_vm1, %v2850_v36  ;;  %v3566_v36 = vunpack.c.l.bf16 %v3565_v24 }
 0xdf4   : > { %4003 = vmatpush3.bf16.msra.mxu1 %v3033_v13 }
 0xdf9   : > { %3993 = vmatmul.mubr.msk.bf16.gmra.mrb[68].mxu0 %vm484_vm1, %v2852_v34 }
 0xe8b   : > { %v5257_v25 = vpop.f32.mrb[56].mxu0 }
 0xe8c   : > { %5824 = vst [vmem:[#allocation63_spill] sm:$0xff] %v5257_v25  ;;  %v5259_v28 = vpop.f32.mrb[57].mxu0 }
 0xe8d   : > { %5825 = vst [vmem:[#allocation64_spill] sm:$0xff] %v5259_v28  ;;  %v5261_v38 = vpop.f32.mrb[58].mxu0 }
 0xe8e   : > { %5826 = vst [vmem:[#allocation65_spill] sm:$0xff] %v5261_v38  ;;  %v5263_v48 = vpop.f32.mrb[59].mxu0 }
 0xe8f   : > { %5827 = vst [vmem:[#allocation66_spill] sm:$0xff] %v5263_v48  ;;  %v3578_v48 = vunpack.c.l.bf16 %v3603_v35 }
 0xebc   : > { %v5265_v30 = vpop.f32.mrb[60].mxu0 }
 0xebd   : > { %5828 = vst [vmem:[#allocation67_spill] sm:$0xff] %v5265_v30  ;;  %v5267_v40 = vpop.f32.mrb[61].mxu0  ;;  %v3571_v30 = vunpack.c.h.bf16 %v3601_v14  ;;  %v3579_v14 = vunpack.c.h.bf16 %v3603_v35 }
 0xebe   : > { %5829 = vst [vmem:[#allocation68_spill] sm:$0xff] %v5267_v40  ;;  %v5269_v51 = vpop.f32.mrb[62].mxu0 }
 0xebf   : > { %5830 = vst [vmem:[#allocation69_spill] sm:$0xff] %v5269_v51  ;;  %v5271_v7 = vpop.f32.mrb[63].mxu0 }
 0xec0   : > { %5831 = vst [vmem:[#allocation70_spill] sm:$0xff] %v5271_v7  ;;  %v3602_v7 = vld [vmem:[#allocation3 + $0xf0] sm:$0xff]  }
 0xec4   : > { %v3990_v34 = vpop.f32.mrb[64].mxu0 }
 0xec5   : > { %v5273_v9 = vadd.f32 %v3990_v34, %v3570_v32  ;;  %v2919_v29 = vpop.f32.mrb[65].mxu0  ;;  %v3574_v34 = vunpack.c.l.bf16 %v3602_v7 }
 0xec6   : > { %v3991_v58 = vpop.f32.mrb[66].mxu0  ;;  %v5275_v13 = vadd.f32 %v3566_v36, %v2919_v29 }
 0xec7   : > { %5832 = vst [vmem:[#allocation71_spill] sm:$0xff] %v5273_v9  ;;  %v2922_v38 = vpop.f32.mrb[67].mxu0  ;;  %v2956_v40 = vsel %vm574_vm2, %v5273_v9, -inf  ;;  %v5283_v32 = vadd.f32 %v3991_v58, %v3571_v30 }
 0xec8   : > { %v5279_v51 = vadd.f32 %v3567_v19, %v2922_v38  ;;  %2957 = vmax.xlane.f32.xlu0 %v2956_v40  ;;  %v2950_v36 = vsel %vm574_vm2, %v5275_v13, -inf  ;;  %v3575_v40 = vunpack.c.h.bf16 %v3602_v7 }
 0xec9   : > { %v2959_v30 = vsel %vm574_vm2, %v5283_v32, -inf }
 0xeca   : > { %5833 = vst [vmem:[#allocation72_spill] sm:$0xff] %v5279_v51  ;;  %v2953_v24 = vsel %vm574_vm2, %v5279_v51, -inf }
 0xecb   : > { %2954 = vmax.xlane.f32.xlu1 %v2953_v24 }
 0xecc   : > { %2951 = vmax.xlane.f32.xlu0 %v2950_v36  ;;  %v3994_v29 = vpop.f32.mrb[68].mxu0  ;;  %v1278_v36 = vsel %vm574_vm2, %v4826_v52, 0.0  ;;  %v1281_v52 = vsel %vm574_vm2, %v4824_v47, 0.0  ;;  %v1631_v47 = vsel %vm574_vm2, %v4929_v37, 0.0  ;;  %v2660_v37 = vsel %vm574_vm2, %v5220_v63, 0.0 }
 0xecd   : > { %v5287_v25 = vadd.f32 %v3994_v29, %v3578_v48  ;;  %v2935_v38 = vpop.f32.mrb[69].mxu0  ;;  %v1622_v29 = vsel %vm574_vm2, %v4922_v18, 0.0  ;;  %v1625_v18 = vsel %vm574_vm2, %v4920_v23, 0.0  ;;  %v1975_v23 = vsel %vm574_vm2, %v5025_v59, 0.0 }
 0xece   : > { %v3995_v19 = vpop.f32.mrb[70].mxu0  ;;  %v5289_v28 = vadd.f32 %v3574_v34, %v2935_v38  ;;  %v1284_v34 = vsel %vm574_vm2, %v4830_v60, 0.0  ;;  %v1628_v38 = vsel %vm574_vm2, %v4926_v62, 0.0  ;;  %v1966_v60 = vsel %vm574_vm2, %v5018_v0, 0.0 }
 0xecf   : > { %v5291_v9 = vadd.f32 %v3995_v19, %v3579_v14  ;;  %v2938_v51 = vpop.f32.mrb[71].mxu0  ;;  %v2968_v58 = vsel %vm574_vm2, %v5287_v25, -inf  ;;  %v943_v14 = vsel %vm574_vm2, %v4737_v42, 0.0  ;;  %v1972_v42 = vsel %vm574_vm2, %v5022_v54, 0.0  ;;  %v5835_v19 = vld [vmem:[#allocation7_spill] sm:$0xff] }
 0xed0   : > { %2960 = vmax.xlane.f32.xlu0 %v2959_v30  ;;  %2969 = vmax.xlane.f32.xlu1 %v2968_v58  ;;  %v5297_v35 = vadd.f32 %v3575_v40, %v2938_v51  ;;  %v2962_v7 = vsel %vm574_vm2, %v5289_v28, -inf  ;;  %v940_v51 = vsel %vm574_vm2, %v4734_v41, 0.0  ;;  %v1287_v41 = vsel %vm574_vm2, %v4833_v53, 0.0 }
 0xed1   : > { %v2971_v48 = vsel %vm574_vm2, %v5291_v9, -inf  ;;  %v2310_v62 = vsel %vm574_vm2, %v5114_v44, 0.0  ;;  %v1969_v53 = vsel %vm574_vm2, %v5016_v27, 0.0  ;;  %v2316_v0 = vsel %vm574_vm2, %v5118_v22, 0.0 }
 0xed2   : > { %v2965_v24 = vsel %vm574_vm2, %v5297_v35, -inf  ;;  %v2654_v54 = vsel %vm574_vm2, %v5216_v33, 0.0  ;;  %v2313_v44 = vsel %vm574_vm2, %v5112_v10, 0.0  ;;  %v2319_v27 = vsel %vm574_vm2, %v5121_v61, 0.0 }
 0xed3   : > { %v946_v22 = vsel %vm574_vm2, %v4753_v3, 0.0  ;;  %v2657_v59 = vsel %vm574_vm2, %v5214_v45, 0.0  ;;  %v952_v33 = vsel %vm574_vm2, %v4759_v6, 0.0  ;;  %v2663_v10 = vsel %vm574_vm2, %v5223_v2, 0.0 }
 0xed4   : > { %2972 = vmax.xlane.f32.xlu0 %v2971_v48  ;;  %2963 = vmax.xlane.f32.xlu1 %v2962_v7  ;;  %v1290_v63 = vsel %vm574_vm2, %v4849_v16, 0.0  ;;  %v949_v3 = vsel %vm574_vm2, %v4757_v4, 0.0  ;;  %v1296_v61 = vsel %vm574_vm2, %v4855_v1, 0.0  ;;  %v955_v6 = vsel %vm574_vm2, %v4755_v5, 0.0  ;;  %v936_v48 = vpop.xlane.xlu0 %935  ;;  %v5838_v7 = vld [vmem:[#allocation6_spill] sm:$0xff] }
 0xed5   : > { %v1634_v45 = vsel %vm574_vm2, %v4945_v46, 0.0  ;;  %v1293_v16 = vsel %vm574_vm2, %v4853_v56, 0.0  ;;  %v1640_v2 = vsel %vm574_vm2, %v4951_v15, 0.0  ;;  %v1299_v4 = vsel %vm574_vm2, %v4851_v17, 0.0 }
 0xed6   : > { %v1978_v1 = vsel %vm574_vm2, %v5041_v21, 0.0  ;;  %v1637_v5 = vsel %vm574_vm2, %v4949_v20, 0.0  ;;  %v1984_v46 = vsel %vm574_vm2, %v5047_v11, 0.0  ;;  %v1643_v56 = vsel %vm574_vm2, %v4947_v57, 0.0 }
 0xed7   : > { %v2322_v15 = vsel %vm574_vm2, %v5137_v31, 0.0  ;;  %v1981_v17 = vsel %vm574_vm2, %v5045_v12, 0.0  ;;  %v2328_v21 = vsel %vm574_vm2, %v5143_v50, 0.0  ;;  %v1987_v20 = vsel %vm574_vm2, %v5043_v43, 0.0  ;;  %v5834_v12 = vld [vmem:[#allocation54_spill] sm:$0xff] }
 0xed8   : > { %2966 = vmax.xlane.f32.xlu0 %v2965_v24  ;;  %1279 = vadd.xlane.f32.xlu1 %v1278_v36  ;;  %v2666_v11 = vsel %vm574_vm2, %v5239_v39, 0.0  ;;  %v2325_v57 = vsel %vm574_vm2, %v5141_v8, 0.0  ;;  %v2672_v31 = vsel %vm574_vm2, %v5245_v26, 0.0  ;;  %v2331_v50 = vsel %vm574_vm2, %v5834_v12, 0.0  ;;  %v5836_v39 = vld [vmem:[#allocation8_spill] sm:$0xff]  ;;  %v5837_v26 = vld [vmem:[#allocation10_spill] sm:$0xff] }
 0xed9   : > { %v623_v40 = vsel %vm574_vm2, %v5835_v19, 0.0  ;;  %v2669_v43 = vsel %vm574_vm2, %v5243_v49, 0.0  ;;  %v629_v30 = vsel %vm574_vm2, %v5836_v39, 0.0  ;;  %v2675_v8 = vsel %vm574_vm2, %v5241_v55, 0.0  ;;  %v5839_v36 = vld [vmem:[#allocation13_spill] sm:$0xff]  ;;  %v5841_v55 = vld [vmem:[#allocation12_spill] sm:$0xff] }
 0xeda   : > { %v635_v58 = vsel %vm574_vm2, %v5837_v26, 0.0  ;;  %v626_v24 = vsel %vm574_vm2, %v5838_v7, 0.0  ;;  %v641_v49 = vsel %vm574_vm2, %v5839_v36, 0.0  ;;  %4225 = vrcp.f32 %v936_v48 }
 0xedc   : > { %941 = vadd.xlane.f32.xlu0 %v940_v51  ;;  %1285 = vadd.xlane.f32.xlu1 %v1284_v34  ;;  %v5840_v51 = vld [vmem:[#allocation9_spill] sm:$0xff] }
 0xedd   : > { %v632_v34 = vsel %vm574_vm2, %v5840_v51, 0.0  ;;  %v5848_v51 = vld [vmem:[#allocation30_spill] sm:$0xff] }
 0xee0   : > { %944 = vadd.xlane.f32.xlu0 %v943_v14  ;;  %1623 = vadd.xlane.f32.xlu1 %v1622_v29  ;;  %v638_v14 = vsel %vm574_vm2, %v5841_v55, 0.0  ;;  %v5842_v29 = vld [vmem:[#allocation11_spill] sm:$0xff] }
 0xee4   : > { %1282 = vadd.xlane.f32.xlu0 %v1281_v52  ;;  %1629 = vadd.xlane.f32.xlu1 %v1628_v38  ;;  %v644_v52 = vsel %vm574_vm2, %v5842_v29, 0.0  ;;  %v4226_v38 = vpop.eup %4225 }
 0xee8   : > { %1288 = vadd.xlane.f32.xlu0 %v1287_v41  ;;  %1967 = vadd.xlane.f32.xlu1 %v1966_v60  ;;  %v5843_v41 = vld [vmem:[#allocation23_spill] sm:$0xff] }
 0xee9   : > { %v1059_v60 = vmul.f32 %v4226_v38, %v5843_v41 }
 0xeec   : > { %1626 = vadd.xlane.f32.xlu0 %v1625_v18  ;;  %1973 = vadd.xlane.f32.xlu1 %v1972_v42  ;;  %v939_v18 = vpop.xlane.xlu1 %938 }
 0xeed   : > { %4227 = vrcp.f32 %v939_v18  ;;  %v5850_v18 = vld [vmem:[#allocation39_spill] sm:$0xff] }
 0xef0   : > { %1632 = vadd.xlane.f32.xlu0 %v1631_v47  ;;  %2311 = vadd.xlane.f32.xlu1 %v2310_v62 }
 0xef4   : > { %1970 = vadd.xlane.f32.xlu0 %v1969_v53  ;;  %2317 = vadd.xlane.f32.xlu1 %v2316_v0  ;;  %v5844_v53 = vld [vmem:[#allocation72_spill] sm:$0xff] }
 0xef7   : > { %v4228_v62 = vpop.eup %4227 }
 0xef8   : > { %1976 = vadd.xlane.f32.xlu0 %v1975_v23  ;;  %2655 = vadd.xlane.f32.xlu1 %v2654_v54  ;;  %v5845_v54 = vld [vmem:[#allocation71_spill] sm:$0xff] }
 0xefc   : > { %2314 = vadd.xlane.f32.xlu0 %v2313_v44  ;;  %2661 = vadd.xlane.f32.xlu1 %v2660_v37 }
 0xf00   : > { %2320 = vadd.xlane.f32.xlu0 %v2319_v27  ;;  %947 = vadd.xlane.f32.xlu1 %v946_v22 }
 0xf04   : > { %2658 = vadd.xlane.f32.xlu0 %v2657_v59  ;;  %953 = vadd.xlane.f32.xlu1 %v952_v33  ;;  %v5846_v59 = vld [vmem:[#allocation25_spill] sm:$0xff] }
 0xf05   : > { %v1060_v33 = vmul.f32 %v4228_v62, %v5846_v59 }
 0xf08   : > { %2664 = vadd.xlane.f32.xlu0 %v2663_v10  ;;  %1291 = vadd.xlane.f32.xlu1 %v1290_v63 }
 0xf0c   : > { %950 = vadd.xlane.f32.xlu0 %v949_v3  ;;  %1297 = vadd.xlane.f32.xlu1 %v1296_v61 }
 0xf10   : > { %956 = vadd.xlane.f32.xlu0 %v955_v6  ;;  %1635 = vadd.xlane.f32.xlu1 %v1634_v45 }
 0xf14   : > { %1294 = vadd.xlane.f32.xlu0 %v1293_v16  ;;  %1641 = vadd.xlane.f32.xlu1 %v1640_v2 }
 0xf18   : > { %1300 = vadd.xlane.f32.xlu0 %v1299_v4  ;;  %1979 = vadd.xlane.f32.xlu1 %v1978_v1 }
 0xf1c   : > { %1638 = vadd.xlane.f32.xlu0 %v1637_v5  ;;  %1985 = vadd.xlane.f32.xlu1 %v1984_v46 }
 0xf20   : > { %1644 = vadd.xlane.f32.xlu0 %v1643_v56  ;;  %2323 = vadd.xlane.f32.xlu1 %v2322_v15 }
 0xf24   : > { %1982 = vadd.xlane.f32.xlu0 %v1981_v17  ;;  %2329 = vadd.xlane.f32.xlu1 %v2328_v21 }
 0xf28   : > { %1988 = vadd.xlane.f32.xlu0 %v1987_v20  ;;  %2667 = vadd.xlane.f32.xlu1 %v2666_v11 }
 0xf2c   : > { %2326 = vadd.xlane.f32.xlu0 %v2325_v57  ;;  %2673 = vadd.xlane.f32.xlu1 %v2672_v31 }
 0xf30   : > { %2332 = vadd.xlane.f32.xlu0 %v2331_v50  ;;  %624 = vadd.xlane.f32.xlu1 %v623_v40 }
 0xf34   : > { %2670 = vadd.xlane.f32.xlu0 %v2669_v43  ;;  %630 = vadd.xlane.f32.xlu1 %v629_v30 }
 0xf38   : > { %2676 = vadd.xlane.f32.xlu0 %v2675_v8  ;;  %636 = vadd.xlane.f32.xlu1 %v635_v58  ;;  %v5847_v8 = vld [vmem:[#allocation31_spill] sm:$0xff] }
 0xf3c   : > { %627 = vadd.xlane.f32.xlu0 %v626_v24  ;;  %642 = vadd.xlane.f32.xlu1 %v641_v49 }
 0xf40   : > { %633 = vadd.xlane.f32.xlu0 %v632_v34 }
 0xf44   : > { %639 = vadd.xlane.f32.xlu0 %v638_v14  ;;  %v5849_v14 = vld [vmem:[#allocation22_spill] sm:$0xff] }
 0xf48   : > { %645 = vadd.xlane.f32.xlu0 %v644_v52 }
 0xf4d   : > { %1075 = vrot.lane.b32.xlu1 %v1059_v60, %s4435_s29 }
 0xf55   : > { %v2958_v42 = vpop.xlane.xlu0 %2957 }
 0xf56   : > { %v2976_v44 = vsub.f32 %v5845_v54, %v2958_v42 }
 0xf58   : > { %v2955_v47 = vpop.xlane.xlu1 %2954  ;;  %v2986_v3 = vmul.f32 1.442695, %v2976_v44  ;;  %v5852_v44 = vld [vmem:[#allocation38_spill] sm:$0xff] }
 0xf59   : > { %v2975_v0 = vsub.f32 %v5844_v53, %v2955_v47  ;;  %v2952_v23 = vpop.xlane.xlu0 %2951  ;;  %v5851_v47 = vld [vmem:[#allocation24_spill] sm:$0xff] }
 0xf5a   : > { %v2974_v37 = vsub.f32 %v5275_v13, %v2952_v23 }
 0xf5b   : > { %v2984_v27 = vmul.f32 1.442695, %v2975_v0 }
 0xf5c   : > { %v2982_v22 = vmul.f32 1.442695, %v2974_v37 }
 0xf5d   : > { %4229 = vpow2.f32 %v2984_v27  ;;  %v2970_v10 = vpop.xlane.xlu1 %2969  ;;  %v2961_v63 = vpop.xlane.xlu0 %2960  ;;  %v5853_v27 = vld [vmem:[#allocation33_spill] sm:$0xff] }
 0xf5e   : > { %4231 = vpow2.f32 %v2982_v22  ;;  %v2980_v61 = vsub.f32 %v5287_v25, %v2970_v10  ;;  %v2977_v6 = vsub.f32 %v5283_v32, %v2961_v63  ;;  %1077 = vrot.lane.b32.xlu0 %v1060_v33, %s4435_s29 }
 0xf5f   : > { %4233 = vpow2.f32 %v2986_v3  ;;  %v5854_v3 = vld [vmem:[#allocation47_spill] sm:$0xff] }
 0xf60   : > { %v2988_v45 = vmul.f32 1.442695, %v2977_v6  ;;  %v2994_v13 = vmul.f32 1.442695, %v2980_v61  ;;  %v5855_v6 = vld [vmem:[#allocation32_spill] sm:$0xff] }
 0xf61   : > { %v2964_v16 = vpop.xlane.xlu1 %2963  ;;  %v2973_v2 = vpop.xlane.xlu0 %2972 }
 0xf62   : > { %v2978_v4 = vsub.f32 %v5289_v28, %v2964_v16  ;;  %v2981_v1 = vsub.f32 %v5291_v9, %v2973_v2  ;;  %4235 = vpow2.f32 %v2988_v45 }
 0xf63   : > { %4237 = vpow2.f32 %v2994_v13 }
 0xf64   : > { %v2990_v5 = vmul.f32 1.442695, %v2978_v4  ;;  %v2996_v46 = vmul.f32 1.442695, %v2981_v1  ;;  %v5856_v1 = vld [vmem:[#allocation46_spill] sm:$0xff] }
 0xf65   : > { %v1280_v56 = vpop.xlane.xlu1 %1279  ;;  %v2967_v15 = vpop.xlane.xlu0 %2966 }
 0xf66   : > { %v2979_v25 = vsub.f32 %v5297_v35, %v2967_v15  ;;  %4239 = vpow2.f32 %v2990_v5 }
 0xf67   : > { %v5425_v32 = vpop.eup %4229  ;;  %4241 = vrcp.f32 %v1280_v56 }
 0xf68   : > { %v5427_v17 = vpop.eup %4231  ;;  %v2992_v21 = vmul.f32 1.442695, %v2979_v25  ;;  %4243 = vpow2.f32 %v2996_v46  ;;  %v5857_v46 = vld [vmem:[#allocation41_spill] sm:$0xff] }
 0xf69   : > { %v1286_v20 = vpop.xlane.xlu1 %1285  ;;  %v942_v28 = vpop.xlane.xlu0 %941  ;;  %v3022_v9 = vpack.c.bf16 %v5425_v32, %v5427_v17 }
 0xf6a   : > { %4245 = vpow2.f32 %v2992_v21  ;;  %v5432_v11 = vpop.eup %4233 }
 0xf6b   : > { %4247 = vrcp.f32 %v1286_v20  ;;  %4004 = vmatprep.mubr.msk.bf16.mxu1 %vm574_vm2, %v3022_v9 }
 0xf6c   : > { %4249 = vrcp.f32 %v942_v28  ;;  %v5434_v35 = vpop.eup %4235  ;;  %v5858_v28 = vld [vmem:[#allocation56_spill] sm:$0xff] }
 0xf6d   : > { %v1624_v57 = vpop.xlane.xlu1 %1623  ;;  %v945_v31 = vpop.xlane.xlu0 %944  ;;  %v3023_v12 = vpack.c.bf16 %v5434_v35, %v5432_v11 }
 0xf6e   : > { %4251 = vrcp.f32 %v1624_v57  ;;  %v5438_v50 = vpop.eup %4237  ;;  %v5859_v57 = vld [vmem:[#allocation40_spill] sm:$0xff] }
 0xf6f   : > { %4253 = vrcp.f32 %v945_v31  ;;  %4005 = vmatmul.mubr.msk.bf16.vlgmr.msra.gmra.mrb[56].mxu1 %vm574_vm2, %v3023_v12 }
 0xf70   : > { %v5441_v19 = vpop.eup %4239 }
 0xf71   : > { %v1630_v40 = vpop.xlane.xlu1 %1629  ;;  %v1283_v43 = vpop.xlane.xlu0 %1282 }
 0xf72   : > { %v4242_v39 = vpop.eup %4241  ;;  %4255 = vrcp.f32 %v1630_v40 }
 0xf73   : > { %v5443_v30 = vpop.eup %4243  ;;  %4257 = vrcp.f32 %v1283_v43  ;;  %v1403_v26 = vmul.f32 %v4242_v39, %v5847_v8  ;;  %v5860_v8 = vld [vmem:[#allocation55_spill] sm:$0xff] }
 0xf74   : > { %v5446_v58 = vpop.eup %4245  ;;  %v3025_v55 = vpack.c.bf16 %v5443_v30, %v5438_v50 }
 0xf75   : > { %v4248_v48 = vpop.eup %4247  ;;  %1419 = vrot.lane.b32.xlu0 %v1403_v26, %s4436_s30  ;;  %v1968_v7 = vpop.xlane.xlu1 %1967  ;;  %v3024_v36 = vpack.c.bf16 %v5446_v58, %v5441_v19 }
 0xf76   : > { %v1289_v24 = vpop.xlane.xlu0 %1288  ;;  %v4250_v49 = vpop.eup %4249  ;;  %4259 = vrcp.f32 %v1968_v7  ;;  %v1405_v34 = vmul.f32 %v4248_v48, %v5848_v51  ;;  %v5861_v48 = vld [vmem:[#allocation49_spill] sm:$0xff] }
 0xf77   : > { %4261 = vrcp.f32 %v1289_v24  ;;  %4008 = vmatprep.mubr.msk.bf16.mxu1 %vm574_vm2, %v3024_v36  ;;  %v1061_v29 = vmul.f32 %v4250_v49, %v5849_v14  ;;  %v5863_v14 = vld [vmem:[#allocation48_spill] sm:$0xff] }
 0xf78   : > { %v4252_v52 = vpop.eup %4251  ;;  %4009 = vmatmul.mubr.msk.bf16.gmra.mrb[60].mxu1 %vm574_vm2, %v3025_v55 }
 0xf79   : > { %v4254_v38 = vpop.eup %4253  ;;  %1423 = vrot.lane.b32.xlu0 %v1405_v34, %s4436_s30  ;;  %1079 = vrot.lane.b32.xlu1 %v1061_v29, %s4435_s29  ;;  %v1974_v41 = vpop.xlane.xlu1 %1973  ;;  %v1747_v42 = vmul.f32 %v4252_v52, %v5850_v18  ;;  %v5862_v34 = vld [vmem:[#allocation64_spill] sm:$0xff]  ;;  %v5864_v18 = vld [vmem:[#allocation63_spill] sm:$0xff] }
 0xf7a   : > { %v1627_v60 = vpop.xlane.xlu0 %1626  ;;  %4263 = vrcp.f32 %v1974_v41  ;;  %v1062_v62 = vmul.f32 %v4254_v38, %v5851_v47  ;;  %v5865_v47 = vld [vmem:[#allocation58_spill] sm:$0xff] }
 0xf7b   : > { %4265 = vrcp.f32 %v1627_v60 }
 0xf7c   : > { %v4256_v53 = vpop.eup %4255 }
 0xf7d   : > { %v4258_v0 = vpop.eup %4257  ;;  %1763 = vrot.lane.b32.xlu0 %v1747_v42, %s4437_s7  ;;  %1081 = vrot.lane.b32.xlu1 %v1062_v62, %s4435_s29  ;;  %v2312_v23 = vpop.xlane.xlu1 %2311  ;;  %v1749_v37 = vmul.f32 %v4256_v53, %v5852_v44  ;;  %v5866_v44 = vld [vmem:[#allocation27_spill] sm:$0xff] }
 0xf7e   : > { %v1633_v54 = vpop.xlane.xlu0 %1632  ;;  %4267 = vrcp.f32 %v2312_v23  ;;  %v1404_v22 = vmul.f32 %v4258_v0, %v5853_v27  ;;  %v5867_v27 = vld [vmem:[#allocation57_spill] sm:$0xff] }
 0xf7f   : > { %4269 = vrcp.f32 %v1633_v54 }
 0xf80   : > { %v4260_v59 = vpop.eup %4259 }
 0xf81   : > { %v4262_v33 = vpop.eup %4261  ;;  %1767 = vrot.lane.b32.xlu0 %v1749_v37, %s4437_s7  ;;  %1421 = vrot.lane.b32.xlu1 %v1404_v22, %s4436_s30  ;;  %v2318_v10 = vpop.xlane.xlu1 %2317  ;;  %v2091_v61 = vmul.f32 %v4260_v59, %v5854_v3 }
 0xf82   : > { %v1971_v63 = vpop.xlane.xlu0 %1970  ;;  %4271 = vrcp.f32 %v2318_v10  ;;  %v1406_v45 = vmul.f32 %v4262_v33, %v5855_v6 }
 0xf83   : > { %4273 = vrcp.f32 %v1971_v63  ;;  %v5868_v63 = vld [vmem:[#allocation66_spill] sm:$0xff] }
 0xf84   : > { %v4264_v16 = vpop.eup %4263 }
 0xf85   : > { %v4266_v2 = vpop.eup %4265  ;;  %2107 = vrot.lane.b32.xlu0 %v2091_v61, %s4438_s8  ;;  %1425 = vrot.lane.b32.xlu1 %v1406_v45, %s4436_s30  ;;  %v2656_v13 = vpop.xlane.xlu1 %2655  ;;  %v2093_v5 = vmul.f32 %v4264_v16, %v5856_v1  ;;  %v5869_v16 = vld [vmem:[#allocation65_spill] sm:$0xff] }
 0xf86   : > { %v1977_v4 = vpop.xlane.xlu0 %1976  ;;  %4275 = vrcp.f32 %v2656_v13  ;;  %v1748_v56 = vmul.f32 %v4266_v2, %v5857_v46 }
 0xf87   : > { %4277 = vrcp.f32 %v1977_v4 }
 0xf88   : > { %v4268_v15 = vpop.eup %4267 }
 0xf89   : > { %v4270_v25 = vpop.eup %4269  ;;  %2111 = vrot.lane.b32.xlu0 %v2093_v5, %s4438_s8  ;;  %1765 = vrot.lane.b32.xlu1 %v1748_v56, %s4437_s7  ;;  %v2662_v21 = vpop.xlane.xlu1 %2661  ;;  %v2435_v9 = vmul.f32 %v4268_v15, %v5858_v28  ;;  %v5870_v5 = vld [vmem:[#allocation29_spill] sm:$0xff] }
 0xf8a   : > { %v2315_v20 = vpop.xlane.xlu0 %2314  ;;  %4279 = vrcp.f32 %v2662_v21  ;;  %v1750_v31 = vmul.f32 %v4270_v25, %v5859_v57 }
 0xf8b   : > { %4281 = vrcp.f32 %v2315_v20 }
 0xf8c   : > { %v4272_v12 = vpop.eup %4271 }
 0xf8d   : > { %v4274_v40 = vpop.eup %4273  ;;  %2451 = vrot.lane.b32.xlu0 %v2435_v9, %s4439_s9  ;;  %1769 = vrot.lane.b32.xlu1 %v1750_v31, %s4437_s7  ;;  %v948_v43 = vpop.xlane.xlu1 %947  ;;  %v2437_v26 = vmul.f32 %v4272_v12, %v5860_v8  ;;  %v3001_v8 = vsel %vm574_vm2, %v5425_v32, 0.0  ;;  %v3013_v32 = vsel %vm574_vm2, %v5446_v58, 0.0 }
 0xf8e   : > { %v2321_v39 = vpop.xlane.xlu0 %2320  ;;  %4283 = vrcp.f32 %v948_v43  ;;  %v2092_v7 = vmul.f32 %v4274_v40, %v5861_v48  ;;  %v3007_v40 = vsel %vm574_vm2, %v5434_v35, 0.0 }
 0xf8f   : > { %4285 = vrcp.f32 %v2321_v39 }
 0xf90   : > { %v4276_v24 = vpop.eup %4275 }
 0xf91   : > { %v4278_v36 = vpop.eup %4277  ;;  %2455 = vrot.lane.b32.xlu0 %v2437_v26, %s4439_s9  ;;  %2109 = vrot.lane.b32.xlu1 %v2092_v7, %s4438_s8  ;;  %v5483_v49 = vpop.xlane.xlu1 %953  ;;  %v2779_v55 = vmul.f32 %v4276_v24, %v5862_v34  ;;  %v3019_v7 = vsel %vm574_vm2, %v5443_v30, 0.0 }
 0xf92   : > { %v2659_v51 = vpop.xlane.xlu0 %2658  ;;  %v2094_v29 = vmul.f32 %v4278_v36, %v5863_v14  ;;  %v5872_v14 = vld [vmem:[#allocation15_spill] sm:$0xff] }
 0xf93   : > { %4287 = vrcp.f32 %v2659_v51  ;;  %v5871_v51 = vld [vmem:[#allocation67_spill] sm:$0xff] }
 0xf94   : > { %v4280_v52 = vpop.eup %4279 }
 0xf95   : > { %v4282_v38 = vpop.eup %4281  ;;  %2795 = vrot.lane.b32.xlu0 %v2779_v55, %s4440_s10  ;;  %2113 = vrot.lane.b32.xlu1 %v2094_v29, %s4438_s8  ;;  %v5489_v41 = vpop.xlane.xlu1 %1291  ;;  %v2781_v42 = vmul.f32 %v4280_v52, %v5864_v18  ;;  %v5873_v18 = vld [vmem:[#allocation14_spill] sm:$0xff] }
 0xf96   : > { %v2665_v60 = vpop.xlane.xlu0 %2664  ;;  %v2436_v62 = vmul.f32 %v4282_v38, %v5865_v47 }
 0xf97   : > { %4289 = vrcp.f32 %v2665_v60  ;;  %v3004_v60 = vsel %vm574_vm2, %v5432_v11, 0.0 }
 0xf98   : > { %v4284_v53 = vpop.eup %4283 }
 0xf99   : > { %v4286_v0 = vpop.eup %4285  ;;  %2799 = vrot.lane.b32.xlu0 %v2781_v42, %s4440_s10  ;;  %2453 = vrot.lane.b32.xlu1 %v2436_v62, %s4439_s9  ;;  %v5495_v23 = vpop.xlane.xlu1 %1297  ;;  %v1063_v37 = vmul.f32 %v4284_v53, %v5866_v44  ;;  %v2998_v53 = vsel %vm574_vm2, %v5427_v17, 0.0 }
 0xf9a   : > { %v951_v54 = vpop.xlane.xlu0 %950  ;;  %v2438_v22 = vmul.f32 %v4286_v0, %v5867_v27 }
 0xf9b   : > { %4291 = vrcp.f32 %v951_v54  ;;  %v5874_v54 = vld [vmem:[#allocation19_spill] sm:$0xff] }
 0xf9d   : > { %v4288_v59 = vpop.eup %4287  ;;  %1083 = vrot.lane.b32.xlu0 %v1063_v37, %s4435_s29  ;;  %2457 = vrot.lane.b32.xlu1 %v2438_v22, %s4439_s9  ;;  %v5501_v33 = vpop.xlane.xlu1 %1635  ;;  %v5875_v37 = vld [vmem:[#allocation69_spill] sm:$0xff]  ;;  %v3016_v22 = vsel %vm574_vm2, %v5438_v50, 0.0  ;;  %v5878_v50 = vld [vmem:[#allocation16_spill] sm:$0xff] }
 0xf9e   : > { %v5503_v10 = vpop.xlane.xlu0 %956  ;;  %v2780_v3 = vmul.f32 %v4288_v59, %v5868_v63  ;;  %v5876_v63 = vld [vmem:[#allocation18_spill] sm:$0xff] }
 0xfa1   : > { %v4290_v61 = vpop.eup %4289  ;;  %2797 = vrot.lane.b32.xlu1 %v2780_v3, %s4440_s10  ;;  %v5507_v6 = vpop.xlane.xlu1 %1641 }
 0xfa2   : > { %v5509_v45 = vpop.xlane.xlu0 %1294  ;;  %v2782_v2 = vmul.f32 %v4290_v61, %v5869_v16  ;;  %v5877_v61 = vld [vmem:[#allocation17_spill] sm:$0xff] }
 0xfa5   : > { %v4292_v13 = vpop.eup %4291  ;;  %2801 = vrot.lane.b32.xlu1 %v2782_v2, %s4440_s10  ;;  %v5513_v4 = vpop.xlane.xlu1 %1979 }
 0xfa6   : > { %v5515_v1 = vpop.xlane.xlu0 %1300  ;;  %v1064_v46 = vmul.f32 %v4292_v13, %v5870_v5 }
 0xfa9   : > { %1085 = vrot.lane.b32.xlu1 %v1064_v46, %s4435_s29  ;;  %v5519_v56 = vpop.xlane.xlu1 %1985 }
 0xfaa   : > { %v5521_v15 = vpop.xlane.xlu0 %1638 }
 0xfad   : > { %v5523_v25 = vpop.xlane.xlu1 %2323 }
 0xfae   : > { %v5525_v21 = vpop.xlane.xlu0 %1644 }
 0xfb1   : > { %v5527_v20 = vpop.xlane.xlu1 %2329 }
 0xfb2   : > { %v5529_v28 = vpop.xlane.xlu0 %1982 }
 0xfb5   : > { %v5531_v9 = vpop.xlane.xlu1 %2667 }
 0xfb6   : > { %v5533_v57 = vpop.xlane.xlu0 %1988 }
 0xfb9   : > { %v2674_v31 = vpop.xlane.xlu1 %2673 }
 0xfba   : > { %v5535_v12 = vpop.xlane.xlu0 %2326  ;;  %4293 = vrcp.f32 %v2674_v31  ;;  %v5879_v31 = vld [vmem:[#allocation26_spill] sm:$0xff] }
 0xfbc   : > { %3008 = vadd.xlane.f32.xlu0 %v3007_v40 }
 0xfbd   : > { %v625_v43 = vpop.xlane.xlu1 %624 }
 0xfbe   : > { %v5539_v39 = vpop.xlane.xlu0 %2332  ;;  %4295 = vrcp.f32 %v625_v43 }
 0xfc0   : > { %3002 = vadd.xlane.f32.xlu0 %v3001_v8  ;;  %v5880_v8 = vld [vmem:[#allocation21_spill] sm:$0xff] }
 0xfc1   : > { %v631_v26 = vpop.xlane.xlu1 %630 }
 0xfc2   : > { %v5543_v48 = vpop.xlane.xlu0 %2670  ;;  %4297 = vrcp.f32 %v631_v26 }
 0xfc4   : > { %v4294_v24 = vpop.eup %4293  ;;  %3020 = vadd.xlane.f32.xlu0 %v3019_v7 }
 0xfc5   : > { %v637_v36 = vpop.xlane.xlu1 %636  ;;  %v5548_v34 = vmul.f32 %v4294_v24, %v5871_v51  ;;  %v5882_v24 = vld [vmem:[#allocation20_spill] sm:$0xff] }
 0xfc6   : > { %v2677_v35 = vpop.xlane.xlu0 %2676  ;;  %4299 = vrcp.f32 %v637_v36 }
 0xfc7   : > { %4301 = vrcp.f32 %v2677_v35  ;;  %v5883_v35 = vld [vmem:[#allocation34_spill] sm:$0xff] }
 0xfc8   : > { %v4296_v55 = vpop.eup %4295  ;;  %3014 = vadd.xlane.f32.xlu0 %v3013_v32 }
 0xfc9   : > { %v748_v29 = vmul.f32 %v4296_v55, %v5872_v14  ;;  %v643_v52 = vpop.xlane.xlu1 %642 }
 0xfca   : > { %v628_v38 = vpop.xlane.xlu0 %627  ;;  %4303 = vrcp.f32 %v643_v52 }
 0xfcb   : > { %756 = vst.msk [vmem:[#allocation2] sm:$0xff] %vm484_vm1, %v748_v29  ;;  %4305 = vrcp.f32 %v628_v38 }
 0xfcc   : > { %v4298_v30 = vpop.eup %4297 }
 0xfcd   : > { %v750_v42 = vmul.f32 %v4298_v30, %v5873_v18  ;;  %3005 = vadd.xlane.f32.xlu1 %v3004_v60  ;;  %v1076_v47 = vpop.permute.xlu1 %1075  ;;  %v5886_v30 = vld [vmem:[#allocation42_spill] sm:$0xff]  ;;  %v5887_v18 = vld [vmem:[#allocation37_spill] sm:$0xff] }
 0xfce   : > { %v634_v58 = vpop.xlane.xlu0 %633  ;;  %1100 = vst.msk [vmem:[#allocation2] sm:$0xff] %vm1099_vm3, %v1076_v47 }
 0xfcf   : > { %4307 = vrcp.f32 %v634_v58  ;;  %758 = vst.msk [vmem:[#allocation2 + $0x10] sm:$0xff] %vm484_vm1, %v750_v42 }
 0xfd0   : > { %4309 = vrcp.f32 %v5483_v49  ;;  %v4300_v62 = vpop.eup %4299 }
 0xfd1   : > { %v4302_v0 = vpop.eup %4301  ;;  %v752_v44 = vmul.f32 %v4300_v62, %v5874_v54  ;;  %2999 = vadd.xlane.f32.xlu1 %v2998_v53  ;;  %v5888_v62 = vld [vmem:[#allocation51_spill] sm:$0xff] }
 0xfd2   : > { %v640_v11 = vpop.xlane.xlu0 %639  ;;  %v5564_v27 = vmul.f32 %v4302_v0, %v5875_v37  ;;  %v5889_v0 = vld [vmem:[#allocation36_spill] sm:$0xff]  ;;  %v5890_v37 = vld [vmem:[#allocation50_spill] sm:$0xff] }
 0xfd3   : > { %4311 = vrcp.f32 %v640_v11  ;;  %760 = vst.msk [vmem:[#allocation2 + $0x20] sm:$0xff] %vm484_vm1, %v752_v44 }
 0xfd4   : > { %4313 = vrcp.f32 %v5489_v41  ;;  %v4304_v49 = vpop.eup %4303  ;;  %v3010_v41 = vsel %vm574_vm2, %v5441_v19, 0.0 }
 0xfd5   : > { %v4306_v59 = vpop.eup %4305  ;;  %v754_v17 = vmul.f32 %v4304_v49, %v5876_v63  ;;  %3017 = vadd.xlane.f32.xlu1 %v3016_v22  ;;  %v5891_v22 = vld [vmem:[#allocation45_spill] sm:$0xff] }
 0xfd6   : > { %v646_v3 = vpop.xlane.xlu0 %645  ;;  %v749_v16 = vmul.f32 %v4306_v59, %v5877_v61 }
 0xfd7   : > { %4315 = vrcp.f32 %v646_v3  ;;  %762 = vst.msk [vmem:[#allocation2 + $0x30] sm:$0xff] %vm484_vm1, %v754_v17  ;;  %v5892_v3 = vld [vmem:[#allocation60_spill] sm:$0xff] }
 0xfd8   : > { %4317 = vrcp.f32 %v5495_v23  ;;  %757 = vst.msk [vmem:[#allocation2 + $0x8] sm:$0xff] %vm484_vm1, %v749_v16  ;;  %v5893_v16 = vld [vmem:[#allocation44_spill] sm:$0xff] }
 0xfd9   : > { %v4308_v2 = vpop.eup %4307  ;;  %3011 = vadd.xlane.f32.xlu1 %v3010_v41  ;;  %4319 = vrcp.f32 %v5501_v33  ;;  %v5881_v33 = vld [vmem:[#allocation35_spill] sm:$0xff] }
 0xfda   : > { %v4310_v13 = vpop.eup %4309  ;;  %v751_v5 = vmul.f32 %v4308_v2, %v5878_v50  ;;  %v1078_v46 = vpop.permute.xlu0 %1077  ;;  %4321 = vrcp.f32 %v5503_v10 }
 0xfdb   : > { %1101 = vst.msk [vmem:[#allocation2 + $0x8] sm:$0xff] %vm1099_vm3, %v1078_v46  ;;  %v1065_v40 = vmul.f32 %v4310_v13, %v5879_v31  ;;  %4323 = vrcp.f32 %v5507_v6 }
 0xfdc   : > { %759 = vst.msk [vmem:[#allocation2 + $0x18] sm:$0xff] %vm484_vm1, %v751_v5  ;;  %4325 = vrcp.f32 %v5509_v45  ;;  %v5894_v5 = vld [vmem:[#allocation59_spill] sm:$0xff] }
 0xfdd   : > { %v4312_v23 = vpop.eup %4311  ;;  %4327 = vrcp.f32 %v5513_v4  ;;  %v5884_v4 = vld [vmem:[#allocation43_spill] sm:$0xff] }
 0xfde   : > { %v4314_v43 = vpop.eup %4313  ;;  %v753_v26 = vmul.f32 %v4312_v23, %v5880_v8  ;;  %1087 = vrot.lane.b32.xlu0 %v1065_v40, %s4435_s29  ;;  %4329 = vrcp.f32 %v5515_v1  ;;  %v5885_v1 = vld [vmem:[#allocation28_spill] sm:$0xff]  ;;  %v5895_v23 = vld [vmem:[#allocation53_spill] sm:$0xff] }
 0xfdf   : > { %v1407_v7 = vmul.f32 %v4314_v43, %v5881_v33  ;;  %4331 = vrcp.f32 %v5519_v56  ;;  %v5896_v8 = vld [vmem:[#allocation68_spill] sm:$0xff] }
 0xfe0   : > { %761 = vst.msk [vmem:[#allocation2 + $0x28] sm:$0xff] %vm484_vm1, %v753_v26  ;;  %4333 = vrcp.f32 %v5521_v15 }
 0xfe1   : > { %v4316_v19 = vpop.eup %4315  ;;  %4335 = vrcp.f32 %v5523_v25 }
 0xfe2   : > { %v4318_v10 = vpop.eup %4317  ;;  %v755_v36 = vmul.f32 %v4316_v19, %v5882_v24  ;;  %1427 = vrot.lane.b32.xlu0 %v1407_v7, %s4436_s30  ;;  %4337 = vrcp.f32 %v5525_v21  ;;  %v5897_v19 = vld [vmem:[#allocation52_spill] sm:$0xff] }
 0xfe3   : > { %v4320_v6 = vpop.eup %4319  ;;  %v1409_v51 = vmul.f32 %v4318_v10, %v5883_v35  ;;  %4339 = vrcp.f32 %v5527_v20 }
 0xfe4   : > { %763 = vst.msk [vmem:[#allocation2 + $0x38] sm:$0xff] %vm484_vm1, %v755_v36  ;;  %v4322_v45 = vpop.eup %4321  ;;  %v1751_v14 = vmul.f32 %v4320_v6, %v5884_v4  ;;  %4341 = vrcp.f32 %v5529_v28 }
 0xfe5   : > { %v4324_v55 = vpop.eup %4323  ;;  %v1066_v29 = vmul.f32 %v4322_v45, %v5885_v1  ;;  %4343 = vrcp.f32 %v5531_v9  ;;  %v5899_v45 = vld [vmem:[#allocation61_spill] sm:$0xff]  ;;  %v5900_v1 = vld [vmem:[#allocation70_spill] sm:$0xff] }
 0xfe6   : > { %1431 = vrot.lane.b32.xlu0 %v1409_v51, %s4436_s30  ;;  %v4326_v52 = vpop.eup %4325  ;;  %v1753_v60 = vmul.f32 %v4324_v55, %v5886_v30  ;;  %4345 = vrcp.f32 %v5533_v57 }
 0xfe7   : > { %v1420_v32 = vpop.permute.xlu0 %1419  ;;  %v4328_v15 = vpop.eup %4327  ;;  %v1408_v42 = vmul.f32 %v4326_v52, %v5887_v18  ;;  %4347 = vrcp.f32 %v5535_v12 }
 0xfe8   : > { %1444 = vst.msk [vmem:[#allocation2] sm:$0xff] %vm1443_vm4, %v1420_v32  ;;  %v4330_v47 = vpop.eup %4329  ;;  %v2095_v53 = vmul.f32 %v4328_v15, %v5888_v62  ;;  %4349 = vrcp.f32 %v5539_v39 }
 0xfe9   : > { %v4332_v58 = vpop.eup %4331  ;;  %v1410_v54 = vmul.f32 %v4330_v47, %v5889_v0  ;;  %4351 = vrcp.f32 %v5543_v48  ;;  %v5898_v48 = vld [vmem:[#allocation62_spill] sm:$0xff] }
 0xfea   : > { %1771 = vrot.lane.b32.xlu0 %v1751_v14, %s4437_s7  ;;  %1089 = vrot.lane.b32.xlu1 %v1066_v29, %s4435_s29  ;;  %v4334_v44 = vpop.eup %4333  ;;  %v2097_v49 = vmul.f32 %v4332_v58, %v5890_v37 }
 0xfeb   : > { %v1080_v56 = vpop.permute.xlu1 %1079  ;;  %v1424_v38 = vpop.permute.xlu0 %1423  ;;  %v1752_v59 = vmul.f32 %v4334_v44, %v5891_v22 }
 0xfec   : > { %1102 = vst.msk [vmem:[#allocation2 + $0x10] sm:$0xff] %vm1099_vm3, %v1080_v56  ;;  %v4336_v11 = vpop.eup %4335 }
 0xfed   : > { %1446 = vst.msk [vmem:[#allocation2 + $0x10] sm:$0xff] %vm1443_vm4, %v1424_v38  ;;  %v4338_v63 = vpop.eup %4337  ;;  %v2439_v61 = vmul.f32 %v4336_v11, %v5892_v3 }
 0xfee   : > { %1775 = vrot.lane.b32.xlu0 %v1753_v60, %s4437_s7  ;;  %1429 = vrot.lane.b32.xlu1 %v1408_v42, %s4436_s30  ;;  %v4340_v17 = vpop.eup %4339  ;;  %v1754_v2 = vmul.f32 %v4338_v63, %v5893_v16 }
 0xfef   : > { %v1082_v25 = vpop.permute.xlu1 %1081  ;;  %v1764_v21 = vpop.permute.xlu0 %1763  ;;  %v2441_v46 = vmul.f32 %v4340_v17, %v5894_v5 }
 0xff0   : > { %1103 = vst.msk [vmem:[#allocation2 + $0x18] sm:$0xff] %vm1099_vm3, %v1082_v25  ;;  %v4342_v41 = vpop.eup %4341 }
 0xff1   : > { %1788 = vst.msk [vmem:[#allocation2] sm:$0xff] %vm1787_vm5, %v1764_v21  ;;  %v4344_v50 = vpop.eup %4343  ;;  %v2096_v31 = vmul.f32 %v4342_v41, %v5895_v23 }
 0xff2   : > { %2115 = vrot.lane.b32.xlu0 %v2095_v53, %s4438_s8  ;;  %1433 = vrot.lane.b32.xlu1 %v1410_v54, %s4436_s30  ;;  %v4346_v40 = vpop.eup %4345  ;;  %v2783_v26 = vmul.f32 %v4344_v50, %v5896_v8 }
 0xff3   : > { %v1422_v20 = vpop.permute.xlu1 %1421  ;;  %v1768_v28 = vpop.permute.xlu0 %1767  ;;  %v2098_v33 = vmul.f32 %v4346_v40, %v5897_v19 }
 0xff4   : > { %1445 = vst.msk [vmem:[#allocation2 + $0x8] sm:$0xff] %vm1443_vm4, %v1422_v20  ;;  %v4348_v7 = vpop.eup %4347 }
 0xff5   : > { %1790 = vst.msk [vmem:[#allocation2 + $0x10] sm:$0xff] %vm1787_vm5, %v1768_v28  ;;  %v2440_v36 = vmul.f32 %v4348_v7, %v5898_v48  ;;  %v4350_v6 = vpop.eup %4349 }
 0xff6   : > { %2119 = vrot.lane.b32.xlu0 %v2097_v49, %s4438_s8  ;;  %1773 = vrot.lane.b32.xlu1 %v1752_v59, %s4437_s7  ;;  %v2442_v32 = vmul.f32 %v4350_v6, %v5899_v45  ;;  %v4352_v55 = vpop.eup %4351  ;;  %v4109_v59 = vld [vmem:[%s5746_s4] sm:$0xff]  }
 0xff7   : > { %v1426_v9 = vpop.permute.xlu1 %1425  ;;  %v2108_v57 = vpop.permute.xlu0 %2107  ;;  %v2784_v29 = vmul.f32 %v4352_v55, %v5900_v1  ;;  %4012 = vmatprep.subr.bf16.mxu1 %v4109_v59 }
 0xff8   : > { %1447 = vst.msk [vmem:[#allocation2 + $0x18] sm:$0xff] %vm1443_vm4, %v1426_v9  ;;  %4013 = vmatpush3.bf16.msra.mxu1 %v4109_v59 }
 0xff9   : > { %2132 = vst.msk [vmem:[#allocation2] sm:$0xff] %vm2131_vm6, %v2108_v57 }
 0xffa   : > { %2459 = vrot.lane.b32.xlu0 %v2439_v61, %s4439_s9  ;;  %1777 = vrot.lane.b32.xlu1 %v1754_v2, %s4437_s7  ;;  %v4110_v2 = vld [vmem:[%s5746_s4 + $0x8] sm:$0xff]  }
 0xffb   : > { %v1766_v13 = vpop.permute.xlu1 %1765  ;;  %v2112_v12 = vpop.permute.xlu0 %2111  ;;  %4014 = vmatprep.subr.bf16.mxu1 %v4110_v2 }
 0xffc   : > { %1789 = vst.msk [vmem:[#allocation2 + $0x8] sm:$0xff] %vm1787_vm5, %v1766_v13  ;;  %4015 = vmatpush3.bf16.msra.mxu1 %v4110_v2 }
 0xffd   : > { %2134 = vst.msk [vmem:[#allocation2 + $0x10] sm:$0xff] %vm2131_vm6, %v2112_v12 }
 0xffe   : > { %2463 = vrot.lane.b32.xlu0 %v2441_v46, %s4439_s9  ;;  %2117 = vrot.lane.b32.xlu1 %v2096_v31, %s4438_s8 }
 0xfff   : > { %v1770_v39 = vpop.permute.xlu1 %1769  ;;  %v2452_v43 = vpop.permute.xlu0 %2451 }
0x1000   : > { %1791 = vst.msk [vmem:[#allocation2 + $0x18] sm:$0xff] %vm1787_vm5, %v1770_v39 }
0x1001   : > { %2476 = vst.msk [vmem:[#allocation2] sm:$0xff] %vm2475_vm7, %v2452_v43 }
0x1002   : > { %2803 = vrot.lane.b32.xlu0 %v2783_v26, %s4440_s10  ;;  %2121 = vrot.lane.b32.xlu1 %v2098_v33, %s4438_s8 }
0x1003   : > { %v2110_v10 = vpop.permute.xlu1 %2109  ;;  %v2456_v24 = vpop.permute.xlu0 %2455 }
0x1004   : > { %2133 = vst.msk [vmem:[#allocation2 + $0x8] sm:$0xff] %vm2131_vm6, %v2110_v10 }
0x1005   : > { %2478 = vst.msk [vmem:[#allocation2 + $0x10] sm:$0xff] %vm2475_vm7, %v2456_v24 }
0x1006   : > { %2461 = vrot.lane.b32.xlu1 %v2440_v36, %s4439_s9 }
0x1007   : > { %v2114_v35 = vpop.permute.xlu1 %2113  ;;  %v2796_v51 = vpop.permute.xlu0 %2795 }
0x1008   : > { %2135 = vst.msk [vmem:[#allocation2 + $0x18] sm:$0xff] %vm2131_vm6, %v2114_v35 }
0x1009   : > { %2820 = vst.msk [vmem:[#allocation2] sm:$0xff] %vm2819_vm8, %v2796_v51 }
0x100a   : > { %2465 = vrot.lane.b32.xlu1 %v2442_v32, %s4439_s9 }
0x100b   : > { %v2454_v4 = vpop.permute.xlu1 %2453  ;;  %v2800_v14 = vpop.permute.xlu0 %2799 }
0x100c   : > { %2477 = vst.msk [vmem:[#allocation2 + $0x8] sm:$0xff] %vm2475_vm7, %v2454_v4 }
0x100d   : > { %2822 = vst.msk [vmem:[#allocation2 + $0x10] sm:$0xff] %vm2819_vm8, %v2800_v14 }
0x100e   : > { %2805 = vrot.lane.b32.xlu1 %v2784_v29, %s4440_s10 }
0x100f   : > { %v2458_v52 = vpop.permute.xlu1 %2457  ;;  %v1084_v56 = vpop.permute.xlu0 %1083 }
0x1010   : > { %2479 = vst.msk [vmem:[#allocation2 + $0x18] sm:$0xff] %vm2475_vm7, %v2458_v52 }
0x1011   : > { %1104 = vst.msk [vmem:[#allocation2 + $0x20] sm:$0xff] %vm1099_vm3, %v1084_v56 }
0x1013   : > { %v2798_v38 = vpop.permute.xlu1 %2797 }
0x1014   : > { %2821 = vst.msk [vmem:[#allocation2 + $0x8] sm:$0xff] %vm2819_vm8, %v2798_v38 }
0x1017   : > { %v2802_v15 = vpop.permute.xlu1 %2801 }
0x1018   : > { %2823 = vst.msk [vmem:[#allocation2 + $0x18] sm:$0xff] %vm2819_vm8, %v2802_v15 }
0x101b   : > { %v1086_v30 = vpop.permute.xlu1 %1085 }
0x101c   : > { %1105 = vst.msk [vmem:[#allocation2 + $0x28] sm:$0xff] %vm1099_vm3, %v1086_v30 }
0x1042   : > { %v4006_v60 = vpop.f32.mrb[56].mxu1 }
0x1043   : > { %v3084_v18 = vpop.f32.mrb[57].mxu1 }
0x1044   : > { %v4007_v42 = vpop.f32.mrb[58].mxu1 }
0x1045   : > { %v3087_v47 = vpop.f32.mrb[59].mxu1 }
0x1049   : > { %v3009_v25 = vpop.xlane.xlu0 %3008 }
0x104a   : > { %4353 = vrcp.f32 %v3009_v25 }
0x104b   : > { %v5665_v21 = vpop.f32.mrb[60].mxu1 }
0x104c   : > { %v5667_v58 = vpop.f32.mrb[61].mxu1 }
0x104d   : > { %v3003_v62 = vpop.xlane.xlu0 %3002  ;;  %v4011_v53 = vpop.f32.mrb[62].mxu1 }
0x104e   : > { %4355 = vrcp.f32 %v3003_v62  ;;  %v3103_v0 = vpop.f32.mrb[63].mxu1 }
0x1051   : > { %v3021_v54 = vpop.xlane.xlu0 %3020 }
0x1054   : > { %v4354_v44 = vpop.eup %4353 }
0x1055   : > { %v3015_v20 = vpop.xlane.xlu0 %3014  ;;  %v3126_v28 = vmul.f32 %v4354_v44, %v4007_v42 }
0x1056   : > { %4357 = vrcp.f32 %v3015_v20  ;;  %v3441_v20 = vld [vmem:[%s5747_s5] ss:$0 sm:$0xff] }
0x1057   : > { %3145 = vrot.lane.b32.xlu1 %v3126_v28, %s4441_s11  ;;  %4359 = vrcp.f32 %v3021_v54 }
0x1058   : > { %v4356_v11 = vpop.eup %4355 }
0x1059   : > { %v1088_v37 = vpop.permute.xlu0 %1087  ;;  %v3124_v49 = vmul.f32 %v4356_v11, %v3087_v47 }
0x105a   : > { %1106 = vst.msk [vmem:[#allocation2 + $0x30] sm:$0xff] %vm1099_vm3, %v1088_v37  ;;  %v3006_v22 = vpop.xlane.xlu1 %3005 }
0x105b   : > { %4361 = vrcp.f32 %v3006_v22  ;;  %3141 = vrot.lane.b32.xlu1 %v3124_v49, %s4441_s11 }
0x105d   : > { %v1428_v63 = vpop.permute.xlu0 %1427 }
0x105e   : > { %1448 = vst.msk [vmem:[#allocation2 + $0x20] sm:$0xff] %vm1443_vm4, %v1428_v63  ;;  %v3000_v9 = vpop.xlane.xlu1 %2999 }
0x105f   : > { %4363 = vrcp.f32 %v3000_v9  ;;  %2809 = vrot.lane.b32.xlu1 %v5564_v27, %s4440_s10 }
0x1060   : > { %v4358_v57 = vpop.eup %4357 }
0x1061   : > { %v1432_v17 = vpop.permute.xlu0 %1431  ;;  %v3128_v3 = vmul.f32 %v4358_v57, %v3103_v0  ;;  %v4360_v61 = vpop.eup %4359 }
0x1062   : > { %1450 = vst.msk [vmem:[#allocation2 + $0x30] sm:$0xff] %vm1443_vm4, %v1432_v17  ;;  %v3018_v16 = vpop.xlane.xlu1 %3017  ;;  %v3130_v12 = vmul.f32 %v4360_v61, %v4011_v53 }
0x1063   : > { %3149 = vrot.lane.b32.xlu1 %v3128_v3, %s4441_s11 }
0x1065   : > { %v4362_v41 = vpop.eup %4361  ;;  %v1772_v13 = vpop.permute.xlu0 %1771 }
0x1066   : > { %1792 = vst.msk [vmem:[#allocation2 + $0x20] sm:$0xff] %vm1787_vm5, %v1772_v13  ;;  %v3012_v27 = vpop.xlane.xlu1 %3011  ;;  %v3125_v50 = vmul.f32 %v4362_v41, %v4006_v60 }
0x1067   : > { %4365 = vrcp.f32 %v3012_v27  ;;  %3153 = vrot.lane.b32.xlu1 %v3130_v12, %s4441_s11 }
0x1068   : > { %3143 = vrot.lane.b32.xlu0 %v3125_v50, %s4441_s11  ;;  %4367 = vrcp.f32 %v3018_v16 }
0x1069   : > { %v4364_v5 = vpop.eup %4363  ;;  %v1776_v46 = vpop.permute.xlu0 %1775 }
0x106a   : > { %1794 = vst.msk [vmem:[#allocation2 + $0x30] sm:$0xff] %vm1787_vm5, %v1776_v46  ;;  %v1090_v23 = vpop.permute.xlu1 %1089  ;;  %v3123_v31 = vmul.f32 %v4364_v5, %v3084_v18 }
0x106b   : > { %1107 = vst.msk [vmem:[#allocation2 + $0x38] sm:$0xff] %vm1099_vm3, %v1090_v23 }
0x106c   : > { %3139 = vrot.lane.b32.xlu0 %v3123_v31, %s4441_s11 }
0x106d   : > { %v2116_v40 = vpop.permute.xlu0 %2115 }
0x106e   : > { %2136 = vst.msk [vmem:[#allocation2 + $0x20] sm:$0xff] %vm2131_vm6, %v2116_v40  ;;  %v1430_v39 = vpop.permute.xlu1 %1429 }
0x106f   : > { %1449 = vst.msk [vmem:[#allocation2 + $0x28] sm:$0xff] %vm1443_vm4, %v1430_v39 }
0x1070   : > { %2807 = vrot.lane.b32.xlu0 %v5548_v34, %s4440_s10 }
0x1071   : > { %v4366_v43 = vpop.eup %4365  ;;  %v2120_v8 = vpop.permute.xlu0 %2119 }
0x1072   : > { %2138 = vst.msk [vmem:[#allocation2 + $0x30] sm:$0xff] %vm2131_vm6, %v2120_v8  ;;  %v1434_v26 = vpop.permute.xlu1 %1433  ;;  %v3127_v19 = vmul.f32 %v4366_v43, %v5667_v58  ;;  %v4368_v33 = vpop.eup %4367 }
0x1073   : > { %1451 = vst.msk [vmem:[#allocation2 + $0x38] sm:$0xff] %vm1443_vm4, %v1434_v26  ;;  %v3129_v24 = vmul.f32 %v4368_v33, %v5665_v21 }
0x1074   : > { %3147 = vrot.lane.b32.xlu0 %v3127_v19, %s4441_s11 }
0x1075   : > { %v2460_v7 = vpop.permute.xlu0 %2459 }
0x1076   : > { %2480 = vst.msk [vmem:[#allocation2 + $0x20] sm:$0xff] %vm2475_vm7, %v2460_v7  ;;  %v1774_v10 = vpop.permute.xlu1 %1773 }
0x1077   : > { %1793 = vst.msk [vmem:[#allocation2 + $0x28] sm:$0xff] %vm1787_vm5, %v1774_v10 }
0x1078   : > { %3151 = vrot.lane.b32.xlu0 %v3129_v24, %s4441_s11 }
0x1079   : > { %v2464_v34 = vpop.permute.xlu0 %2463 }
0x107a   : > { %2482 = vst.msk [vmem:[#allocation2 + $0x30] sm:$0xff] %vm2475_vm7, %v2464_v34  ;;  %v1778_v48 = vpop.permute.xlu1 %1777 }
0x107b   : > { %1795 = vst.msk [vmem:[#allocation2 + $0x38] sm:$0xff] %vm1787_vm5, %v1778_v48 }
0x107d   : > { %v2804_v36 = vpop.permute.xlu0 %2803 }
0x107e   : > { %2824 = vst.msk [vmem:[#allocation2 + $0x20] sm:$0xff] %vm2819_vm8, %v2804_v36  ;;  %v2118_v6 = vpop.permute.xlu1 %2117 }
0x107f   : > { %2137 = vst.msk [vmem:[#allocation2 + $0x28] sm:$0xff] %vm2131_vm6, %v2118_v6 }
0x1082   : > { %v2122_v35 = vpop.permute.xlu1 %2121 }
0x1083   : > { %2139 = vst.msk [vmem:[#allocation2 + $0x38] sm:$0xff] %vm2131_vm6, %v2122_v35 }
0x1086   : > { %v2462_v51 = vpop.permute.xlu1 %2461 }
0x1087   : > { %2481 = vst.msk [vmem:[#allocation2 + $0x28] sm:$0xff] %vm2475_vm7, %v2462_v51 }
0x108a   : > { %v2466_v45 = vpop.permute.xlu1 %2465 }
0x108b   : > { %2483 = vst.msk [vmem:[#allocation2 + $0x38] sm:$0xff] %vm2475_vm7, %v2466_v45 }
0x108e   : > { %v2806_v32 = vpop.permute.xlu1 %2805 }
0x108f   : > { %2825 = vst.msk [vmem:[#allocation2 + $0x28] sm:$0xff] %vm2819_vm8, %v2806_v32 }
0x10c9   : > { %v3146_v55 = vpop.permute.xlu1 %3145 }
0x10ca   : > { %3167 = vst.msk [vmem:[#allocation2 + $0x18] sm:$0xff] %vm3163_vm9, %v3146_v55 }
0x10cd   : > { %v3142_v4 = vpop.permute.xlu1 %3141 }
0x10ce   : > { %3165 = vst.msk [vmem:[#allocation2 + $0x8] sm:$0xff] %vm3163_vm9, %v3142_v4 }
0x10d1   : > { %v2810_v14 = vpop.permute.xlu1 %2809  ;;  %v3175_v47 = vld [vmem:[#allocation2 + $0x18] sm:$0xff] }
0x10d2   : > { %2827 = vst.msk [vmem:[#allocation2 + $0x38] sm:$0xff] %vm2819_vm8, %v2810_v14 }
0x10d5   : > { %v3150_v1 = vpop.permute.xlu1 %3149  ;;  %v3173_v18 = vld [vmem:[#allocation2 + $0x8] sm:$0xff] }
0x10d6   : > { %3169 = vst.msk [vmem:[#allocation2 + $0x28] sm:$0xff] %vm3163_vm9, %v3150_v1 }
0x10d9   : > { %v3154_v29 = vpop.permute.xlu1 %3153 }
0x10da   : > { %3171 = vst.msk [vmem:[#allocation2 + $0x38] sm:$0xff] %vm3163_vm9, %v3154_v29  ;;  %v3144_v52 = vpop.permute.xlu0 %3143 }
0x10db   : > { %3166 = vst.msk [vmem:[#allocation2 + $0x10] sm:$0xff] %vm3163_vm9, %v3144_v52 }
0x10dd   : > { %v3177_v62 = vld [vmem:[#allocation2 + $0x28] sm:$0xff] }
0x10de   : > { %v3140_v56 = vpop.permute.xlu0 %3139 }
0x10df   : > { %3164 = vst.msk [vmem:[#allocation2] sm:$0xff] %vm3163_vm9, %v3140_v56 }
0x10e1   : > { %v3179_v54 = vld [vmem:[#allocation2 + $0x38] sm:$0xff] }
0x10e2   : > { %v2808_v38 = vpop.permute.xlu0 %2807  ;;  %v3174_v15 = vld [vmem:[#allocation2 + $0x10] sm:$0xff] }
0x10e3   : > { %2826 = vst.msk [vmem:[#allocation2 + $0x30] sm:$0xff] %vm2819_vm8, %v2808_v38  ;;  %v3181_v25 = vpack.c.bf16 %v3175_v47, %v3174_v15 }
0x10e6   : > { %v3148_v30 = vpop.permute.xlu0 %3147  ;;  %v3172_v60 = vld [vmem:[#allocation2] sm:$0xff] }
0x10e7   : > { %3168 = vst.msk [vmem:[#allocation2 + $0x20] sm:$0xff] %vm3163_vm9, %v3148_v30  ;;  %v3180_v42 = vpack.c.bf16 %v3173_v18, %v3172_v60 }
0x10e9   : > { %4016 = vmatprep.mubr.msk.bf16.mxu1 %vm276_vm0, %v3180_v42 }
0x10ea   : > { %4017 = vmatmul.mubr.msk.bf16.vlgmr.msra.gmra.mrb[64].mxu1 %vm276_vm0, %v3181_v25  ;;  %v3152_v21 = vpop.permute.xlu0 %3151 }
0x10eb   : > { %3170 = vst.msk [vmem:[#allocation2 + $0x30] sm:$0xff] %vm3163_vm9, %v3152_v21 }
0x10ee   : > { %v3176_v58 = vld [vmem:[#allocation2 + $0x20] sm:$0xff] }
0x10ef   : > { %v3182_v53 = vpack.c.bf16 %v3177_v62, %v3176_v58 }
0x10f1   : > { %4020 = vmatprep.mubr.msk.bf16.mxu1 %vm276_vm0, %v3182_v53 }
0x10f2   : > { %v3178_v0 = vld [vmem:[#allocation2 + $0x30] sm:$0xff] }
0x10f3   : > { %v3183_v44 = vpack.c.bf16 %v3179_v54, %v3178_v0 }
0x10f5   : > { %4021 = vmatmul.mubr.msk.bf16.gmra.mrb[68].mxu1 %vm276_vm0, %v3183_v44 }
0x11bd   : > { %v4018_v28 = vpop.f32.mrb[64].mxu1 }
0x11be   : > { %v3262_v11 = vadd.f32 %v4018_v28, %v3441_v20  ;;  %v3253_v37 = vpop.f32.mrb[65].mxu1 }
0x11bf   : > { %v3254_v49 = vadd.f32 %v3441_v20, %v3253_v37  ;;  %v4019_v22 = vpop.f32.mrb[66].mxu1 }
0x11c0   : > { %3286 = vst.msk [vmem:[%s266_s23 + $0x10] sm:$0xff] %vm276_vm0, %v3262_v11  ;;  %v3265_v59 = vadd.f32 %v4019_v22, %v3441_v20  ;;  %v3256_v63 = vpop.f32.mrb[67].mxu1 }
0x11c1   : > { %3284 = vst.msk [vmem:[%s266_s23] sm:$0xff] %vm276_vm0, %v3254_v49  ;;  %v3257_v9 = vadd.f32 %v3441_v20, %v3256_v63 }
0x11c2   : > { %3287 = vst.msk [vmem:[%s266_s23 + $0x18] sm:$0xff] %vm276_vm0, %v3265_v59 }
0x11c3   : > { %3285 = vst.msk [vmem:[%s266_s23 + $0x8] sm:$0xff] %vm276_vm0, %v3257_v9 }
0x11c8   : > { %v4022_v57 = vpop.f32.mrb[68].mxu1 }
0x11c9   : > { %v3278_v17 = vadd.f32 %v4022_v57, %v3441_v20  ;;  %v3269_v3 = vpop.f32.mrb[69].mxu1 }
0x11ca   : > { %v3270_v61 = vadd.f32 %v3441_v20, %v3269_v3  ;;  %v4023_v16 = vpop.f32.mrb[70].mxu1 }
0x11cb   : > { %3290 = vst.msk [vmem:[%s266_s23 + $0x30] sm:$0xff] %vm276_vm0, %v3278_v17  ;;  %v3281_v2 = vadd.f32 %v4023_v16, %v3441_v20  ;;  %v3272_v41 = vpop.f32.mrb[71].mxu1 }
0x11cc   : > { %3288 = vst.msk [vmem:[%s266_s23 + $0x20] sm:$0xff] %vm276_vm0, %v3270_v61  ;;  %v3273_v13 = vadd.f32 %v3441_v20, %v3272_v41 }
0x11cd   : > { %3291 = vst.msk [vmem:[%s266_s23 + $0x38] sm:$0xff] %vm276_vm0, %v3281_v2 }
0x11ce   : > { %3289 = vst.msk [vmem:[%s266_s23 + $0x28] sm:$0xff] %vm276_vm0, %v3273_v13 }
0x11cf PF: > { %s17_s21 = sadd.s32 1, %s4407_s21  }
0x11d0   : > { %p14_p3 = scmp.ge.s32.totalorder %s17_s21, 4  }
0x11d2   :  { %16 = sbr.rel (!%p14_p3) target bundleno = 1 (0x1), region = 86 }
0x11d9   :  { %3313 = vsyncpa [#allocation4], 1 }
0x11da   :  { %3315 = vsyncpa [#allocation4 + $0x1], 1 }

</bundles_post_ra>
